<compile_context>
chip_gen: v7x
topology: tpu7x:2x2x1
jax: 0.10.0
libtpu: 0.0.40
codegen_flags: <defaults>
</compile_context>

<pallas_src>
import functools

import jax
import jax.numpy as jnp
from jax.experimental import pallas as pl
from jax.experimental.pallas import tpu as pltpu

_LANE = 128
_SUBLANE = 8
_BF16_SUBLANE = 16
_MAX_BLOCK_ROWS = 4096          # 4096 x 128 x f32 = 2 MiB / tile (1 MiB in bf16)
_MAX_PATCH_COLS = 4096
_REDUCE_VMEM_LIMIT = 32 * 1024 * 1024


def _round_up(x, m):
    return (x + m - 1) // m * m


# ---------------------------------------------------------------------------
# Kernel 1: fused 3x3 conv (+ bias, optional ReLU), NHWC, bf16 MXU operands.
#   The 3x3 structure is handled in-kernel: three H-shifted views are tiled by
#   BlockSpec and the 3 dw taps are static slices, so no im2col array is ever
#   materialised in HBM.
# ---------------------------------------------------------------------------
def _conv3x3_kernel(x0_ref, x1_ref, x2_ref, w_ref, b_ref, o_ref, *,
                    th, wout, apply_relu):
    np_ = o_ref.shape[-1]
    row_refs = (x0_ref, x1_ref, x2_ref)
    acc = jnp.zeros((th * wout, np_), jnp.float32)
    for dh in range(3):
        row = row_refs[dh][0]                                # (th, W+2, Cin) bf16
        for dw in range(3):
            lhs = row[:, dw:dw + wout, :].reshape(th * wout, -1)
            acc = acc + jnp.dot(lhs, w_ref[dh * 3 + dw],
                                preferred_element_type=jnp.float32)
    acc = acc + b_ref[...]
    if apply_relu:
        acc = jnp.maximum(acc, 0.0)
    o_ref[...] = acc.reshape(1, th, wout, np_).astype(o_ref.dtype)


def _pick_row_tile(h, w):
    """Largest divisor of H keeping <= 2048 GEMM rows per grid step."""
    best = 1
    for d in range(1, h + 1):
        if h % d == 0 and d * w <= 2048:
            best = d
    return best


def _conv3x3_fused(x_nhwc, w9, b_pad, *, apply_relu, cout):
    """3x3 'same' conv on NHWC input. w9: (9, Cin, Np) bf16, b_pad: (1, Np)."""
    n, h, w, c = x_nhwc.shape
    np_ = w9.shape[-1]
    x_bf = x_nhwc.astype(jnp.bfloat16)
    xp = jnp.pad(x_bf, ((0, 0), (1, 1), (1, 1), (0, 0)))
    views = [xp[:, dh:dh + h] for dh in range(3)]            # (n, h, w+2, c) each
    th = _pick_row_tile(h, w)
    in_idx = lambda bi, ri: (bi, ri, 0, 0)
    out = pl.pallas_call(
        functools.partial(_conv3x3_kernel, th=th, wout=w, apply_relu=apply_relu),
        out_shape=jax.ShapeDtypeStruct((n, h, w, np_), jnp.bfloat16),
        grid=(n, h // th),
        in_specs=[pl.BlockSpec((1, th, w + 2, c), in_idx),
                  pl.BlockSpec((1, th, w + 2, c), in_idx),
                  pl.BlockSpec((1, th, w + 2, c), in_idx),
                  pl.BlockSpec((9, c, np_), lambda bi, ri: (0, 0, 0)),
                  pl.BlockSpec((1, np_), lambda bi, ri: (0, 0))],
        out_specs=pl.BlockSpec((1, th, w, np_), in_idx),
        compiler_params=pltpu.CompilerParams(
            dimension_semantics=("parallel", "parallel")),
    )(views[0], views[1], views[2], w9, b_pad)
    if cout != np_:
        out = out[..., :cout]
    return out


# ---------------------------------------------------------------------------
# Kernel 2: sum(|x - g|) or sum((x - g)^2) over lane-dense (rows, 128) slabs,
#           split 2-way over a 'parallel' grid axis (both v7x TensorCores).
# ---------------------------------------------------------------------------
def _diff_reduce_kernel(x_ref, g_ref, o_ref, acc_ref, *, square):
    i = pl.program_id(1)

    @pl.when(i == 0)
    def _():
        acc_ref[...] = jnp.zeros_like(acc_ref)

    d = x_ref[...].astype(jnp.float32) - g_ref[...].astype(jnp.float32)
    v = d * d if square else jnp.abs(d)
    tr = v.shape[0]
    acc_ref[...] += v.reshape(tr // _SUBLANE, _SUBLANE, _LANE).sum(axis=0)

    @pl.when(i == pl.num_programs(1) - 1)
    def _():
        o_ref[0, 0, 0] = jnp.sum(acc_ref[...])


def _to_slabs(x, g):
    fx = jnp.ravel(x)
    fg = jnp.ravel(g)
    nelem = fx.shape[0]
    rows = pl.cdiv(nelem, _LANE)
    block_rows = min(_MAX_BLOCK_ROWS, _round_up(rows, _BF16_SUBLANE))
    n_par = 2 if pl.cdiv(rows, block_rows) >= 2 else 1
    padded_rows = _round_up(rows, n_par * block_rows)
    pad = padded_rows * _LANE - nelem
    if pad:
        fx = jnp.pad(fx, (0, pad))
        fg = jnp.pad(fg, (0, pad))
    return (fx.reshape(padded_rows, _LANE), fg.reshape(padded_rows, _LANE),
            block_rows, n_par)


def _diff_reduce_sum(x, g, *, square):
    x_slab, g_slab, block_rows, n_par = _to_slabs(x, g)
    steps = x_slab.shape[0] // (block_rows * n_par)
    in_idx = lambda p, i: (p * steps + i, 0)
    out = pl.pallas_call(
        functools.partial(_diff_reduce_kernel, square=square),
        out_shape=jax.ShapeDtypeStruct((n_par, 1, 1), jnp.float32),
        grid=(n_par, steps),
        in_specs=[pl.BlockSpec((block_rows, _LANE), in_idx),
                  pl.BlockSpec((block_rows, _LANE), in_idx)],
        out_specs=pl.BlockSpec((1, 1, 1), lambda p, i: (p, 0, 0)),
        scratch_shapes=[pltpu.VMEM((_SUBLANE, _LANE), jnp.float32)],
        compiler_params=pltpu.CompilerParams(
            dimension_semantics=("parallel", "arbitrary"),
            vmem_limit_bytes=_REDUCE_VMEM_LIMIT),
    )(x_slab, g_slab)
    return jnp.sum(out)


def _l1_mean(x, g):
    """torch.nn.L1Loss(reduction='mean') equivalent."""
    return _diff_reduce_sum(x, g, square=False) / jnp.float32(x.size)


# ---------------------------------------------------------------------------
# Kernel 3: patch cosine loss in a lane-major (k*k, R) layout.
#   Per column (= one k*k patch of one channel):
#     loss = (1 - cos(x, g)) [* std(g, unbiased)]
#   Partial sums per 'parallel' shard; mean is taken in the wrapper.
# ---------------------------------------------------------------------------
def _patch_cos_kernel(x_ref, g_ref, o_ref, acc_ref, *, total_cols, tile_cols,
                      use_std):
    i = pl.program_id(1)

    @pl.when(i == 0)
    def _():
        acc_ref[...] = jnp.zeros_like(acc_ref)

    x = x_ref[...].astype(jnp.float32)                  # (P, T), P = k*k
    g = g_ref[...].astype(jnp.float32)
    p = x.shape[0]
    dot = jnp.sum(x * g, axis=0, keepdims=True)
    nx2 = jnp.sum(x * x, axis=0, keepdims=True)
    ng2 = jnp.sum(g * g, axis=0, keepdims=True)
    # eps-clamped rsqrt: EUP op, avoids 0/0 NaN for all-zero patches/padding.
    cos = dot * jax.lax.rsqrt(jnp.maximum(nx2 * ng2, 1e-24))
    loss = 1.0 - cos
    if use_std:
        mu = jnp.sum(g, axis=0, keepdims=True) / p
        var = jnp.maximum((ng2 - p * mu * mu) / (p - 1), 0.0)  # unbiased std
        loss = loss * jnp.sqrt(var)
    tile_idx = pl.program_id(0) * pl.num_programs(1) + i
    cols = tile_idx * tile_cols + jax.lax.broadcasted_iota(
        jnp.int32, (1, tile_cols), 1)
    acc_ref[...] += jnp.where(cols < total_cols, loss, 0.0)

    @pl.when(i == pl.num_programs(1) - 1)
    def _():
        o_ref[0, 0, 0] = jnp.sum(acc_ref[...])


def _patch_cosine_mean(x_cols, g_cols, *, use_std):
    p, r = x_cols.shape
    tile = min(_MAX_PATCH_COLS, _round_up(r, _LANE))
    n_par = 2 if pl.cdiv(r, tile) >= 2 else 1
    rp = _round_up(r, n_par * tile)
    if rp != r:
        x_cols = jnp.pad(x_cols, ((0, 0), (0, rp - r)))
        g_cols = jnp.pad(g_cols, ((0, 0), (0, rp - r)))
    steps = rp // (tile * n_par)
    in_idx = lambda pi, i: (0, pi * steps + i)
    out = pl.pallas_call(
        functools.partial(_patch_cos_kernel, total_cols=r, tile_cols=tile,
                          use_std=use_std),
        out_shape=jax.ShapeDtypeStruct((n_par, 1, 1), jnp.float32),
        grid=(n_par, steps),
        in_specs=[pl.BlockSpec((p, tile), in_idx),
                  pl.BlockSpec((p, tile), in_idx)],
        out_specs=pl.BlockSpec((1, 1, 1), lambda pi, i: (pi, 0, 0)),
        scratch_shapes=[pltpu.VMEM((1, tile), jnp.float32)],
        compiler_params=pltpu.CompilerParams(
            dimension_semantics=("parallel", "arbitrary"),
            vmem_limit_bytes=_REDUCE_VMEM_LIMIT),
    )(x_cols, g_cols)
    return jnp.sum(out) / jnp.float32(r)


# ---------------------------------------------------------------------------
# XLA-side plumbing: maxpool, patch extraction (strided slices, no gather).
# ---------------------------------------------------------------------------
def _maxpool2_nhwc(x):
    n, h, w, c = x.shape
    return x.reshape(n, h // 2, 2, w // 2, 2, c).max(axis=(2, 4))


def _patch_cols(x_nhwc, k, s):
    """PatchesKernel3D equivalent, lane-major: NHWC -> (k*k, N*Ho*Wo*C).
    Each column is one k*k spatial patch of one channel; column order is
    irrelevant because the loss is a mean over patches."""
    n, h, w, c = x_nhwc.shape
    ho = (h - k) // s + 1
    wo = (w - k) // s + 1
    rows = []
    for a in range(k):
        for b in range(k):
            sl = jax.lax.slice(
                x_nhwc, (0, a, b, 0),
                (n, a + s * (ho - 1) + 1, b + s * (wo - 1) + 1, c),
                (1, s, s, 1))                       # (n, ho, wo, c)
            rows.append(sl.reshape(1, n * ho * wo * c))
    return jnp.concatenate(rows, axis=0)            # (k*k, R)


# ---------------------------------------------------------------------------
# VGG-style feature extractor (deterministic random weights, NHWC internally).
# ---------------------------------------------------------------------------
class _VGGStyleExtractor:
    """Truncated VGG-style extractor mirroring basicsr's VGGFeatureExtractor
    interface: named conv layers (features taken pre-ReLU), 2x2 maxpool between
    stages, optional input normalisation.  Channel counts follow VGG19."""

    _ARCH = [('conv1_1', 3, 64), ('conv1_2', 64, 64), ('pool1', None, None),
             ('conv2_1', 64, 128), ('conv2_2', 128, 128)]

    def __init__(self, layer_name_list, use_input_norm=True, range_norm=False,
                 key=None):
        self.layer_name_list = list(layer_name_list)
        self.use_input_norm = use_input_norm
        self.range_norm = range_norm
        names = [a[0] for a in self._ARCH]
        unknown = [l for l in self.layer_name_list if l not in names]
        if unknown:
            raise ValueError(f'Unsupported layers for in-script extractor: {unknown}')
        if key is None:
            key = jax.random.PRNGKey(0)
        self.params = {}
        for name, cin, cout in self._ARCH:
            if cin is None:
                continue
            key, kw = jax.random.split(key)
            scale = jnp.sqrt(2.0 / (cin * 9))
            w = scale * jax.random.normal(kw, (cout, cin, 3, 3), jnp.float32)
            b = jnp.zeros((cout,), jnp.float32)
            np_ = _round_up(cout, _LANE)
            w9 = jnp.transpose(w, (2, 3, 1, 0)).reshape(9, cin, cout)
            w9 = jnp.pad(w9, ((0, 0), (0, 0), (0, np_ - cout))).astype(jnp.bfloat16)
            bpad = jnp.pad(b, (0, np_ - cout)).reshape(1, np_)
            self.params[name] = dict(w=w, b=b, w9=w9, bpad=bpad, cout=cout)
        self.mean = jnp.array([0.485, 0.456, 0.406], jnp.float32).reshape(1, 3, 1, 1)
        self.std = jnp.array([0.229, 0.224, 0.225], jnp.float32).reshape(1, 3, 1, 1)
        last = max(i for i, a in enumerate(self._ARCH)
                   if a[0] in self.layer_name_list)
        self._arch = self._ARCH[:last + 1]

    def __call__(self, x):
        """x: (N, 3, H, W) (PyTorch layout). Features returned in NHWC bf16."""
        if self.range_norm:
            x = (x + 1.0) / 2.0
        if self.use_input_norm:
            x = (x - self.mean) / self.std
        h = jnp.transpose(x, (0, 2, 3, 1)).astype(jnp.bfloat16)
        feats = {}
        for name, _, _ in self._arch:
            if name.startswith('pool'):
                h = _maxpool2_nhwc(h)
                if name in self.layer_name_list:
                    feats[name] = h
                continue
            prm = self.params[name]
            wanted = name in self.layer_name_list
            # Requested features are pre-ReLU -> keep ReLU out of the fused
            # conv for those layers and apply it afterwards.
            y = _conv3x3_fused(h, prm['w9'], prm['bpad'],
                               apply_relu=not wanted, cout=prm['cout'])
            if wanted:
                feats[name] = y
                y = jnp.maximum(y, 0)
            h = y
        return feats


# ---------------------------------------------------------------------------
# PerceptualLoss module equivalent.
# ---------------------------------------------------------------------------
class PerceptualLossPallas:
    """basicsr PerceptualLoss forward (perceptual + optional style loss)."""

    def __init__(self, layer_weights, vgg_type='vgg19', use_input_norm=True,
                 range_norm=False, perceptual_weight=1.0,
                 perceptual_patch_weight=1.0, style_weight=0.0,
                 criterion='patch', perceptual_kernels=(4, 8),
                 use_std_to_force=True, key=None):
        del vgg_type  # TODO(synk): pretrained VGG19 weights unavailable in-script.
        if criterion not in ('l1', 'fro', 'patch'):
            raise NotImplementedError(
                f'{criterion} criterion has not been supported.')
        self.perceptual_weight = float(perceptual_weight)
        self.patch_weights = float(perceptual_patch_weight)
        self.style_weight = float(style_weight)
        self.layer_weights = dict(layer_weights)
        self.perceptual_kernels = list(perceptual_kernels)
        self.use_std_to_force = bool(use_std_to_force)
        self.criterion_type = criterion
        self.vgg = _VGGStyleExtractor(
            layer_name_list=list(layer_weights.keys()),
            use_input_norm=use_input_norm, range_norm=range_norm, key=key)

    # L1Loss(reduction='mean')
    def _criterion(self, a, b):
        return _l1_mean(a, b)

    def _patch(self, xf, gf):
        loss = jnp.float32(0.0)
        for ksz in self.perceptual_kernels:
            xr = _patch_cols(xf, ksz, ksz // 2)
            gr = _patch_cols(gf, ksz, ksz // 2)
            loss = loss + _patch_cosine_mean(xr, gr, use_std=self.use_std_to_force)
        return loss

    def _gram_mat(self, x_nhwc):
        n, h, w, c = x_nhwc.shape
        f = x_nhwc.reshape(n, h * w, c).astype(jnp.float32)
        return jnp.einsum('nxc,nxd->ncd', f, f) / (c * h * w)

    def __call__(self, x, gt):
        x_features = self.vgg(x)
        gt_features = self.vgg(jax.lax.stop_gradient(gt))

        if self.perceptual_weight > 0:
            percep_loss = jnp.float32(0.0)
            for k in x_features.keys():
                xf, gf = x_features[k], gt_features[k]
                lw = self.layer_weights[k]
                if self.criterion_type == 'fro':
                    percep_loss += jnp.sqrt(
                        _diff_reduce_sum(xf, gf, square=True)) * lw
                elif self.criterion_type == 'patch':
                    if self.patch_weights == 0:
                        percep_loss += self._criterion(xf, gf) * lw
                    else:
                        percep_loss += (self._patch(xf, gf) * lw * self.patch_weights
                                        + self._criterion(xf, gf) * lw)
                else:  # 'l1'
                    percep_loss += self._criterion(xf, gf) * lw
            percep_loss = percep_loss * self.perceptual_weight
        else:
            percep_loss = None

        if self.style_weight > 0:
            style_loss = jnp.float32(0.0)
            for k in x_features.keys():
                gx = self._gram_mat(x_features[k])
                gg = self._gram_mat(gt_features[k])
                lw = self.layer_weights[k]
                if self.criterion_type == 'fro':
                    style_loss += jnp.sqrt(
                        _diff_reduce_sum(gx, gg, square=True)) * lw
                else:
                    style_loss += self._criterion(gx, gg) * lw
            style_loss = style_loss * self.style_weight
        else:
            style_loss = None

        return percep_loss, style_loss


# ---------------------------------------------------------------------------
# Pure-JAX reference (criterion='patch' path) for the sanity check.
# ---------------------------------------------------------------------------
def _reference_perceptual_loss(loss_fn, x, gt):
    vgg = loss_fn.vgg

    def feats(img):
        h = img
        if vgg.range_norm:
            h = (h + 1.0) / 2.0
        if vgg.use_input_norm:
            h = (h - vgg.mean) / vgg.std
        h = h.astype(jnp.bfloat16)
        out = {}
        for name, _, _ in vgg._arch:
            if name.startswith('pool'):
                n_, c_, hh, ww = h.shape
                h = h.reshape(n_, c_, hh // 2, 2, ww // 2, 2).max(axis=(3, 5))
                if name in vgg.layer_name_list:
                    out[name] = h
                continue
            w = vgg.params[name]['w'].astype(jnp.bfloat16)
            b = vgg.params[name]['b']
            y = jax.lax.conv_general_dilated(
                h, w, (1, 1), ((1, 1), (1, 1)),
                dimension_numbers=('NCHW', 'OIHW', 'NCHW'),
                preferred_element_type=jnp.float32)
            y = (y + b.reshape(1, -1, 1, 1)).astype(jnp.bfloat16)
            if name in vgg.layer_name_list:
                out[name] = y
            h = jnp.maximum(y, 0)
        return out

    xf, gf = feats(x), feats(gt)
    total = jnp.float32(0.0)
    for k, lw in loss_fn.layer_weights.items():
        a = xf[k].astype(jnp.float32)
        g = gf[k].astype(jnp.float32)
        l1 = jnp.mean(jnp.abs(a - g))
        patch = jnp.float32(0.0)
        for ksz in loss_fn.perceptual_kernels:
            xr = _patch_cols(jnp.transpose(a, (0, 2, 3, 1)), ksz, ksz // 2)
            gr = _patch_cols(jnp.transpose(g, (0, 2, 3, 1)), ksz, ksz // 2)
            dot = jnp.sum(xr * gr, axis=0)
            cos = (dot / jnp.sqrt(jnp.sum(xr * xr, axis=0))
                   / jnp.sqrt(jnp.sum(gr * gr, axis=0)))
            if loss_fn.use_std_to_force:
                dy = jnp.std(gr, axis=0, ddof=1)
                patch = patch + jnp.mean((1.0 - cos) * dy)
            else:
                patch = patch + jnp.mean(1.0 - cos)
        total = total + patch * lw * loss_fn.patch_weights + l1 * lw
    return total * loss_fn.perceptual_weight


# ---------------------------------------------------------------------------
# Demo / sanity check
# ---------------------------------------------------------------------------
if __name__ == "__main__":
    key = jax.random.PRNGKey(0)
    kx, kg, kw = jax.random.split(key, 3)

    N, C, H, W = 2, 3, 16, 16  # NCHW image pairs, same layout as PyTorch
    x = jax.random.uniform(kx, (N, C, H, W), jnp.float32)
    gt = jax.random.uniform(kg, (N, C, H, W), jnp.float32)

    layer_weights = {'conv1_2': 0.5, 'conv2_2': 1.0}
    loss_fn = PerceptualLossPallas(
        layer_weights,
        perceptual_weight=1.0,
        perceptual_patch_weight=1.0,
        style_weight=0.0,
        criterion='patch',
        perceptual_kernels=(4, 8),
        use_std_to_force=True,
        key=kw)

    percep_loss, style_loss = loss_fn(x, gt)
    percep_loss = jax.block_until_ready(percep_loss)
    assert style_loss is None

    ref = jax.block_until_ready(_reference_perceptual_loss(loss_fn, x, gt))
    assert jnp.isfinite(percep_loss), percep_loss
    assert jnp.allclose(percep_loss, ref, rtol=2e-2, atol=2e-3), (percep_loss, ref)

    print("KERNEL_OK")
</pallas_src>

<mosaic_0001>
module attributes {stable_mosaic.version = 11 : i64} {
  func.func @_conv3x3_kernel(%arg0: i32, %arg1: i32, %arg2: memref<1x16x18x3xbf16, #tpu.memory_space<vmem>>, %arg3: memref<1x16x18x3xbf16, #tpu.memory_space<vmem>>, %arg4: memref<1x16x18x3xbf16, #tpu.memory_space<vmem>>, %arg5: memref<9x3x128xbf16, #tpu.memory_space<vmem>>, %arg6: memref<1x128xf32, #tpu.memory_space<vmem>>, %arg7: memref<1x16x16x128xbf16, #tpu.memory_space<vmem>>) attributes {dimension_semantics = [#tpu.dimension_semantics<parallel>, #tpu.dimension_semantics<parallel>], iteration_bounds = array<i64: 2, 1>, scalar_prefetch = 0 : i64, scratch_operands = 0 : i64, tpu.core_type = #tpu.core_type<tc>, window_params = [{transform_indices = @transform_0, window_bounds = array<i64: 1, 16, 18, 3>}, {transform_indices = @transform_1, window_bounds = array<i64: 1, 16, 18, 3>}, {transform_indices = @transform_2, window_bounds = array<i64: 1, 16, 18, 3>}, {pipeline_mode = #tpu.pipeline_mode<synchronous>, transform_indices = @transform_3, window_bounds = array<i64: 9, 3, 128>}, {pipeline_mode = #tpu.pipeline_mode<synchronous>, transform_indices = @transform_4, window_bounds = array<i64: 1, 128>}, {transform_indices = @transform_5, window_bounds = array<i64: 1, 16, 16, 128>}]} {
    %cst = arith.constant 0.000000e+00 : f32
    %0 = vector.broadcast %cst : f32 to vector<256x128xf32>
    %c0 = arith.constant 0 : index
    %c0_0 = arith.constant 0 : index
    %c0_1 = arith.constant 0 : index
    %c0_2 = arith.constant 0 : index
    %1 = vector.load %arg2[%c0, %c0_0, %c0_1, %c0_2] : memref<1x16x18x3xbf16, #tpu.memory_space<vmem>>, vector<1x16x18x3xbf16>
    %2 = vector.shape_cast %1 : vector<1x16x18x3xbf16> to vector<16x18x3xbf16>
    %3 = vector.extract_strided_slice %2 {offsets = [0, 0, 0], sizes = [16, 16, 3], strides = [1, 1, 1]} : vector<16x18x3xbf16> to vector<16x16x3xbf16>
    %4 = vector.shape_cast %3 : vector<16x16x3xbf16> to vector<256x3xbf16>
    %c0_3 = arith.constant 0 : index
    %c0_4 = arith.constant 0 : index
    %c0_5 = arith.constant 0 : index
    %5 = vector.load %arg5[%c0_3, %c0_4, %c0_5] : memref<9x3x128xbf16, #tpu.memory_space<vmem>>, vector<1x3x128xbf16>
    %6 = vector.shape_cast %5 : vector<1x3x128xbf16> to vector<3x128xbf16>
    %cst_6 = arith.constant dense<0.000000e+00> : vector<256x128xf32>
    %7 = tpu.matmul %4, %6, %cst_6 {dimension_numbers = #tpu.dot_dimension_numbers<[1], [0], [0], [1], [0, 0, 1, 1], [], []>} : vector<256x3xbf16>, vector<3x128xbf16>, vector<256x128xf32> -> vector<256x128xf32>
    %8 = arith.addf %0, %7 : vector<256x128xf32>
    %9 = vector.extract_strided_slice %2 {offsets = [0, 1, 0], sizes = [16, 16, 3], strides = [1, 1, 1]} : vector<16x18x3xbf16> to vector<16x16x3xbf16>
    %10 = vector.shape_cast %9 : vector<16x16x3xbf16> to vector<256x3xbf16>
    %c1 = arith.constant 1 : index
    %c0_7 = arith.constant 0 : index
    %c0_8 = arith.constant 0 : index
    %11 = vector.load %arg5[%c1, %c0_7, %c0_8] : memref<9x3x128xbf16, #tpu.memory_space<vmem>>, vector<1x3x128xbf16>
    %12 = vector.shape_cast %11 : vector<1x3x128xbf16> to vector<3x128xbf16>
    %cst_9 = arith.constant dense<0.000000e+00> : vector<256x128xf32>
    %13 = tpu.matmul %10, %12, %cst_9 {dimension_numbers = #tpu.dot_dimension_numbers<[1], [0], [0], [1], [0, 0, 1, 1], [], []>} : vector<256x3xbf16>, vector<3x128xbf16>, vector<256x128xf32> -> vector<256x128xf32>
    %14 = arith.addf %8, %13 : vector<256x128xf32>
    %15 = vector.extract_strided_slice %2 {offsets = [0, 2, 0], sizes = [16, 16, 3], strides = [1, 1, 1]} : vector<16x18x3xbf16> to vector<16x16x3xbf16>
    %16 = vector.shape_cast %15 : vector<16x16x3xbf16> to vector<256x3xbf16>
    %c2 = arith.constant 2 : index
    %c0_10 = arith.constant 0 : index
    %c0_11 = arith.constant 0 : index
    %17 = vector.load %arg5[%c2, %c0_10, %c0_11] : memref<9x3x128xbf16, #tpu.memory_space<vmem>>, vector<1x3x128xbf16>
    %18 = vector.shape_cast %17 : vector<1x3x128xbf16> to vector<3x128xbf16>
    %cst_12 = arith.constant dense<0.000000e+00> : vector<256x128xf32>
    %19 = tpu.matmul %16, %18, %cst_12 {dimension_numbers = #tpu.dot_dimension_numbers<[1], [0], [0], [1], [0, 0, 1, 1], [], []>} : vector<256x3xbf16>, vector<3x128xbf16>, vector<256x128xf32> -> vector<256x128xf32>
    %20 = arith.addf %14, %19 : vector<256x128xf32>
    %c0_13 = arith.constant 0 : index
    %c0_14 = arith.constant 0 : index
    %c0_15 = arith.constant 0 : index
    %c0_16 = arith.constant 0 : index
    %21 = vector.load %arg3[%c0_13, %c0_14, %c0_15, %c0_16] : memref<1x16x18x3xbf16, #tpu.memory_space<vmem>>, vector<1x16x18x3xbf16>
    %22 = vector.shape_cast %21 : vector<1x16x18x3xbf16> to vector<16x18x3xbf16>
    %23 = vector.extract_strided_slice %22 {offsets = [0, 0, 0], sizes = [16, 16, 3], strides = [1, 1, 1]} : vector<16x18x3xbf16> to vector<16x16x3xbf16>
    %24 = vector.shape_cast %23 : vector<16x16x3xbf16> to vector<256x3xbf16>
    %c3 = arith.constant 3 : index
    %c0_17 = arith.constant 0 : index
    %c0_18 = arith.constant 0 : index
    %25 = vector.load %arg5[%c3, %c0_17, %c0_18] : memref<9x3x128xbf16, #tpu.memory_space<vmem>>, vector<1x3x128xbf16>
    %26 = vector.shape_cast %25 : vector<1x3x128xbf16> to vector<3x128xbf16>
    %cst_19 = arith.constant dense<0.000000e+00> : vector<256x128xf32>
    %27 = tpu.matmul %24, %26, %cst_19 {dimension_numbers = #tpu.dot_dimension_numbers<[1], [0], [0], [1], [0, 0, 1, 1], [], []>} : vector<256x3xbf16>, vector<3x128xbf16>, vector<256x128xf32> -> vector<256x128xf32>
    %28 = arith.addf %20, %27 : vector<256x128xf32>
    %29 = vector.extract_strided_slice %22 {offsets = [0, 1, 0], sizes = [16, 16, 3], strides = [1, 1, 1]} : vector<16x18x3xbf16> to vector<16x16x3xbf16>
    %30 = vector.shape_cast %29 : vector<16x16x3xbf16> to vector<256x3xbf16>
    %c4 = arith.constant 4 : index
    %c0_20 = arith.constant 0 : index
    %c0_21 = arith.constant 0 : index
    %31 = vector.load %arg5[%c4, %c0_20, %c0_21] : memref<9x3x128xbf16, #tpu.memory_space<vmem>>, vector<1x3x128xbf16>
    %32 = vector.shape_cast %31 : vector<1x3x128xbf16> to vector<3x128xbf16>
    %cst_22 = arith.constant dense<0.000000e+00> : vector<256x128xf32>
    %33 = tpu.matmul %30, %32, %cst_22 {dimension_numbers = #tpu.dot_dimension_numbers<[1], [0], [0], [1], [0, 0, 1, 1], [], []>} : vector<256x3xbf16>, vector<3x128xbf16>, vector<256x128xf32> -> vector<256x128xf32>
    %34 = arith.addf %28, %33 : vector<256x128xf32>
    %35 = vector.extract_strided_slice %22 {offsets = [0, 2, 0], sizes = [16, 16, 3], strides = [1, 1, 1]} : vector<16x18x3xbf16> to vector<16x16x3xbf16>
    %36 = vector.shape_cast %35 : vector<16x16x3xbf16> to vector<256x3xbf16>
    %c5 = arith.constant 5 : index
    %c0_23 = arith.constant 0 : index
    %c0_24 = arith.constant 0 : index
    %37 = vector.load %arg5[%c5, %c0_23, %c0_24] : memref<9x3x128xbf16, #tpu.memory_space<vmem>>, vector<1x3x128xbf16>
    %38 = vector.shape_cast %37 : vector<1x3x128xbf16> to vector<3x128xbf16>
    %cst_25 = arith.constant dense<0.000000e+00> : vector<256x128xf32>
    %39 = tpu.matmul %36, %38, %cst_25 {dimension_numbers = #tpu.dot_dimension_numbers<[1], [0], [0], [1], [0, 0, 1, 1], [], []>} : vector<256x3xbf16>, vector<3x128xbf16>, vector<256x128xf32> -> vector<256x128xf32>
    %40 = arith.addf %34, %39 : vector<256x128xf32>
    %c0_26 = arith.constant 0 : index
    %c0_27 = arith.constant 0 : index
    %c0_28 = arith.constant 0 : index
    %c0_29 = arith.constant 0 : index
    %41 = vector.load %arg4[%c0_26, %c0_27, %c0_28, %c0_29] : memref<1x16x18x3xbf16, #tpu.memory_space<vmem>>, vector<1x16x18x3xbf16>
    %42 = vector.shape_cast %41 : vector<1x16x18x3xbf16> to vector<16x18x3xbf16>
    %43 = vector.extract_strided_slice %42 {offsets = [0, 0, 0], sizes = [16, 16, 3], strides = [1, 1, 1]} : vector<16x18x3xbf16> to vector<16x16x3xbf16>
    %44 = vector.shape_cast %43 : vector<16x16x3xbf16> to vector<256x3xbf16>
    %c6 = arith.constant 6 : index
    %c0_30 = arith.constant 0 : index
    %c0_31 = arith.constant 0 : index
    %45 = vector.load %arg5[%c6, %c0_30, %c0_31] : memref<9x3x128xbf16, #tpu.memory_space<vmem>>, vector<1x3x128xbf16>
    %46 = vector.shape_cast %45 : vector<1x3x128xbf16> to vector<3x128xbf16>
    %cst_32 = arith.constant dense<0.000000e+00> : vector<256x128xf32>
    %47 = tpu.matmul %44, %46, %cst_32 {dimension_numbers = #tpu.dot_dimension_numbers<[1], [0], [0], [1], [0, 0, 1, 1], [], []>} : vector<256x3xbf16>, vector<3x128xbf16>, vector<256x128xf32> -> vector<256x128xf32>
    %48 = arith.addf %40, %47 : vector<256x128xf32>
    %49 = vector.extract_strided_slice %42 {offsets = [0, 1, 0], sizes = [16, 16, 3], strides = [1, 1, 1]} : vector<16x18x3xbf16> to vector<16x16x3xbf16>
    %50 = vector.shape_cast %49 : vector<16x16x3xbf16> to vector<256x3xbf16>
    %c7 = arith.constant 7 : index
    %c0_33 = arith.constant 0 : index
    %c0_34 = arith.constant 0 : index
    %51 = vector.load %arg5[%c7, %c0_33, %c0_34] : memref<9x3x128xbf16, #tpu.memory_space<vmem>>, vector<1x3x128xbf16>
    %52 = vector.shape_cast %51 : vector<1x3x128xbf16> to vector<3x128xbf16>
    %cst_35 = arith.constant dense<0.000000e+00> : vector<256x128xf32>
    %53 = tpu.matmul %50, %52, %cst_35 {dimension_numbers = #tpu.dot_dimension_numbers<[1], [0], [0], [1], [0, 0, 1, 1], [], []>} : vector<256x3xbf16>, vector<3x128xbf16>, vector<256x128xf32> -> vector<256x128xf32>
    %54 = arith.addf %48, %53 : vector<256x128xf32>
    %55 = vector.extract_strided_slice %42 {offsets = [0, 2, 0], sizes = [16, 16, 3], strides = [1, 1, 1]} : vector<16x18x3xbf16> to vector<16x16x3xbf16>
    %56 = vector.shape_cast %55 : vector<16x16x3xbf16> to vector<256x3xbf16>
    %c8 = arith.constant 8 : index
    %c0_36 = arith.constant 0 : index
    %c0_37 = arith.constant 0 : index
    %57 = vector.load %arg5[%c8, %c0_36, %c0_37] : memref<9x3x128xbf16, #tpu.memory_space<vmem>>, vector<1x3x128xbf16>
    %58 = vector.shape_cast %57 : vector<1x3x128xbf16> to vector<3x128xbf16>
    %cst_38 = arith.constant dense<0.000000e+00> : vector<256x128xf32>
    %59 = tpu.matmul %56, %58, %cst_38 {dimension_numbers = #tpu.dot_dimension_numbers<[1], [0], [0], [1], [0, 0, 1, 1], [], []>} : vector<256x3xbf16>, vector<3x128xbf16>, vector<256x128xf32> -> vector<256x128xf32>
    %60 = arith.addf %54, %59 : vector<256x128xf32>
    %c0_39 = arith.constant 0 : index
    %c0_40 = arith.constant 0 : index
    %61 = vector.load %arg6[%c0_39, %c0_40] : memref<1x128xf32, #tpu.memory_space<vmem>>, vector<1x128xf32>
    %62 = vector.broadcast %61 : vector<1x128xf32> to vector<256x128xf32>
    %63 = arith.addf %60, %62 : vector<256x128xf32>
    %cst_41 = arith.constant 0.000000e+00 : f32
    %64 = vector.broadcast %cst_41 : f32 to vector<256x128xf32>
    %65 = arith.maximumf %63, %64 : vector<256x128xf32>
    %66 = vector.shape_cast %65 : vector<256x128xf32> to vector<1x16x16x128xf32>
    %67 = arith.truncf %66 : vector<1x16x16x128xf32> to vector<1x16x16x128xbf16>
    %c0_42 = arith.constant 0 : index
    %c0_43 = arith.constant 0 : index
    %c0_44 = arith.constant 0 : index
    %c0_45 = arith.constant 0 : index
    %68 = vector.load %arg7[%c0_42, %c0_43, %c0_44, %c0_45] : memref<1x16x16x128xbf16, #tpu.memory_space<vmem>>, vector<1x16x16x128xbf16>
    tpu.vector_store %arg7[%c0_42, %c0_43, %c0_44, %c0_45], %67 {strides = array<i32>} : memref<1x16x16x128xbf16, #tpu.memory_space<vmem>>, vector<1x16x16x128xbf16>,
    return
  }
  func.func @transform_0(%arg0: i32, %arg1: i32) -> (i32, i32, i32, i32) {
    %c0_i32 = arith.constant 0 : i32
    %c0_i32_0 = arith.constant 0 : i32
    %c0_i32_1 = arith.constant 0 : i32
    return %arg0, %arg1, %c0_i32, %c0_i32_0 : i32, i32, i32, i32
  }
  func.func @transform_1(%arg0: i32, %arg1: i32) -> (i32, i32, i32, i32) {
    %c0_i32 = arith.constant 0 : i32
    %c0_i32_0 = arith.constant 0 : i32
    %c0_i32_1 = arith.constant 0 : i32
    return %arg0, %arg1, %c0_i32, %c0_i32_0 : i32, i32, i32, i32
  }
  func.func @transform_2(%arg0: i32, %arg1: i32) -> (i32, i32, i32, i32) {
    %c0_i32 = arith.constant 0 : i32
    %c0_i32_0 = arith.constant 0 : i32
    %c0_i32_1 = arith.constant 0 : i32
    return %arg0, %arg1, %c0_i32, %c0_i32_0 : i32, i32, i32, i32
  }
  func.func @transform_3(%arg0: i32, %arg1: i32) -> (i32, i32, i32) {
    %c0_i32 = arith.constant 0 : i32
    %c0_i32_0 = arith.constant 0 : i32
    %c0_i32_1 = arith.constant 0 : i32
    %c0_i32_2 = arith.constant 0 : i32
    return %c0_i32, %c0_i32_0, %c0_i32_1 : i32, i32, i32
  }
  func.func @transform_4(%arg0: i32, %arg1: i32) -> (i32, i32) {
    %c0_i32 = arith.constant 0 : i32
    %c0_i32_0 = arith.constant 0 : i32
    %c0_i32_1 = arith.constant 0 : i32
    return %c0_i32, %c0_i32_0 : i32, i32
  }
  func.func @transform_5(%arg0: i32, %arg1: i32) -> (i32, i32, i32, i32) {
    %c0_i32 = arith.constant 0 : i32
    %c0_i32_0 = arith.constant 0 : i32
    %c0_i32_1 = arith.constant 0 : i32
    return %arg0, %arg1, %c0_i32, %c0_i32_0 : i32, i32, i32, i32
  }
}

</mosaic_0001>

<bundles_post_ra>
// kernel: tpu_custom_call.1
= control target key start
LH: loop header
LB: loop body
LE: loop exit
PB: predicated region body
PF: predicated region fallthrough
CT: control target
= control target key end

     0   :  { %10 = vsyncpa [#allocation3], 0  ;;  %s8770_s0 = inlined_call_operand.vmem [shape: bf16[2,16,18,3], index: 0, kind: input, shape index: {}]   ;;  %s8771_s1 = inlined_call_operand.vmem [shape: bf16[2,16,18,3], index: 1, kind: input, shape index: {}]   ;;  %s8772_s2 = inlined_call_operand.vmem [shape: bf16[2,16,18,3], index: 2, kind: input, shape index: {}]   ;;  %s8773_s3 = inlined_call_operand.vmem [shape: bf16[9,3,128], index: 3, kind: input, shape index: {}]   ;;  %s8774_s4 = inlined_call_operand.vmem [shape: f32[1,128], index: 4, kind: input, shape index: {}]   ;;  %s8775_s5 = inlined_call_operand.hbm [shape: bf16[2,16,16,128], index: 5, kind: output, shape index: {}]  }
   0x1   :  { %12 = vsyncpa [#allocation3 + $0x1], 0  ;;  %s6640_s18 = smov 0   ;;  %s6642_s19 = smov 0  }
   0x2   :  { %s6644_s20 = smov 0   ;;  %s6646_s21 = smov 0  }
   0x3   :  { %s6648_s22 = smov 0   ;;  %s6650_s23 = smov 0  }
   0x4 LB: > { %s5076_s24 = sadd.s32 4294967295, %s6604_s23   ;;  %s5077_s25 = sadd.s32 4294967294, %s6604_s23   ;;  %s6604_s23 = sphi %s6650_s23, %s18_s23   ;;  %s6600_s22 = sphi %s6648_s22, %s8912_s22   ;;  %s6596_s21 = sphi %s6646_s21, %s8911_s21   ;;  %s6592_s20 = sphi %s6644_s20, %s8910_s20   ;;  %s6588_s19 = sphi %s6642_s19, %s8909_s19   ;;  %s6584_s18 = sphi %s6640_s18, %s8908_s18  }
   0x5   : > { %s30_s26 = sadd.s32 1, %s6600_s22  ;;  %s165_s27 = sadd.s32 1, %s6592_s20 }
   0x6   : > { %p32_p0 = scmp.ge.s32.totalorder %s30_s26, 2  ;;  %p175_p1 = scmp.ne.s32.totalorder %s6592_s20, %s6588_s19 }
   0x7   : > { %p176_p2 = scmp.eq.s32.totalorder %s5076_s24, 1  ;;  %p181_p3 = scmp.ne.s32.totalorder %s6588_s19, %s6584_s18 }
   0x8   : > { %s8914_s26 = smov (%p32_p0, %s30_s26), 0  ;;  %p182_p5 = scmp.eq.s32.totalorder %s5077_s25, 1 }
   0x9   : > { %p6680_p4 = por %p176_p2, %p175_p1  ;;  %s160_s29 = ssub.s32 %s6600_s22, %s8914_s26 }
   0xa   : > { %p5080_p6 = scmp.ge.s32.totalorder %s6604_s23, 1  ;;  %p163_p7 = scmp.eq.s32.totalorder %s160_s29, 0 }
   0xb   : > { %p6687_p8 = por %p182_p5, %p181_p3  ;;  %p248_p9 = scmp.lt.s32.totalorder %s6604_s23, 3 }
   0xc   : > { %s6693_s6 = scalar_select %p163_p7, %s6592_s20, %s165_s27  }
   0xd   : > { %p249_p10 = pnand %p5080_p6, %p248_p9 }
   0xf   : > { %252 = sbr.rel (%p249_p10) target bundleno = 618 (0x26a), region = 40 }
  0x16   : > { %v5085_v0 = vld [vmem:[%s8773_s3 + $0x2] sm:$0x3]  ;;  %vm871_vm0 = vcmask 1040384   ;;  %vm872_vm1 = vcmask 1041408   ;;  %p302_p11 = scmp.lt.s32.totalorder %s6596_s21, 1  ;;  %v6606_v1 = vmov 65535  }
  0x17   : > { %v873_v2 = vsel %vm871_vm0, 4294967295, %v6606_v1  ;;  %v5232_v3 = vld [vmem:[%s8773_s3 + $0x8] sm:$0x3]  ;;  %v384_v5 = vld [vmem:[%s8773_s3] sm:$0x3]  ;;  %vm822_vm4 = vcmask 23552  }
  0x18   : > { %v6702_v4 = vsel %vm872_vm1, %v873_v2, 0  ;;  %s303_s11 = scalar_select %p302_p11, %s6596_s21, 1  ;;  %v5281_v9 = vld [vmem:[%s8773_s3 + $0xa] sm:$0x3]  ;;  %vm385_vm2 = vsmask.f32 3328 }
  0x19   : > { %v876_v6 = vand.u32 %v5085_v0, %v6702_v4  ;;  %v6710_v7 = vand.u32 %v5232_v3, %v6702_v4  ;;  %v6713_v8 = vand.u32 %v6702_v4, %v384_v5  ;;  %v6721_v10 = vand.u32 %v5281_v9, %v6702_v4  ;;  %v5314_v26 = vld [vmem:[%s8773_s3 + $0xc] sm:$0x3]  ;;  %v5166_v55 = vld [vmem:[%s8773_s3 + $0x4] sm:$0x3]  ;;  %s298_s8 = sand.u32 1, %s6588_s19   ;;  %s6607_s24 = smov [#allocation2]  }
  0x1a   : > { %s6718_s16 = smul.u32 192, %s303_s11  ;;  %vm386_vm3 = vsmask.f32 7440  ;;  %v6768_v41 = vand.u32 %v5314_v26, %v6702_v4  ;;  %v6792_v9 = vand.u32 %v5166_v55, %v6702_v4  ;;  %vm1347_vm6 = vcmask 1042432   ;;  %s5081_s9 = sshll.u32 %s298_s8, 7 }
  0x1b   : > { %8807 = vst [vmem:[#allocation5_spill] sm:$0xff] %v6710_v7  ;;  %5748 = vmatprep.subr.bf16.mxu1 %v876_v6  ;;  %5884 = vmatprep.subr.bf16.mxu0 %v6710_v7  ;;  %vm6763_vm5 = vmor %vm385_vm2, %vm386_vm3  ;;  %vm1348_vm7 = vcmask 1046532   ;;  %s8663_s10 = scalar_lea.vmem [#allocation2], %s5081_s9  ;;  %s5499_s11 = sshll.u32 %s6596_s21, 11 }
  0x1c   : > { %5749 = vmatpush3.bf16.msra.mxu1 %v876_v6  ;;  %5885 = vmatpush3.bf16.msra.mxu0 %v6710_v7  ;;  %s6729_s25 = scalar_lea.vmem %s8770_s0, %s6718_s16  ;;  %s6735_s7 = scalar_lea.vmem %s8771_s1, %s6718_s16  ;;  %vm7022_vm8 = vmor %vm1347_vm6, %vm1348_vm7 }
  0x1d   : > { %v336_v11 = vld [vmem:[%s6729_s25] sm:$0xf]  ;;  %v337_v12 = vld [vmem:[%s6729_s25 + $0x4] sm:$0xf]  ;;  %v338_v13 = vld [vmem:[%s6729_s25 + $0x8] sm:$0x1]  ;;  %5782 = vmatprep.subr.bf16.mxu1 %v6713_v8  ;;  %5918 = vmatprep.subr.bf16.mxu0 %v6721_v10  ;;  %s7340_s27 = scalar_lea.vmem %s8772_s2, %s6718_s16  ;;  %s8716_s15 = scalar_lea.hbm %s8775_s5, %s5499_s11 }
  0x1e   : > { %v389_v14 = vshrl.u32 %v336_v11, 16  ;;  %v392_v15 = vshll.u32 %v336_v11, 16  ;;  %v398_v16 = vshll.u32 %v337_v12, 16  ;;  %v402_v17 = vshrl.u32 %v337_v12, 16  ;;  %v6743_v18 = vld [vmem:[%s6735_s7] sm:$0xf] }
  0x1f   : > { %v408_v19 = vshll.u32 %v338_v13, 16  ;;  %v6746_v20 = vld [vmem:[%s6735_s7 + $0x4] sm:$0xf]  ;;  %v6749_v21 = vld [vmem:[%s6735_s7 + $0x8] sm:$0x1]  ;;  %v2131_v28 = vshrl.u32 %v6743_v18, 16 }
  0x20   : > { %v391_v22 = vrot.slane %v389_v14, 4  ;;  %v394_v23 = vrot.slane %v392_v15, 5  ;;  %v400_v24 = vrot.slane %v398_v16, 5  ;;  %v404_v25 = vrot.slane %v402_v17, 4  ;;  %v339_v35 = vld [vmem:[%s6729_s25 + $0xc] sm:$0xf] }
  0x21   : > { %v410_v27 = vrot.slane %v408_v19, 5  ;;  %v2134_v29 = vshll.u32 %v6743_v18, 16  ;;  %v2140_v30 = vshll.u32 %v6746_v20, 16  ;;  %v2144_v33 = vshrl.u32 %v6746_v20, 16  ;;  %v340_v36 = vld [vmem:[%s6729_s25 + $0x10] sm:$0xf] }
  0x22   : > { %v395_v31 = vor.u32 %v394_v23, %v391_v22  ;;  %v405_v32 = vor.u32 %v404_v25, %v400_v24  ;;  %v2150_v34 = vshll.u32 %v6749_v21, 16  ;;  %v2133_v38 = vrot.slane %v2131_v28, 4  ;;  %v341_v47 = vld [vmem:[%s6729_s25 + $0x14] sm:$0x1]  ;;  %v6779_v60 = vld [vmem:[%s6735_s7 + $0xc] sm:$0xf] }
  0x23   : > { %v2136_v39 = vrot.slane %v2134_v29, 5  ;;  %v2142_v40 = vrot.slane %v2140_v30, 5  ;;  %v2146_v44 = vrot.slane %v2144_v33, 4  ;;  %v413_v48 = vshrl.u32 %v339_v35, 16  ;;  %v6782_v1 = vld [vmem:[%s6735_s7 + $0x10] sm:$0xf] }
  0x24   : > { %v396_v42 = vrot.slane %v395_v31, 4  ;;  %v406_v43 = vrot.slane %v405_v32, 4  ;;  %v2152_v45 = vrot.slane %v2150_v34, 5  ;;  %v416_v49 = vshll.u32 %v339_v35, 16  ;;  %v6789_v6 = vld [vmem:[%s6735_s7 + $0x14] sm:$0x1] }
  0x25   : > { %v2137_v46 = vor.u32 %v2136_v39, %v2133_v38  ;;  %v422_v50 = vshll.u32 %v340_v36, 16  ;;  %v2147_v53 = vor.u32 %v2146_v44, %v2142_v40  ;;  %v426_v54 = vshrl.u32 %v340_v36, 16  ;;  %v342_v22 = vld [vmem:[%s6729_s25 + $0x18] sm:$0xf]  ;;  %v344_v32 = vld [vmem:[%s6729_s25 + $0x20] sm:$0x1] }
  0x26   : > { %v401_v51 = vsel %vm6763_vm5, %v396_v42, %v400_v24  ;;  %v411_v52 = vsel %vm6763_vm5, %v406_v43, %v410_v27  ;;  %v415_v58 = vrot.slane %v413_v48, 4  ;;  %v418_v59 = vrot.slane %v416_v49, 5  ;;  %v343_v27 = vld [vmem:[%s6729_s25 + $0x1c] sm:$0xf]  ;;  %v6812_v38 = vld [vmem:[%s6735_s7 + $0x18] sm:$0xf] }
  0x27   : > { %v5086_v56 = vcombine.low %v401_v51, %v411_v52  ;;  %v2138_v57 = vrot.slane %v2137_v46, 4  ;;  %v2148_v61 = vrot.slane %v2147_v53, 4  ;;  %v424_v62 = vrot.slane %v422_v50, 5  ;;  %v6816_v51 = vld [vmem:[%s6735_s7 + $0x1c] sm:$0xf]  ;;  %s4952_s12 = sshll.u32 %s8663_s10, 4  ;;  %s8718_s12 = int_to_ptr.vmem [resolvable:$true] %s4952_s12 }
  0x28   : > { %v428_v63 = vrot.slane %v426_v54, 4  ;;  %v432_v0 = vshll.u32 %v341_v47, 16  ;;  %v2829_v3 = vrot.slane %v6749_v21, 5  ;;  %v419_v5 = vor.u32 %v418_v59, %v415_v58  ;;  %s8724_s21 = scalar_lea.sflag [#allocation3], %s298_s8  ;;  %s6526_s17 = scalar_lea.vmem %s8718_s12, 2048 }
  0x29   : > { %5750 = vmatprep.mubr.msk.bf16.mxu1 %vm822_vm4, %v5086_v56  ;;  %v2143_v2 = vsel %vm6763_vm5, %v2138_v57, %v2142_v40  ;;  %v2153_v11 = vsel %vm6763_vm5, %v2148_v61, %v2152_v45  ;;  %v2155_v14 = vshrl.u32 %v6779_v60, 16  ;;  %v2158_v17 = vshll.u32 %v6779_v60, 16  ;;  %v6821_v57 = vld [vmem:[%s6735_s7 + $0x20] sm:$0x1]  ;;  %p6527_p12 = scmp.ne.s32.totalorder %s8718_s12, %s6526_s17 }
  0x2a   : > { %v429_v12 = vor.u32 %v428_v63, %v424_v62  ;;  %v434_v13 = vrot.slane %v432_v0, 5  ;;  %v5233_v15 = vcombine.low %v2143_v2, %v2153_v11  ;;  %v420_v16 = vrot.slane %v419_v5, 4  ;;  %v345_v63 = vld [vmem:[%s6729_s25 + $0x24] sm:$0xf] }
  0x2b   : > { %v2164_v19 = vshll.u32 %v6782_v1, 16  ;;  %v2157_v24 = vrot.slane %v2155_v14, 4  ;;  %v2168_v25 = vshrl.u32 %v6782_v1, 16  ;;  %v2174_v26 = vshll.u32 %v6789_v6, 16  ;;  %p6528_p13 = pnand %p6527_p12, %p6680_p4 }
  0x2c   : > { %v430_v23 = vrot.slane %v429_v12, 4  ;;  %5886 = vmatprep.mubr.msk.bf16.mxu0 %vm822_vm4, %v5233_v15  ;;  %v425_v28 = vsel %vm6763_vm5, %v420_v16, %v424_v62  ;;  %v2160_v29 = vrot.slane %v2158_v17, 5  ;;  %v437_v42 = vshrl.u32 %v342_v22, 16  ;;  %v346_v15 = vld [vmem:[%s6729_s25 + $0x28] sm:$0xf] }
  0x2d   : > { %v2166_v30 = vrot.slane %v2164_v19, 5  ;;  %v2170_v34 = vrot.slane %v2168_v25, 4  ;;  %v2176_v35 = vrot.slane %v2174_v26, 5  ;;  %v440_v43 = vshll.u32 %v342_v22, 16  ;;  %v347_v26 = vld [vmem:[%s6729_s25 + $0x2c] sm:$0x1]  ;;  %p6529_p0 = pneg %p6528_p13 }
  0x2e   : > { %v435_v33 = vsel %vm6763_vm5, %v430_v23, %v434_v13  ;;  %v2161_v40 = vor.u32 %v2160_v29, %v2157_v24  ;;  %v446_v45 = vshll.u32 %v343_v27, 16  ;;  %v450_v46 = vshrl.u32 %v343_v27, 16 }
  0x2f   : > { %v5087_v39 = vcombine.low %v425_v28, %v435_v33  ;;  %v2171_v44 = vor.u32 %v2170_v34, %v2166_v30  ;;  %v456_v47 = vshll.u32 %v344_v32, 16  ;;  %v439_v49 = vrot.slane %v437_v42, 4  ;;  %v6839_v28 = vld [vmem:[%s6735_s7 + $0x24] sm:$0xf]  ;;  %v6845_v42 = vld [vmem:[%s6735_s7 + $0x28] sm:$0xf] }
  0x30   : > { %v2162_v48 = vrot.slane %v2161_v40, 4  ;;  %v442_v50 = vrot.slane %v440_v43, 5  ;;  %v2179_v52 = vshrl.u32 %v6812_v38, 16  ;;  %v448_v54 = vrot.slane %v446_v45, 5 }
  0x31   : > { %5751 = vmatmul.mubr.msk.bf16.vlgmr.msra.gmra.mrb[0].mxu1 %vm822_vm4, %v5087_v39  ;;  %v2172_v53 = vrot.slane %v2171_v44, 4  ;;  %v452_v55 = vrot.slane %v450_v46, 4  ;;  %v458_v56 = vrot.slane %v456_v47, 5  ;;  %v2182_v62 = vshll.u32 %v6812_v38, 16 }
  0x32   : > { %5783 = vmatpush3.bf16.msra.mxu1 %v6713_v8  ;;  %v2167_v58 = vsel %vm6763_vm5, %v2162_v48, %v2166_v30  ;;  %v443_v59 = vor.u32 %v442_v50, %v439_v49  ;;  %v2181_v61 = vrot.slane %v2179_v52, 4  ;;  %v2188_v2 = vshll.u32 %v6816_v51, 16  ;;  %v6853_v49 = vld [vmem:[%s6735_s7 + $0x2c] sm:$0x1]  ;;  %v6857_v52 = vld [vmem:[%s6729_s25 + $0x30] sm:$0xf] }
  0x33   : > { %5816 = vmatprep.subr.bf16.mxu1 %v6792_v9  ;;  %v2177_v8 = vsel %vm6763_vm5, %v2172_v53, %v2176_v35  ;;  %v453_v0 = vor.u32 %v452_v55, %v448_v54  ;;  %v2192_v5 = vshrl.u32 %v6816_v51, 16  ;;  %v2184_v13 = vrot.slane %v2182_v62, 5 }
  0x34   : > { %v5234_v11 = vcombine.low %v2167_v58, %v2177_v8  ;;  %v444_v12 = vrot.slane %v443_v59, 4  ;;  %v2198_v14 = vshll.u32 %v6821_v57, 16  ;;  %v2190_v17 = vrot.slane %v2188_v2, 5 }
  0x35   : > { %v454_v16 = vrot.slane %v453_v0, 4  ;;  %v2194_v19 = vrot.slane %v2192_v5, 4  ;;  %v461_v22 = vshrl.u32 %v345_v63, 16  ;;  %v2185_v24 = vor.u32 %v2184_v13, %v2181_v61 }
  0x36   : > { %5887 = vmatmul.mubr.msk.bf16.vlgmr.msra.gmra.mrb[0].mxu0 %vm822_vm4, %v5234_v11  ;;  %v449_v23 = vsel %vm6763_vm5, %v444_v12, %v448_v54  ;;  %v2200_v25 = vrot.slane %v2198_v14, 5  ;;  %v464_v27 = vshll.u32 %v345_v63, 16  ;;  %v470_v33 = vshll.u32 %v346_v15, 16  ;;  %v6863_v63 = vld [vmem:[%s6729_s25 + $0x34] sm:$0xf] }
  0x37   : > { %5919 = vmatpush3.bf16.msra.mxu0 %v6721_v10  ;;  %v459_v29 = vsel %vm6763_vm5, %v454_v16, %v458_v56  ;;  %v2195_v30 = vor.u32 %v2194_v19, %v2190_v17  ;;  %v463_v32 = vrot.slane %v461_v22, 4  ;;  %v2186_v35 = vrot.slane %v2185_v24, 4  ;;  %v350_v14 = vld [vmem:[%s6729_s25 + $0x38] sm:$0x1] }
  0x38   : > { %v5088_v34 = vcombine.low %v449_v23, %v459_v29  ;;  %v466_v39 = vrot.slane %v464_v27, 5  ;;  %v474_v40 = vshrl.u32 %v346_v15, 16  ;;  %5952 = vmatprep.subr.bf16.mxu0 %v6768_v41  ;;  %v472_v44 = vrot.slane %v470_v33, 5  ;;  %v6875_v23 = vld [vmem:[%s6735_s7 + $0x30] sm:$0xf] }
  0x39   : > { %v2196_v43 = vrot.slane %v2195_v30, 4  ;;  %v480_v45 = vshll.u32 %v347_v26, 16  ;;  %v2203_v10 = vshrl.u32 %v6839_v28, 16  ;;  %v2191_v46 = vsel %vm6763_vm5, %v2186_v35, %v2190_v17  ;;  %v6881_v29 = vld [vmem:[%s6735_s7 + $0x34] sm:$0xf] }
  0x3a   : > { %5754 = vmatprep.mubr.msk.bf16.mxu1 %vm822_vm4, %v5088_v34  ;;  %v467_v47 = vor.u32 %v466_v39, %v463_v32  ;;  %v476_v48 = vrot.slane %v474_v40, 4  ;;  %v2206_v50 = vshll.u32 %v6839_v28, 16  ;;  %v2212_v56 = vshll.u32 %v6845_v42, 16 }
  0x3b   : > { %v2201_v53 = vsel %vm6763_vm5, %v2196_v43, %v2200_v25  ;;  %v482_v54 = vrot.slane %v480_v45, 5  ;;  %v2205_v55 = vrot.slane %v2203_v10, 4  ;;  %v2216_v0 = vshrl.u32 %v6845_v42, 16  ;;  %v6886_v43 = vld [vmem:[%s6735_s7 + $0x38] sm:$0x1] }
  0x3c   : > { %v5235_v58 = vcombine.low %v2191_v46, %v2201_v53  ;;  %v468_v59 = vrot.slane %v467_v47, 4  ;;  %v477_v61 = vor.u32 %v476_v48, %v472_v44  ;;  %v2208_v62 = vrot.slane %v2206_v50, 5 }
  0x3d   : > { %v2214_v8 = vrot.slane %v2212_v56, 5  ;;  %v2222_v2 = vshll.u32 %v6853_v49, 16  ;;  %v485_v5 = vshrl.u32 %v6857_v52, 16  ;;  %v488_v15 = vshll.u32 %v6857_v52, 16 }
  0x3e   : > { %5890 = vmatprep.mubr.msk.bf16.mxu0 %vm822_vm4, %v5235_v58  ;;  %v473_v11 = vsel %vm6763_vm5, %v468_v59, %v472_v44  ;;  %v478_v12 = vrot.slane %v477_v61, 4  ;;  %v2209_v13 = vor.u32 %v2208_v62, %v2205_v55  ;;  %v2218_v16 = vrot.slane %v2216_v0, 4  ;;  %v6894_v55 = vld [vmem:[%s6729_s25 + $0x3c] sm:$0xf]  ;;  %v6900_v62 = vld [vmem:[%s6729_s25 + $0x40] sm:$0xf] }
  0x3f   : > { %v2224_v17 = vrot.slane %v2222_v2, 5  ;;  %v487_v19 = vrot.slane %v485_v5, 4  ;;  %v494_v22 = vshll.u32 %v6863_v63, 16  ;;  %v490_v26 = vrot.slane %v488_v15, 5 }
  0x40   : > { %v483_v24 = vsel %vm6763_vm5, %v478_v12, %v482_v54  ;;  %v2210_v25 = vrot.slane %v2209_v13, 4  ;;  %v498_v27 = vshrl.u32 %v6863_v63, 16  ;;  %v2219_v32 = vor.u32 %v2218_v16, %v2214_v8  ;;  %v353_v13 = vld [vmem:[%s6729_s25 + $0x44] sm:$0x1] }
  0x41   : > { %v5089_v30 = vcombine.low %v473_v11, %v483_v24  ;;  %v496_v33 = vrot.slane %v494_v22, 5  ;;  %v504_v34 = vshll.u32 %v350_v14, 16  ;;  %v491_v39 = vor.u32 %v490_v26, %v487_v19  ;;  %v6913_v24 = vld [vmem:[%s6735_s7 + $0x3c] sm:$0xf] }
  0x42   : > { %v2215_v35 = vsel %vm6763_vm5, %v2210_v25, %v2214_v8  ;;  %v500_v40 = vrot.slane %v498_v27, 4  ;;  %v2227_v44 = vshrl.u32 %v6875_v23, 16  ;;  %v2220_v45 = vrot.slane %v2219_v32, 4  ;;  %v6916_v32 = vld [vmem:[%s6735_s7 + $0x40] sm:$0xf] }
  0x43   : > { %5755 = vmatmul.mubr.msk.bf16.gmra.mrb[4].mxu1 %vm822_vm4, %v5089_v30  ;;  %v506_v10 = vrot.slane %v504_v34, 5  ;;  %v2230_v46 = vshll.u32 %v6875_v23, 16  ;;  %v2236_v47 = vshll.u32 %v6881_v29, 16  ;;  %v492_v48 = vrot.slane %v491_v39, 4 }
  0x44   : > { %v501_v50 = vor.u32 %v500_v40, %v496_v33  ;;  %v2229_v53 = vrot.slane %v2227_v44, 4  ;;  %v2240_v54 = vshrl.u32 %v6881_v29, 16  ;;  %v2225_v56 = vsel %vm6763_vm5, %v2220_v45, %v2224_v17  ;;  %v6922_v45 = vld [vmem:[%s6735_s7 + $0x44] sm:$0x1] }
  0x45   : > { %v2232_v58 = vrot.slane %v2230_v46, 5  ;;  %v2238_v59 = vrot.slane %v2236_v47, 5  ;;  %v2246_v61 = vshll.u32 %v6886_v43, 16  ;;  %v5236_v8 = vcombine.low %v2215_v35, %v2225_v56 }
  0x46   : > { %v497_v0 = vsel %vm6763_vm5, %v492_v48, %v496_v33  ;;  %v502_v2 = vrot.slane %v501_v50, 4  ;;  %v2242_v5 = vrot.slane %v2240_v54, 4  ;;  %v509_v14 = vshrl.u32 %v6894_v55, 16  ;;  %v6930_v54 = vld [vmem:[%s6729_s25 + $0x48] sm:$0xf] }
  0x47   : > { %v2233_v11 = vor.u32 %v2232_v58, %v2229_v53  ;;  %v2248_v12 = vrot.slane %v2246_v61, 5  ;;  %v512_v15 = vshll.u32 %v6894_v55, 16  ;;  %5891 = vmatmul.mubr.msk.bf16.gmra.mrb[4].mxu0 %vm822_vm4, %v5236_v8  ;;  %v518_v19 = vshll.u32 %v6900_v62, 16  ;;  %v6933_v8 = vld [vmem:[%s6729_s25 + $0x4c] sm:$0xf] }
  0x48   : > { %v507_v16 = vsel %vm6763_vm5, %v502_v2, %v506_v10  ;;  %v2243_v17 = vor.u32 %v2242_v5, %v2238_v59  ;;  %v522_v22 = vshrl.u32 %v6900_v62, 16  ;;  %v511_v27 = vrot.slane %v509_v14, 4  ;;  %v356_v14 = vld [vmem:[%s6729_s25 + $0x50] sm:$0x1] }
  0x49   : > { %v5090_v25 = vcombine.low %v497_v0, %v507_v16  ;;  %v2234_v26 = vrot.slane %v2233_v11, 4  ;;  %v514_v30 = vrot.slane %v512_v15, 5  ;;  %v520_v34 = vrot.slane %v518_v19, 5 }
  0x4a   : > { %v2244_v33 = vrot.slane %v2243_v17, 4  ;;  %v524_v35 = vrot.slane %v522_v22, 4  ;;  %v528_v39 = vshll.u32 %v353_v13, 16  ;;  %v2251_v10 = vshrl.u32 %v6913_v24, 16 }
  0x4b   : > { %5758 = vmatprep.mubr.msk.bf16.mxu1 %vm822_vm4, %v5090_v25  ;;  %v2239_v40 = vsel %vm6763_vm5, %v2234_v26, %v2238_v59  ;;  %v515_v44 = vor.u32 %v514_v30, %v511_v27  ;;  %v2254_v46 = vshll.u32 %v6913_v24, 16  ;;  %v2260_v53 = vshll.u32 %v6916_v32, 16  ;;  %v6947_v26 = vld [vmem:[%s6735_s7 + $0x48] sm:$0xf] }
  0x4c   : > { %v2249_v47 = vsel %vm6763_vm5, %v2244_v33, %v2248_v12  ;;  %v525_v48 = vor.u32 %v524_v35, %v520_v34  ;;  %v530_v50 = vrot.slane %v528_v39, 5  ;;  %v2253_v59 = vrot.slane %v2251_v10, 4  ;;  %v6950_v35 = vld [vmem:[%s6735_s7 + $0x4c] sm:$0xf] }
  0x4d   : > { %v5237_v56 = vcombine.low %v2239_v40, %v2249_v47  ;;  %v516_v58 = vrot.slane %v515_v44, 4  ;;  %v2256_v61 = vrot.slane %v2254_v46, 5  ;;  %v2262_v2 = vrot.slane %v2260_v53, 5 }
  0x4e   : > { %v526_v0 = vrot.slane %v525_v48, 4  ;;  %v2264_v5 = vshrl.u32 %v6916_v32, 16  ;;  %v2270_v11 = vshll.u32 %v6922_v45, 16  ;;  %v533_v15 = vshrl.u32 %v6930_v54, 16  ;;  %v6957_v48 = vld [vmem:[%s6735_s7 + $0x50] sm:$0x1] }
  0x4f   : > { %5894 = vmatprep.mubr.msk.bf16.mxu0 %vm822_vm4, %v5237_v56  ;;  %v521_v12 = vsel %vm6763_vm5, %v516_v58, %v520_v34  ;;  %v2257_v13 = vor.u32 %v2256_v61, %v2253_v59  ;;  %v536_v16 = vshll.u32 %v6930_v54, 16  ;;  %v542_v25 = vshll.u32 %v6933_v8, 16 }
  0x50   : > { %v531_v17 = vsel %vm6763_vm5, %v526_v0, %v530_v50  ;;  %v2266_v19 = vrot.slane %v2264_v5, 4  ;;  %v2272_v22 = vrot.slane %v2270_v11, 5  ;;  %v535_v33 = vrot.slane %v533_v15, 4 }
  0x51   : > { %v5091_v27 = vcombine.low %v521_v12, %v531_v17  ;;  %v2258_v30 = vrot.slane %v2257_v13, 4  ;;  %v538_v34 = vrot.slane %v536_v16, 5  ;;  %v544_v40 = vrot.slane %v542_v25, 5  ;;  %v6970_v17 = vld [vmem:[%s6729_s25 + $0x58] sm:$0xf] }
  0x52   : > { %v2267_v39 = vor.u32 %v2266_v19, %v2262_v2  ;;  %v546_v44 = vshrl.u32 %v6933_v8, 16  ;;  %v552_v10 = vshll.u32 %v356_v14, 16  ;;  %v2275_v50 = vshrl.u32 %v6947_v26, 16 }
  0x53   : > { %5759 = vmatmul.mubr.msk.bf16.gmra.mrb[8].mxu1 %vm822_vm4, %v5091_v27  ;;  %v2263_v46 = vsel %vm6763_vm5, %v2258_v30, %v2262_v2  ;;  %v539_v47 = vor.u32 %v538_v34, %v535_v33  ;;  %v2278_v53 = vshll.u32 %v6947_v26, 16  ;;  %v2284_v61 = vshll.u32 %v6950_v35, 16  ;;  %v6964_v2 = vld [vmem:[%s6729_s25 + $0x54] sm:$0xf]  ;;  %v359_v33 = vld [vmem:[%s6729_s25 + $0x5c] sm:$0x1] }
  0x54   : > { %v2268_v56 = vrot.slane %v2267_v39, 4  ;;  %v548_v58 = vrot.slane %v546_v44, 4  ;;  %v554_v59 = vrot.slane %v552_v10, 5  ;;  %v2277_v5 = vrot.slane %v2275_v50, 4 }
  0x55   : > { %v540_v0 = vrot.slane %v539_v47, 4  ;;  %v2280_v11 = vrot.slane %v2278_v53, 5  ;;  %v2288_v12 = vshrl.u32 %v6950_v35, 16  ;;  %v2286_v15 = vrot.slane %v2284_v61, 5 }
  0x56   : > { %v2273_v13 = vsel %vm6763_vm5, %v2268_v56, %v2272_v22  ;;  %v549_v14 = vor.u32 %v548_v58, %v544_v40  ;;  %v2294_v16 = vshll.u32 %v6957_v48, 16  ;;  %v557_v44 = vshrl.u32 %v6964_v2, 16 }
  0x57   : > { %v5238_v19 = vcombine.low %v2263_v46, %v2273_v13  ;;  %v545_v25 = vsel %vm6763_vm5, %v540_v0, %v544_v40  ;;  %v2281_v27 = vor.u32 %v2280_v11, %v2277_v5  ;;  %v2290_v30 = vrot.slane %v2288_v12, 4  ;;  %v6981_v40 = vld [vmem:[%s6735_s7 + $0x54] sm:$0xf]  ;;  %v6986_v0 = vld [vmem:[%s6735_s7 + $0x58] sm:$0xf] }
  0x58   : > { %v550_v34 = vrot.slane %v549_v14, 4  ;;  %v2296_v39 = vrot.slane %v2294_v16, 5  ;;  %v560_v22 = vshll.u32 %v6964_v2, 16  ;;  %v566_v50 = vshll.u32 %v6970_v17, 16 }
  0x59   : > { %5895 = vmatmul.mubr.msk.bf16.gmra.mrb[8].mxu0 %vm822_vm4, %v5238_v19  ;;  %v2282_v10 = vrot.slane %v2281_v27, 4  ;;  %v2291_v47 = vor.u32 %v2290_v30, %v2286_v15  ;;  %v570_v46 = vshrl.u32 %v6970_v17, 16  ;;  %v559_v56 = vrot.slane %v557_v44, 4  ;;  %v6991_v27 = vld [vmem:[%s6735_s7 + $0x5c] sm:$0x1] }
  0x5a   : > { %v555_v53 = vsel %vm6763_vm5, %v550_v34, %v554_v59  ;;  %v562_v58 = vrot.slane %v560_v22, 5  ;;  %v576_v61 = vshll.u32 %v359_v33, 16  ;;  %v568_v13 = vrot.slane %v566_v50, 5  ;;  %v7001_v34 = vld [vmem:[%s6729_s25 + $0x60] sm:$0xf] }
  0x5b   : > { %v5092_v5 = vcombine.low %v545_v25, %v555_v53  ;;  %v2287_v11 = vsel %vm6763_vm5, %v2282_v10, %v2286_v15  ;;  %v2292_v12 = vrot.slane %v2291_v47, 4  ;;  %v572_v16 = vrot.slane %v570_v46, 4  ;;  %v7004_v50 = vld [vmem:[%s6729_s25 + $0x64] sm:$0xf] }
  0x5c   : > { %v563_v14 = vor.u32 %v562_v58, %v559_v56  ;;  %v578_v19 = vrot.slane %v576_v61, 5  ;;  %v2299_v59 = vshrl.u32 %v6981_v40, 16  ;;  %v2302_v25 = vshll.u32 %v6981_v40, 16 }
  0x5d   : > { %5762 = vmatprep.mubr.msk.bf16.mxu1 %vm822_vm4, %v5092_v5  ;;  %v2297_v30 = vsel %vm6763_vm5, %v2292_v12, %v2296_v39  ;;  %v2308_v33 = vshll.u32 %v6986_v0, 16  ;;  %v2312_v15 = vshrl.u32 %v6986_v0, 16  ;;  %v573_v10 = vor.u32 %v572_v16, %v568_v13 }
  0x5e   : > { %v5239_v44 = vcombine.low %v2287_v11, %v2297_v30  ;;  %v564_v22 = vrot.slane %v563_v14, 4  ;;  %v2301_v47 = vrot.slane %v2299_v59, 4  ;;  %v2304_v46 = vrot.slane %v2302_v25, 5  ;;  %v362_v59 = vld [vmem:[%s6729_s25 + $0x68] sm:$0x1] }
  0x5f   : > { %v2310_v53 = vrot.slane %v2308_v33, 5  ;;  %v2314_v56 = vrot.slane %v2312_v15, 4  ;;  %v2318_v39 = vshll.u32 %v6991_v27, 16  ;;  %v574_v61 = vrot.slane %v573_v10, 4 }
  0x60   : > { %5898 = vmatprep.mubr.msk.bf16.mxu0 %vm822_vm4, %v5239_v44  ;;  %v569_v58 = vsel %vm6763_vm5, %v564_v22, %v568_v13  ;;  %v581_v5 = vshrl.u32 %v7001_v34, 16  ;;  %v584_v11 = vshll.u32 %v7001_v34, 16  ;;  %v2305_v12 = vor.u32 %v2304_v46, %v2301_v47  ;;  %v7018_v13 = vld [vmem:[%s6729_s25 + $0x6c] sm:$0xf] }
  0x61   : > { %v2315_v14 = vor.u32 %v2314_v56, %v2310_v53  ;;  %v2320_v16 = vrot.slane %v2318_v39, 5  ;;  %v590_v30 = vshll.u32 %v7004_v50, 16  ;;  %v579_v25 = vsel %vm6763_vm5, %v574_v61, %v578_v19 }
  0x62   : > { %v583_v33 = vrot.slane %v581_v5, 4  ;;  %v586_v15 = vrot.slane %v584_v11, 5  ;;  %v594_v44 = vshrl.u32 %v7004_v50, 16  ;;  %v5093_v22 = vcombine.low %v569_v58, %v579_v25  ;;  %v7034_v11 = vld [vmem:[%s6729_s25 + $0x70] sm:$0xf] }
  0x63   : > { %v2306_v10 = vrot.slane %v2305_v12, 4  ;;  %v2316_v36 = vrot.slane %v2315_v14, 4  ;;  %v592_v31 = vrot.slane %v590_v30, 5  ;;  %v600_v56 = vshll.u32 %v362_v59, 16 }
  0x64   : > { %v587_v47 = vor.u32 %v586_v15, %v583_v33  ;;  %v596_v46 = vrot.slane %v594_v44, 4  ;;  %v5265_v19 = vrot.slane %v6743_v18, 9  ;;  %5763 = vmatmul.mubr.msk.bf16.gmra.mrb[12].mxu1 %vm822_vm4, %v5093_v22  ;;  %v2826_v5 = vrot.slane %v6746_v20, 5  ;;  %v365_v18 = vld [vmem:[%s6729_s25 + $0x74] sm:$0x1] }
  0x65   : > { %v2311_v58 = vsel %vm6763_vm5, %v2306_v10, %v2310_v53  ;;  %v2321_v61 = vsel %vm6763_vm5, %v2316_v36, %v2320_v16  ;;  %v605_v12 = vshrl.u32 %v7018_v13, 16  ;;  %v602_v25 = vrot.slane %v600_v56, 5 }
  0x66   : > { %v5240_v14 = vcombine.low %v2311_v58, %v2321_v61  ;;  %v588_v59 = vrot.slane %v587_v47, 4  ;;  %v597_v30 = vor.u32 %v596_v46, %v592_v31  ;;  %v2827_v33 = vsel %vm7022_vm8, %v5265_v19, %v2826_v5  ;;  %v7052_v19 = vld [vmem:[%s6729_s25 + $0x78] sm:$0xf] }
  0x67   : > { %v2828_v15 = vrot.slane %v2826_v5, 4  ;;  %v607_v53 = vrot.slane %v605_v12, 4  ;;  %v608_v36 = vshll.u32 %v7018_v13, 16  ;;  %v614_v44 = vshll.u32 %v7034_v11, 16  ;;  %v7057_v12 = vld [vmem:[%s6729_s25 + $0x7c] sm:$0xf] }
  0x68   : > { %5899 = vmatmul.mubr.msk.bf16.gmra.mrb[12].mxu0 %vm822_vm4, %v5240_v14  ;;  %v593_v20 = vsel %vm6763_vm5, %v588_v59, %v592_v31  ;;  %v598_v16 = vrot.slane %v597_v30, 4  ;;  %v618_v22 = vshrl.u32 %v7034_v11, 16  ;;  %v624_v46 = vshll.u32 %v365_v18, 16  ;;  %v368_v14 = vld [vmem:[%s6729_s25 + $0x80] sm:$0x1] }
  0x69   : > { %v2830_v10 = vsel %vm7022_vm8, %v2828_v15, %v2829_v3  ;;  %v610_v47 = vrot.slane %v608_v36, 5  ;;  %v5266_v56 = vrot.slane %v6779_v60, 9  ;;  %v616_v61 = vrot.slane %v614_v44, 5 }
  0x6a   : > { %v603_v58 = vsel %vm6763_vm5, %v598_v16, %v602_v25  ;;  %v5282_v31 = vcombine.low %v2827_v33, %v2830_v10  ;;  %v620_v5 = vrot.slane %v618_v22, 4  ;;  %v626_v30 = vrot.slane %v624_v46, 5 }
  0x6b   : > { %v5094_v59 = vcombine.low %v593_v20, %v603_v58  ;;  %v611_v21 = vor.u32 %v610_v47, %v607_v53  ;;  %v8812_v3 = vrot.slane %v6782_v1, 5  ;;  %v629_v33 = vshrl.u32 %v7052_v19, 16 }
  0x6c   : > { %5920 = vmatprep.mubr.msk.bf16.mxu0 %vm822_vm4, %v5282_v31  ;;  %v621_v60 = vor.u32 %v620_v5, %v616_v61  ;;  %v632_v36 = vshll.u32 %v7052_v19, 16  ;;  %v638_v20 = vshll.u32 %v7057_v12, 16  ;;  %v642_v16 = vshrl.u32 %v7057_v12, 16 }
  0x6d   : > { %v2834_v18 = vsel %vm7022_vm8, %v5266_v56, %v8812_v3  ;;  %v8813_v15 = vmov %v8812_v3  ;;  %5766 = vmatprep.mubr.msk.bf16.mxu1 %vm822_vm4, %v5094_v59  ;;  %v612_v53 = vrot.slane %v611_v21, 4  ;;  %v648_v44 = vshll.u32 %v368_v14, 16  ;;  %v7079_v59 = vld [vmem:[%s6729_s25 + $0x84] sm:$0xf]  ;;  %v7082_v21 = vld [vmem:[%s6729_s25 + $0x88] sm:$0xf] }
  0x6e   : > { %v2835_v25 = vrot.slane %v8813_v15, 4  ;;  %v622_v22 = vrot.slane %v621_v60, 4  ;;  %v8814_v10 = vrot.slane %v6789_v6, 5  ;;  %v631_v47 = vrot.slane %v629_v33, 4 }
  0x6f   : > { %v634_v46 = vrot.slane %v632_v36, 5  ;;  %v617_v56 = vsel %vm6763_vm5, %v612_v53, %v616_v61  ;;  %v640_v31 = vrot.slane %v638_v20, 5  ;;  %v644_v5 = vrot.slane %v642_v16, 4  ;;  %v7092_v36 = vld [vmem:[%s6729_s25 + $0x8c] sm:$0x1] }
  0x70   : > { %v2837_v1 = vsel %vm7022_vm8, %v2835_v25, %v8814_v10  ;;  %v627_v14 = vsel %vm6763_vm5, %v622_v22, %v626_v30  ;;  %v650_v3 = vrot.slane %v648_v44, 5  ;;  %v5267_v60 = vrot.slane %v6812_v38, 9 }
  0x71   : > { %v5283_v58 = vcombine.low %v2834_v18, %v2837_v1  ;;  %v635_v6 = vor.u32 %v634_v46, %v631_v47  ;;  %v5095_v15 = vcombine.low %v617_v56, %v627_v14  ;;  %v645_v25 = vor.u32 %v644_v5, %v640_v31  ;;  %v7112_v5 = vld [vmem:[%s6729_s25 + $0x94] sm:$0xf] }
  0x72   : > { %v2840_v61 = vrot.slane %v6816_v51, 5  ;;  %v2843_v18 = vrot.slane %v6821_v57, 5  ;;  %v653_v53 = vshrl.u32 %v7079_v59, 16  ;;  %v656_v30 = vshll.u32 %v7079_v59, 16 }
  0x73   : > { %5921 = vmatmul.mubr.msk.bf16.vlgmr.msra.gmra.mrb[0].mxu0 %vm822_vm4, %v5283_v58  ;;  %v636_v33 = vrot.slane %v635_v6, 4  ;;  %v662_v38 = vshll.u32 %v7082_v21, 16  ;;  %5767 = vmatmul.mubr.msk.bf16.gmra.mrb[16].mxu1 %vm822_vm4, %v5095_v15  ;;  %v646_v20 = vrot.slane %v645_v25, 4  ;;  %v672_v56 = vshll.u32 %v7092_v36, 16  ;;  %v7109_v58 = vld [vmem:[%s6729_s25 + $0x90] sm:$0xf] }
  0x74   : > { %5953 = vmatpush3.bf16.msra.mxu0 %v6768_v41  ;;  %v2841_v51 = vsel %vm7022_vm8, %v5267_v60, %v2840_v61  ;;  %v2842_v57 = vrot.slane %v2840_v61, 4  ;;  %v666_v41 = vshrl.u32 %v7082_v21, 16  ;;  %v655_v44 = vrot.slane %v653_v53, 4 }
  0x75   : > { %v641_v16 = vsel %vm6763_vm5, %v636_v33, %v640_v31  ;;  %v658_v22 = vrot.slane %v656_v30, 5  ;;  %v664_v10 = vrot.slane %v662_v38, 5  ;;  %v651_v1 = vsel %vm6763_vm5, %v646_v20, %v650_v3  ;;  %v374_v33 = vld [vmem:[%s6729_s25 + $0x98] sm:$0x1] }
  0x76   : > { %v2844_v47 = vsel %vm7022_vm8, %v2842_v57, %v2843_v18  ;;  %v668_v46 = vrot.slane %v666_v41, 4  ;;  %v5096_v14 = vcombine.low %v641_v16, %v651_v1  ;;  %v5268_v60 = vrot.slane %v6839_v28, 9 }
  0x77   : > { %v5284_v6 = vcombine.low %v2841_v51, %v2844_v47  ;;  %v659_v31 = vor.u32 %v658_v22, %v655_v44  ;;  %v674_v25 = vrot.slane %v672_v56, 5  ;;  %v2847_v3 = vrot.slane %v6845_v42, 5  ;;  %v7136_v56 = vld [vmem:[%s6729_s25 + $0xa0] sm:$0xf] }
  0x78   : > { %v669_v15 = vor.u32 %v668_v46, %v664_v10  ;;  %v2850_v61 = vrot.slane %v6853_v49, 5  ;;  %5770 = vmatprep.mubr.msk.bf16.mxu1 %vm822_vm4, %v5096_v14  ;;  %v677_v53 = vshrl.u32 %v7109_v58, 16  ;;  %v680_v30 = vshll.u32 %v7109_v58, 16  ;;  %v7133_v46 = vld [vmem:[%s6729_s25 + $0x9c] sm:$0xf] }
  0x79   : > { %5924 = vmatprep.mubr.msk.bf16.mxu0 %vm822_vm4, %v5284_v6  ;;  %v660_v18 = vrot.slane %v659_v31, 4  ;;  %v686_v28 = vshll.u32 %v7112_v5, 16  ;;  %v2848_v42 = vsel %vm7022_vm8, %v5268_v60, %v2847_v3  ;;  %v2849_v20 = vrot.slane %v2847_v3, 4 }
  0x7a   : > { %v670_v38 = vrot.slane %v669_v15, 4  ;;  %v690_v49 = vshrl.u32 %v7112_v5, 16  ;;  %v679_v57 = vrot.slane %v677_v53, 4  ;;  %v682_v41 = vrot.slane %v680_v30, 5 }
  0x7b   : > { %v665_v51 = vsel %vm6763_vm5, %v660_v18, %v664_v10  ;;  %v688_v16 = vrot.slane %v686_v28, 5  ;;  %v2851_v22 = vsel %vm7022_vm8, %v2849_v20, %v2850_v61  ;;  %v696_v47 = vshll.u32 %v374_v33, 16  ;;  %v7144_v18 = vld [vmem:[%s6729_s25 + $0xa4] sm:$0x1] }
  0x7c   : > { %v675_v44 = vsel %vm6763_vm5, %v670_v38, %v674_v25  ;;  %v692_v1 = vrot.slane %v690_v49, 4  ;;  %v5285_v6 = vcombine.low %v2848_v42, %v2851_v22  ;;  %v683_v31 = vor.u32 %v682_v41, %v679_v57  ;;  %8815 = vst [vmem:[#allocation6_spill] sm:$0xff] %v7144_v18  ;;  %v7160_v22 = vld [vmem:[%s6729_s25 + $0xa8] sm:$0xf] }
  0x7d   : > { %v5097_v14 = vcombine.low %v665_v51, %v675_v44  ;;  %v5269_v10 = vrot.slane %v6875_v23, 9  ;;  %v698_v15 = vrot.slane %v696_v47, 5  ;;  %v2854_v3 = vrot.slane %v6881_v29, 5  ;;  %8816 = vst [vmem:[#allocation7_spill] sm:$0xff] %v7160_v22 }
  0x7e   : > { %v693_v60 = vor.u32 %v692_v1, %v688_v16  ;;  %v2857_v25 = vrot.slane %v6886_v43, 5  ;;  %5925 = vmatmul.mubr.msk.bf16.gmra.mrb[4].mxu0 %vm822_vm4, %v5285_v6  ;;  %v684_v61 = vrot.slane %v683_v31, 4  ;;  %v701_v33 = vshrl.u32 %v7133_v46, 16  ;;  %v7163_v1 = vld [vmem:[%s6729_s25 + $0xac] sm:$0xf] }
  0x7f   : > { %5771 = vmatmul.mubr.msk.bf16.gmra.mrb[20].mxu1 %vm822_vm4, %v5097_v14  ;;  %v704_v53 = vshll.u32 %v7133_v46, 16  ;;  %v710_v23 = vshll.u32 %v7136_v56, 16  ;;  %v2855_v29 = vsel %vm7022_vm8, %v5269_v10, %v2854_v3  ;;  %v2856_v43 = vrot.slane %v2854_v3, 4  ;;  %8817 = vst [vmem:[#allocation8_spill] sm:$0xff] %v7163_v1 }
  0x80   : > { %v694_v30 = vrot.slane %v693_v60, 4  ;;  %v714_v28 = vshrl.u32 %v7136_v56, 16  ;;  %v689_v38 = vsel %vm6763_vm5, %v684_v61, %v688_v16  ;;  %v703_v42 = vrot.slane %v701_v33, 4 }
  0x81   : > { %v706_v20 = vrot.slane %v704_v53, 5  ;;  %v712_v49 = vrot.slane %v710_v23, 5  ;;  %v2858_v57 = vsel %vm7022_vm8, %v2856_v43, %v2857_v25  ;;  %v720_v44 = vshll.u32 %v7144_v18, 16  ;;  %v7171_v25 = vld [vmem:[%s6729_s25 + $0xb0] sm:$0x1] }
  0x82   : > { %v699_v51 = vsel %vm6763_vm5, %v694_v30, %v698_v15  ;;  %v716_v41 = vrot.slane %v714_v28, 4  ;;  %v5286_v14 = vcombine.low %v2855_v29, %v2858_v57  ;;  %v5270_v6 = vrot.slane %v6913_v24, 9  ;;  %8818 = vst [vmem:[#allocation9_spill] sm:$0xff] %v7171_v25  ;;  %v7187_v57 = vld [vmem:[%s6729_s25 + $0xb4] sm:$0xf] }
  0x83   : > { %v5098_v47 = vcombine.low %v689_v38, %v699_v51  ;;  %v707_v16 = vor.u32 %v706_v20, %v703_v42  ;;  %v722_v10 = vrot.slane %v720_v44, 5  ;;  %v2861_v60 = vrot.slane %v6916_v32, 5 }
  0x84   : > { %v717_v31 = vor.u32 %v716_v41, %v712_v49  ;;  %v2864_v15 = vrot.slane %v6922_v45, 5  ;;  %5928 = vmatprep.mubr.msk.bf16.mxu0 %vm822_vm4, %v5286_v14  ;;  %v725_v61 = vshrl.u32 %v7160_v22, 16  ;;  %v728_v33 = vshll.u32 %v7160_v22, 16  ;;  %v7190_v41 = vld [vmem:[%s6729_s25 + $0xb8] sm:$0xf] }
  0x85   : > { %5774 = vmatprep.mubr.msk.bf16.mxu1 %vm822_vm4, %v5098_v47  ;;  %v708_v3 = vrot.slane %v707_v16, 4  ;;  %v734_v24 = vshll.u32 %v7163_v1, 16  ;;  %v2862_v32 = vsel %vm7022_vm8, %v5270_v6, %v2861_v60  ;;  %v2863_v45 = vrot.slane %v2861_v60, 4  ;;  %8819 = vst [vmem:[#allocation10_spill] sm:$0xff] %v7190_v41 }
  0x86   : > { %v718_v53 = vrot.slane %v717_v31, 4  ;;  %v738_v23 = vshrl.u32 %v7163_v1, 16  ;;  %v727_v29 = vrot.slane %v725_v61, 4  ;;  %v730_v43 = vrot.slane %v728_v33, 5 }
  0x87   : > { %v713_v30 = vsel %vm6763_vm5, %v708_v3, %v712_v49  ;;  %v736_v28 = vrot.slane %v734_v24, 5  ;;  %v2865_v42 = vsel %vm7022_vm8, %v2863_v45, %v2864_v15  ;;  %v744_v51 = vshll.u32 %v7171_v25, 16  ;;  %v7198_v15 = vld [vmem:[%s6729_s25 + $0xbc] sm:$0x1]  ;;  %v7631_v25 = vld [vmem:[%s7340_s27 + $0xac] sm:$0xf] }
  0x88   : > { %v723_v38 = vsel %vm6763_vm5, %v718_v53, %v722_v10  ;;  %v740_v20 = vrot.slane %v738_v23, 4  ;;  %v5287_v47 = vcombine.low %v2862_v32, %v2865_v42  ;;  %v731_v49 = vor.u32 %v730_v43, %v727_v29  ;;  %8820 = vst [vmem:[#allocation11_spill] sm:$0xff] %v7198_v15 }
  0x89   : > { %v5099_v44 = vcombine.low %v713_v30, %v723_v38  ;;  %v5271_v14 = vrot.slane %v6947_v26, 9  ;;  %v746_v6 = vrot.slane %v744_v51, 5  ;;  %v2868_v31 = vrot.slane %v6950_v35, 5  ;;  %v1780_v30 = vld [vmem:[%s6735_s7 + $0x60] sm:$0xf] }
  0x8a   : > { %v741_v16 = vor.u32 %v740_v20, %v736_v28  ;;  %v2871_v10 = vrot.slane %v6957_v48, 5  ;;  %5929 = vmatmul.mubr.msk.bf16.gmra.mrb[8].mxu0 %vm822_vm4, %v5287_v47  ;;  %v732_v60 = vrot.slane %v731_v49, 4  ;;  %v749_v3 = vshrl.u32 %v7187_v57, 16  ;;  %v1781_v20 = vld [vmem:[%s6735_s7 + $0x64] sm:$0xf] }
  0x8b   : > { %5775 = vmatmul.mubr.msk.bf16.gmra.mrb[24].mxu1 %vm822_vm4, %v5099_v44  ;;  %v752_v61 = vshll.u32 %v7187_v57, 16  ;;  %v758_v26 = vshll.u32 %v7190_v41, 16  ;;  %v2869_v35 = vsel %vm7022_vm8, %v5271_v14, %v2868_v31  ;;  %v2870_v48 = vrot.slane %v2868_v31, 4  ;;  %v1782_v51 = vld [vmem:[%s6735_s7 + $0x68] sm:$0x1] }
  0x8c   : > { %v742_v33 = vrot.slane %v741_v16, 4  ;;  %v762_v24 = vshrl.u32 %v7190_v41, 16  ;;  %v737_v53 = vsel %vm6763_vm5, %v732_v60, %v736_v28  ;;  %v751_v32 = vrot.slane %v749_v3, 4 }
  0x8d   : > { %v754_v45 = vrot.slane %v752_v61, 5  ;;  %v760_v23 = vrot.slane %v758_v26, 5  ;;  %v2872_v43 = vsel %vm7022_vm8, %v2870_v48, %v2871_v10  ;;  %v768_v42 = vshll.u32 %v7198_v15, 16  ;;  %v1799_v15 = vld [vmem:[%s6735_s7 + $0xac] sm:$0xf] }
  0x8e   : > { %v747_v29 = vsel %vm6763_vm5, %v742_v33, %v746_v6  ;;  %v764_v38 = vrot.slane %v762_v24, 4  ;;  %v5288_v47 = vcombine.low %v2869_v35, %v2872_v43  ;;  %v5272_v28 = vrot.slane %v6981_v40, 9 }
  0x8f   : > { %v5100_v44 = vcombine.low %v737_v53, %v747_v29  ;;  %v755_v49 = vor.u32 %v754_v45, %v751_v32  ;;  %v770_v16 = vrot.slane %v768_v42, 5  ;;  %v2875_v31 = vrot.slane %v6986_v0, 5  ;;  %v7232_v53 = vld [vmem:[%s6729_s25] sm:$0xf]  ;;  %v7235_v32 = vld [vmem:[%s6729_s25 + $0x4] sm:$0xf] }
  0x90   : > { %v765_v14 = vor.u32 %v764_v38, %v760_v23  ;;  %v2878_v6 = vrot.slane %v6991_v27, 5  ;;  %5932 = vmatprep.mubr.msk.bf16.mxu0 %vm822_vm4, %v5288_v47  ;;  %v5273_v60 = vrot.slane %v1780_v30, 9  ;;  %v2882_v3 = vrot.slane %v1781_v20, 5  ;;  %v1783_v30 = vld [vmem:[%s6735_s7 + $0x6c] sm:$0xf] }
  0x91   : > { %5778 = vmatprep.mubr.msk.bf16.mxu1 %vm822_vm4, %v5100_v44  ;;  %v756_v10 = vrot.slane %v755_v49, 4  ;;  %v2885_v61 = vrot.slane %v1782_v51, 5  ;;  %v2876_v26 = vsel %vm7022_vm8, %v5272_v28, %v2875_v31  ;;  %v2877_v0 = vrot.slane %v2875_v31, 4  ;;  %v1785_v29 = vld [vmem:[%s6735_s7 + $0x74] sm:$0x1] }
  0x92   : > { %v766_v40 = vrot.slane %v765_v14, 4  ;;  %v2883_v33 = vsel %vm7022_vm8, %v5273_v60, %v2882_v3  ;;  %v2884_v35 = vrot.slane %v2882_v3, 4  ;;  %v5118_v45 = vcombine.low %v7232_v53, %v7235_v32  ;;  %v1786_v20 = vld [vmem:[%s6735_s7 + $0x78] sm:$0xf]  ;;  %v1787_v51 = vld [vmem:[%s6735_s7 + $0x7c] sm:$0xf] }
  0x93   : > { %v761_v27 = vsel %vm6763_vm5, %v756_v10, %v760_v23  ;;  %v2879_v24 = vsel %vm7022_vm8, %v2877_v0, %v2878_v6  ;;  %v1784_v23 = vld [vmem:[%s6735_s7 + $0x70] sm:$0xf]  ;;  %v1788_v47 = vld [vmem:[%s6735_s7 + $0x80] sm:$0x1]  ;;  %v5274_v49 = vrot.slane %v1783_v30, 9  ;;  %v2892_v14 = vrot.slane %v1785_v29, 5 }
  0x94   : > { %v771_v48 = vsel %vm6763_vm5, %v766_v40, %v770_v16  ;;  %v5289_v38 = vcombine.low %v2876_v26, %v2879_v24  ;;  %v2886_v42 = vsel %vm7022_vm8, %v2884_v35, %v2885_v61  ;;  %v2889_v28 = vrot.slane %v1784_v23, 5  ;;  %v1789_v6 = vld [vmem:[%s6735_s7 + $0x84] sm:$0xf]  ;;  %v1790_v10 = vld [vmem:[%s6735_s7 + $0x88] sm:$0xf] }
  0x95   : > { %v5101_v43 = vcombine.low %v761_v27, %v771_v48  ;;  %v5290_v44 = vcombine.low %v2883_v33, %v2886_v42  ;;  %v5275_v16 = vrot.slane %v1786_v20, 9  ;;  %v2896_v31 = vrot.slane %v1787_v51, 5  ;;  %v1791_v40 = vld [vmem:[%s6735_s7 + $0x8c] sm:$0x1]  ;;  %v1793_v26 = vld [vmem:[%s6735_s7 + $0x94] sm:$0xf] }
  0x96   : > { %5933 = vmatmul.mubr.msk.bf16.gmra.mrb[12].mxu0 %vm822_vm4, %v5289_v38  ;;  %v2890_v60 = vsel %vm7022_vm8, %v5274_v49, %v2889_v28  ;;  %v2891_v3 = vrot.slane %v2889_v28, 4  ;;  %v2899_v61 = vrot.slane %v1788_v47, 5  ;;  %v7258_v0 = vld [vmem:[%s6729_s25 + $0xc] sm:$0xf]  ;;  %v7261_v27 = vld [vmem:[%s6729_s25 + $0x10] sm:$0xf] }
  0x97   : > { %5779 = vmatmul.mubr.msk.bf16.gmra.mrb[28].mxu1 %vm822_vm4, %v5101_v43  ;;  %5936 = vmatprep.mubr.msk.bf16.mxu0 %vm822_vm4, %v5290_v44  ;;  %v5119_v33 = vcombine.low %v7258_v0, %v7261_v27  ;;  %v2897_v35 = vsel %vm7022_vm8, %v5275_v16, %v2896_v31  ;;  %v2898_v48 = vrot.slane %v2896_v31, 4  ;;  %v1792_v24 = vld [vmem:[%s6735_s7 + $0x90] sm:$0xf]  ;;  %v7272_v23 = vld [vmem:[%s6729_s25 + $0x18] sm:$0xf]  ;;  %v5276_v38 = vrot.slane %v1789_v6, 9 }
  0x98   : > { %5784 = vmatprep.mubr.msk.bf16.mxu1 %vm822_vm4, %v5118_v45  ;;  %v1794_v45 = vld [vmem:[%s6735_s7 + $0x98] sm:$0x1]  ;;  %v2893_v30 = vsel %vm7022_vm8, %v2891_v3, %v2892_v14  ;;  %v7275_v29 = vld [vmem:[%s6729_s25 + $0x1c] sm:$0xf]  ;;  %v2903_v42 = vrot.slane %v1790_v10, 5  ;;  %v2906_v44 = vrot.slane %v1791_v40, 5 }
  0x99   : > { %v5120_v43 = vcombine.low %v7272_v23, %v7275_v29  ;;  %v5291_v20 = vcombine.low %v2890_v60, %v2893_v30  ;;  %v2900_v51 = vsel %vm7022_vm8, %v2898_v48, %v2899_v61  ;;  %v2910_v47 = vrot.slane %v1793_v26, 5  ;;  %v1796_v31 = vld [vmem:[%s6735_s7 + $0xa0] sm:$0xf]  ;;  %v1795_v26 = vld [vmem:[%s6735_s7 + $0x9c] sm:$0xf] }
  0x9a   : > { %v5292_v49 = vcombine.low %v2897_v35, %v2900_v51  ;;  %v2905_v28 = vrot.slane %v2903_v42, 4  ;;  %v5277_v14 = vrot.slane %v1792_v24, 9  ;;  %v2913_v16 = vrot.slane %v1794_v45, 5  ;;  %v1798_v35 = vld [vmem:[%s6735_s7 + $0xa8] sm:$0xf] }
  0x9b   : > { %v2912_v3 = vrot.slane %v2910_v47, 4  ;;  %v2904_v6 = vsel %vm7022_vm8, %v5276_v38, %v2903_v42  ;;  %v2917_v60 = vrot.slane %v1796_v31, 5  ;;  %v1800_v48 = vld [vmem:[%s6735_s7 + $0xb0] sm:$0x1]  ;;  %v7301_v24 = vld [vmem:[%s6729_s25 + $0x24] sm:$0xf]  ;;  %v5122_v38 = vcombine.low %v6857_v52, %v6863_v63 }
  0x9c   : > { %v2907_v10 = vsel %vm7022_vm8, %v2905_v28, %v2906_v44  ;;  %v2911_v61 = vsel %vm7022_vm8, %v5277_v14, %v2910_v47  ;;  %v7304_v45 = vld [vmem:[%s6729_s25 + $0x28] sm:$0xf]  ;;  %v5347_v42 = vld [vmem:[%s8773_s3 + $0xe] sm:$0x3]  ;;  %v5279_v47 = vrot.slane %v1798_v35, 9  ;;  %v2927_v28 = vrot.slane %v1800_v48, 5 }
  0x9d   : > { %v2914_v40 = vsel %vm7022_vm8, %v2912_v3, %v2913_v16  ;;  %v5121_v30 = vcombine.low %v7301_v24, %v7304_v45  ;;  %v2919_v51 = vrot.slane %v2917_v60, 4  ;;  %v1802_v14 = vld [vmem:[%s6735_s7 + $0xb8] sm:$0xf]  ;;  %v4087_v16 = vand.u32 %v5347_v42, %v6702_v4 }
  0x9e   : > { %5937 = vmatmul.mubr.msk.bf16.gmra.mrb[16].mxu0 %vm822_vm4, %v5291_v20  ;;  %v5294_v20 = vcombine.low %v2911_v61, %v2914_v40  ;;  %v2931_v31 = vrot.slane %v1802_v14, 5  ;;  %v1803_v61 = vld [vmem:[%s6735_s7 + $0xbc] sm:$0x1]  ;;  %v5123_v40 = vcombine.low %v6894_v55, %v6900_v62  ;;  %v7401_v14 = vld [vmem:[%s7340_s27 + $0x30] sm:$0xf] }
  0x9f   : > { %5785 = vmatmul.mubr.msk.bf16.vlgmr.msra.gmra.mrb[0].mxu1 %vm822_vm4, %v5119_v33  ;;  %5940 = vmatprep.mubr.msk.bf16.mxu0 %vm822_vm4, %v5292_v49  ;;  %v1797_v33 = vld [vmem:[%s6735_s7 + $0xa4] sm:$0x1] }
  0xa0   : > { %5817 = vmatpush3.bf16.msra.mxu1 %v6792_v9  ;;  %5788 = vmatprep.mubr.msk.bf16.mxu1 %vm822_vm4, %v5120_v43  ;;  %v2924_v9 = vrot.slane %v1799_v15, 5  ;;  %v5293_v43 = vcombine.low %v2904_v6, %v2907_v10  ;;  %v5278_v15 = vrot.slane %v1795_v26, 9  ;;  %v2920_v44 = vrot.slane %v1797_v33, 5  ;;  %v1801_v10 = vld [vmem:[%s6735_s7 + $0xb4] sm:$0xf] }
  0xa1   : > { %5986 = vmatprep.subr.bf16.mxu0 %v4087_v16  ;;  %v5280_v35 = vrot.slane %v1801_v10, 9  ;;  %v2933_v48 = vrot.slane %v2931_v31, 4 }
  0xa2   : > { %v2926_v49 = vrot.slane %v2924_v9, 4  ;;  %v2918_v52 = vsel %vm7022_vm8, %v5278_v15, %v2917_v60  ;;  %v2921_v63 = vsel %vm7022_vm8, %v2919_v51, %v2920_v44  ;;  %v2925_v3 = vsel %vm7022_vm8, %v5279_v47, %v2924_v9  ;;  %v5199_v9 = vld [vmem:[%s8773_s3 + $0x6] sm:$0x3]  ;;  %v7371_v51 = vld [vmem:[%s7340_s27 + $0xc] sm:$0xf] }
  0xa3   : > { %v5295_v26 = vcombine.low %v2918_v52, %v2921_v63  ;;  %v5124_v60 = vcombine.low %v6930_v54, %v6933_v8  ;;  %v2932_v55 = vsel %vm7022_vm8, %v5280_v35, %v2931_v31  ;;  %v7351_v54 = vand.u32 %v5199_v9, %v6702_v4  ;;  %v7354_v8 = vld [vmem:[%s7340_s27] sm:$0xf]  ;;  %v7407_v52 = vld [vmem:[%s6729_s25 + $0x8] sm:$0x1]  ;;  %v7412_v31 = vld [vmem:[%s6729_s25 + $0x14] sm:$0x1] }
  0xa4   : > { %v2928_v6 = vsel %vm7022_vm8, %v2926_v49, %v2927_v28  ;;  %v5128_v47 = vcombine.low %v7052_v19, %v7057_v12  ;;  %v7394_v28 = vld [vmem:[%s7340_s27 + $0x24] sm:$0xf]  ;;  %v7404_v19 = vld [vmem:[%s7340_s27 + $0x34] sm:$0xf]  ;;  %v1355_v63 = vrot.slane %v7407_v52, 5 }
  0xa5   : > { %v5296_v33 = vcombine.low %v2925_v3, %v2928_v6  ;;  %5850 = vmatprep.subr.bf16.mxu1 %v7351_v54  ;;  %v5129_v6 = vcombine.low %v7079_v59, %v7082_v21  ;;  %v7429_v35 = vld [vmem:[%s7340_s27 + $0x40] sm:$0xf]  ;;  %v6432_v3 = vld [vmem:[%s6729_s25 + $0x30] sm:$0xf]  ;;  %v6434_v9 = vld [vmem:[%s6729_s25 + $0x38] sm:$0x1] }
  0xa6   : > { %5941 = vmatmul.mubr.msk.bf16.gmra.mrb[20].mxu0 %vm822_vm4, %v5293_v43  ;;  %v7357_v43 = vld [vmem:[%s7340_s27 + $0x4] sm:$0xf]  ;;  %v6433_v52 = vld [vmem:[%s6729_s25 + $0x40] sm:$0xf] }
  0xa7   : > { %5789 = vmatmul.mubr.msk.bf16.gmra.mrb[4].mxu1 %vm822_vm4, %v5121_v30  ;;  %5944 = vmatprep.mubr.msk.bf16.mxu0 %vm822_vm4, %v5294_v20  ;;  %v2934_v30 = vrot.slane %v1803_v61, 5  ;;  %v5126_v20 = vcombine.low %v7001_v34, %v7004_v50  ;;  %v5315_v15 = vcombine.low %v7354_v8, %v7357_v43  ;;  %v7380_v34 = vld [vmem:[%s7340_s27 + $0x1c] sm:$0xf]  ;;  %v5127_v50 = vcombine.low %v7018_v13, %v7034_v11  ;;  %v7397_v13 = vld [vmem:[%s7340_s27 + $0x28] sm:$0xf] }
  0xa8   : > { %5792 = vmatprep.mubr.msk.bf16.mxu1 %vm822_vm4, %v5122_v38  ;;  %v5125_v38 = vcombine.low %v6964_v2, %v6970_v17  ;;  %v7374_v2 = vld [vmem:[%s7340_s27 + $0x10] sm:$0xf]  ;;  %v7377_v17 = vld [vmem:[%s7340_s27 + $0x18] sm:$0xf]  ;;  %v5318_v10 = vcombine.low %v7394_v28, %v7397_v13 }
  0xa9   : > { %v2935_v62 = vsel %vm7022_vm8, %v2933_v48, %v2934_v30  ;;  %v5316_v44 = vcombine.low %v7371_v51, %v7374_v2  ;;  %v5317_v49 = vcombine.low %v7377_v17, %v7380_v34  ;;  %v7497_v48 = vld [vmem:[%s7340_s27 + $0x6c] sm:$0xf]  ;;  %v7506_v61 = vld [vmem:[%s7340_s27 + $0x70] sm:$0xf] }
  0xaa   : > { %v5297_v42 = vcombine.low %v2932_v55, %v2935_v62  ;;  %8829 = vst [vmem:[#allocation20_spill] sm:$0xff] %v7497_v48 }
  0xae   : > { %5945 = vmatmul.mubr.msk.bf16.gmra.mrb[24].mxu0 %vm822_vm4, %v5295_v26  ;;  %v5130_v26 = vcombine.low %v7109_v58, %v7112_v5  ;;  %v5396_v58 = vld [vmem:[%s8773_s3 + $0x10] sm:$0x3] }
  0xaf   : > { %5793 = vmatmul.mubr.msk.bf16.gmra.mrb[8].mxu1 %vm822_vm4, %v5123_v40  ;;  %5948 = vmatprep.mubr.msk.bf16.mxu0 %vm822_vm4, %v5296_v33  ;;  %v7426_v33 = vld [vmem:[%s7340_s27 + $0x3c] sm:$0xf]  ;;  %v7554_v40 = vld [vmem:[%s7340_s27 + $0x84] sm:$0xf] }
  0xb0   : > { %5796 = vmatprep.mubr.msk.bf16.mxu1 %vm822_vm4, %v5124_v60  ;;  %v5319_v60 = vcombine.low %v7401_v14, %v7404_v19  ;;  %8821 = vst [vmem:[#allocation12_spill] sm:$0xff] %v7426_v33 }
  0xb6   : > { %5949 = vmatmul.mubr.msk.bf16.gmra.mrb[28].mxu0 %vm822_vm4, %v5297_v42  ;;  %v7483_v42 = vld [vmem:[%s7340_s27 + $0x64] sm:$0xf] }
  0xb7   : > { %5797 = vmatmul.mubr.msk.bf16.gmra.mrb[12].mxu1 %vm822_vm4, %v5125_v38  ;;  %5954 = vmatprep.mubr.msk.bf16.mxu0 %vm822_vm4, %v5315_v15  ;;  %v7443_v15 = vld [vmem:[%s7340_s27 + $0x48] sm:$0xf]  ;;  %v1352_v38 = vrot.slane %v7235_v32, 5  ;;  %v5320_v32 = vcombine.low %v7426_v33, %v7429_v35  ;;  %8828 = vst [vmem:[#allocation19_spill] sm:$0xff] %v7483_v42 }
  0xb8   : > { %5800 = vmatprep.mubr.msk.bf16.mxu1 %vm822_vm4, %v5126_v20  ;;  %8822 = vst [vmem:[#allocation13_spill] sm:$0xff] %v7443_v15  ;;  %v5151_v20 = vrot.slane %v7258_v0, 9  ;;  %v1366_v0 = vrot.slane %v7275_v29, 5 }
  0xb9   : > { %v1354_v62 = vrot.slane %v1352_v38, 4 }
  0xbe   : > { %5955 = vmatmul.mubr.msk.bf16.vlgmr.msra.gmra.mrb[0].mxu0 %vm822_vm4, %v5316_v44  ;;  %v7461_v44 = vld [vmem:[%s7340_s27 + $0x54] sm:$0xf] }
  0xbf   : > { %5801 = vmatmul.mubr.msk.bf16.gmra.mrb[16].mxu1 %vm822_vm4, %v5127_v50  ;;  %5987 = vmatpush3.bf16.msra.mxu0 %v4087_v16  ;;  %v1359_v16 = vrot.slane %v7261_v27, 5  ;;  %v5131_v50 = vcombine.low %v7133_v46, %v7136_v56  ;;  %8824 = vst [vmem:[#allocation15_spill] sm:$0xff] %v7461_v44  ;;  %v5132_v46 = vcombine.low %v7160_v22, %v7163_v1  ;;  %v5152_v27 = vrot.slane %v7272_v23, 9  ;;  %v6443_v22 = vld [vmem:[%s6729_s25 + $0x64] sm:$0xf] }
  0xc0   : > { %5804 = vmatprep.mubr.msk.bf16.mxu1 %vm822_vm4, %v5128_v47  ;;  %5958 = vmatprep.mubr.msk.bf16.mxu0 %vm822_vm4, %v5317_v49  ;;  %v7451_v49 = vld [vmem:[%s7340_s27 + $0x4c] sm:$0xf]  ;;  %v7464_v47 = vand.u32 %v5396_v58, %v6702_v4  ;;  %v5150_v4 = vrot.slane %v7232_v53, 9  ;;  %v7480_v58 = vld [vmem:[%s7340_s27 + $0x60] sm:$0xf]  ;;  %v5133_v53 = vcombine.low %v7187_v57, %v7190_v41 }
  0xc1   : > { %8823 = vst [vmem:[#allocation14_spill] sm:$0xff] %v7451_v49  ;;  %8827 = vst [vmem:[#allocation18_spill] sm:$0xff] %v7480_v58  ;;  %v1361_v55 = vrot.slane %v1359_v16, 4  ;;  %v6435_v41 = vld [vmem:[%s6729_s25 + $0x4c] sm:$0xf] }
  0xc2   : > { %8825 = vst [vmem:[#allocation16_spill] sm:$0xff] %v7464_v47  ;;  %6020 = vmatprep.subr.bf16.mxu0 %v7464_v47  ;;  %v1353_v57 = vsel %vm7022_vm8, %v5150_v4, %v1352_v38  ;;  %v1356_v38 = vsel %vm7022_vm8, %v1354_v62, %v1355_v63  ;;  %v8830_v4 = vrot.slane %v7412_v31, 5  ;;  %v1368_v31 = vrot.slane %v1366_v0, 4  ;;  %v7563_v62 = vld [vmem:[%s7340_s27 + $0x88] sm:$0xf] }
  0xc3   : > { %v5154_v63 = vrot.slane %v6432_v3, 9  ;;  %v7628_v47 = vld [vmem:[%s7340_s27 + $0xa8] sm:$0xf] }
  0xc4   : > { %v7528_v29 = vsel %vm7022_vm8, %v1361_v55, %v8830_v4  ;;  %v6429_v55 = vld [vmem:[%s6729_s25 + $0x20] sm:$0x1] }
  0xc5   : > { %v1369_v23 = vrot.slane %v6429_v55, 5  ;;  %v7581_v55 = vld [vmem:[%s7340_s27 + $0x90] sm:$0xf] }
  0xc6   : > { %5959 = vmatmul.mubr.msk.bf16.gmra.mrb[4].mxu0 %vm822_vm4, %v5318_v10  ;;  %v5321_v10 = vcombine.low %v7443_v15, %v7451_v49  ;;  %v1408_v15 = vrot.slane %v6443_v22, 5  ;;  %v8838_v49 = vcombine.low %v7497_v48, %v7506_v61  ;;  %v8845_v48 = vshll.u32 %v7377_v17, 16 }
  0xc7   : > { %5805 = vmatmul.mubr.msk.bf16.gmra.mrb[20].mxu1 %vm822_vm4, %v5129_v6  ;;  %5962 = vmatprep.mubr.msk.bf16.mxu0 %vm822_vm4, %v5319_v60  ;;  %v7472_v6 = vld [vmem:[%s7340_s27 + $0x58] sm:$0xf]  ;;  %v7516_v60 = vsel %vm7022_vm8, %v5151_v20, %v1359_v16  ;;  %v7535_v20 = vld [vmem:[%s7340_s27 + $0x7c] sm:$0xf] }
  0xc8   : > { %5808 = vmatprep.mubr.msk.bf16.mxu1 %vm822_vm4, %v5130_v26  ;;  %8826 = vst [vmem:[#allocation17_spill] sm:$0xff] %v7472_v6  ;;  %v5322_v30 = vcombine.low %v7461_v44, %v7472_v6  ;;  %v7532_v16 = vld [vmem:[%s7340_s27 + $0x78] sm:$0xf]  ;;  %8832 = vst [vmem:[#allocation22_spill] sm:$0xff] %v7535_v20  ;;  %v7567_v26 = vsel %vm7022_vm8, %v1368_v31, %v1369_v23  ;;  %v1394_v44 = vrot.slane %v6435_v41, 5 }
  0xc9   : > { %8831 = vst [vmem:[#allocation21_spill] sm:$0xff] %v7532_v16  ;;  %v7599_v23 = vld [vmem:[%s7340_s27 + $0x9c] sm:$0xf] }
  0xca   : > { %v6442_v6 = vld [vmem:[%s6729_s25 + $0x5c] sm:$0x1] }
  0xce   : > { %5963 = vmatmul.mubr.msk.bf16.gmra.mrb[8].mxu0 %vm822_vm4, %v5320_v32  ;;  %v7558_v32 = vsel %vm7022_vm8, %v5152_v27, %v1366_v0  ;;  %v1387_v0 = vrot.slane %v6433_v52, 5  ;;  %v7596_v52 = vld [vmem:[%s7340_s27 + $0x94] sm:$0xf] }
  0xcf   : > { %5809 = vmatmul.mubr.msk.bf16.gmra.mrb[24].mxu1 %vm822_vm4, %v5131_v50  ;;  %v1373_v50 = vrot.slane %v7304_v45, 5  ;;  %5966 = vmatprep.mubr.msk.bf16.mxu0 %vm822_vm4, %v5321_v10  ;;  %v5167_v10 = vcombine.low %v1353_v57, %v1356_v38  ;;  %v6431_v57 = vld [vmem:[%s6729_s25 + $0x2c] sm:$0x1]  ;;  %v5169_v41 = vcombine.low %v7558_v32, %v7567_v26  ;;  %v8833_v26 = vcombine.low %v7480_v58, %v7483_v42  ;;  %v6437_v32 = vld [vmem:[%s6729_s25 + $0x3c] sm:$0xf] }
  0xd0   : > { %5812 = vmatprep.mubr.msk.bf16.mxu1 %vm822_vm4, %v5132_v46  ;;  %v6430_v46 = vld [vmem:[%s6729_s25 + $0x34] sm:$0xf]  ;;  %v1376_v38 = vrot.slane %v6431_v57, 5  ;;  %v1383_v57 = vrot.slane %v6434_v9, 5 }
  0xd1   : > { %v1380_v4 = vrot.slane %v6430_v46, 5  ;;  %v5153_v46 = vrot.slane %v7301_v24, 9  ;;  %v1375_v45 = vrot.slane %v1373_v50, 4 }
  0xd3   : > { %v1382_v24 = vrot.slane %v1380_v4, 4  ;;  %v7589_v9 = vsel %vm7022_vm8, %v5153_v46, %v1373_v50  ;;  %v7593_v3 = vsel %vm7022_vm8, %v1375_v45, %v1376_v38  ;;  %v7609_v50 = vsel %vm7022_vm8, %v5154_v63, %v1380_v4  ;;  %v6438_v38 = vld [vmem:[%s6729_s25 + $0x44] sm:$0x1]  ;;  %v6440_v4 = vld [vmem:[%s6729_s25 + $0x50] sm:$0x1] }
  0xd4   : > { %v5155_v45 = vrot.slane %v6437_v32, 9  ;;  %v1389_v46 = vrot.slane %v1387_v0, 4  ;;  %v1390_v27 = vrot.slane %v6438_v38, 5  ;;  %v1396_v63 = vrot.slane %v1394_v44, 4 }
  0xd5   : > { %v1397_v58 = vrot.slane %v6440_v4, 5  ;;  %v1404_v32 = vrot.slane %v6442_v6, 5  ;;  %v8837_v6 = vcombine.low %v7516_v60, %v7528_v29  ;;  %v8840_v29 = vshrl.u32 %v7371_v51, 16 }
  0xd6   : > { %5967 = vmatmul.mubr.msk.bf16.gmra.mrb[12].mxu0 %vm822_vm4, %v5322_v30  ;;  %v7642_v42 = vsel %vm7022_vm8, %v5155_v45, %v1387_v0  ;;  %v7660_v0 = vld [vmem:[%s7340_s27 + $0xb4] sm:$0xf] }
  0xd7   : > { %5813 = vmatmul.mubr.msk.bf16.gmra.mrb[28].mxu1 %vm822_vm4, %v5133_v53  ;;  %v6436_v53 = vld [vmem:[%s6729_s25 + $0x58] sm:$0xf]  ;;  %5970 = vmatprep.mubr.msk.bf16.mxu0 %vm822_vm4, %v8833_v26  ;;  %v6439_v26 = vld [vmem:[%s6729_s25 + $0x48] sm:$0xf]  ;;  %v7655_v22 = vsel %vm7022_vm8, %v1396_v63, %v1397_v58  ;;  %v8836_v58 = vshll.u32 %v7354_v8, 16 }
  0xd8   : > { %v1401_v30 = vrot.slane %v6436_v53, 5  ;;  %5818 = vmatprep.mubr.msk.bf16.mxu1 %vm822_vm4, %v5167_v10  ;;  %v7614_v53 = vld [vmem:[%s7340_s27 + $0xa0] sm:$0xf]  ;;  %v7618_v10 = vsel %vm7022_vm8, %v1382_v24, %v1383_v57  ;;  %v5156_v31 = vrot.slane %v6439_v26, 9  ;;  %v6441_v24 = vld [vmem:[%s6729_s25 + $0x54] sm:$0xf] }
  0xd9   : > { %v5157_v57 = vrot.slane %v6441_v24, 9  ;;  %v7646_v24 = vsel %vm7022_vm8, %v1389_v46, %v1390_v27  ;;  %v3614_v26 = vshll.u32 %v7357_v43, 16  ;;  %v3638_v27 = vshll.u32 %v7374_v2, 16  ;;  %v6444_v46 = vld [vmem:[%s6729_s25 + $0x60] sm:$0xf] }
  0xda   : > { %v1403_v4 = vrot.slane %v1401_v30, 4  ;;  %v7651_v1 = vsel %vm7022_vm8, %v5156_v31, %v1394_v44  ;;  %v5158_v38 = vrot.slane %v6444_v46, 9  ;;  %v7669_v44 = vld [vmem:[%s7340_s27 + $0x8] sm:$0x1]  ;;  %v8835_v31 = vshrl.u32 %v7354_v8, 16 }
  0xdb   : > { %v7665_v45 = vsel %vm7022_vm8, %v5157_v57, %v1401_v30  ;;  %8834 = vst [vmem:[#allocation23_spill] sm:$0xff] %v7669_v44  ;;  %v3610_v63 = vrot.slane %v8836_v58, 5  ;;  %v7688_v57 = vld [vmem:[%s7340_s27 + $0xb8] sm:$0xf]  ;;  %v1410_v46 = vrot.slane %v1408_v15, 4  ;;  %v8839_v58 = vshrl.u32 %v7357_v43, 16 }
  0xdc   : > { %v3607_v18 = vrot.slane %v8835_v31, 4  ;;  %v7685_v30 = vsel %vm7022_vm8, %v1403_v4, %v1404_v32  ;;  %v6445_v31 = vld [vmem:[%s6729_s25 + $0x68] sm:$0x1]  ;;  %v7695_v60 = vrot.slane %v3614_v26, 5  ;;  %v3631_v32 = vrot.slane %v8840_v29, 4 }
  0xdd   : > { %v1411_v8 = vrot.slane %v6445_v31, 5  ;;  %v3620_v33 = vrot.slane %v8839_v58, 4  ;;  %v8841_v4 = vshll.u32 %v7371_v51, 16  ;;  %v8842_v43 = vcombine.low %v7532_v16, %v7535_v20  ;;  %v6447_v29 = vld [vmem:[%s6729_s25 + $0x74] sm:$0x1] }
  0xde   : > { %5971 = vmatmul.mubr.msk.bf16.gmra.mrb[16].mxu0 %vm822_vm4, %v8838_v49  ;;  %v1415_v49 = vrot.slane %v7034_v11, 5  ;;  %v7709_v26 = vrot.slane %v3638_v27, 5  ;;  %v8843_v11 = vshrl.u32 %v7374_v2, 16  ;;  %v7725_v27 = vsel %vm7022_vm8, %v5158_v38, %v1408_v15 }
  0xdf   : > { %5819 = vmatmul.mubr.msk.bf16.vlgmr.msra.gmra.mrb[0].mxu1 %vm822_vm4, %v8837_v6  ;;  %v3634_v6 = vrot.slane %v8841_v4, 5  ;;  %5974 = vmatprep.mubr.msk.bf16.mxu0 %vm822_vm4, %v8842_v43  ;;  %v3611_v4 = vor.u32 %v3610_v63, %v3607_v18  ;;  %v7721_v43 = vld [vmem:[%s7340_s27 + $0x14] sm:$0x1]  ;;  %v7729_v2 = vsel %vm7022_vm8, %v1410_v46, %v1411_v8  ;;  %v3662_v51 = vshll.u32 %v7380_v34, 16 }
  0xe0   : > { %5851 = vmatpush3.bf16.msra.mxu1 %v7351_v54  ;;  %5822 = vmatprep.mubr.msk.bf16.mxu1 %vm822_vm4, %v5169_v41  ;;  %v3624_v41 = vshll.u32 %v7669_v44, 16  ;;  %v3644_v31 = vrot.slane %v8843_v11, 4  ;;  %v6446_v11 = vld [vmem:[%s6729_s25 + $0x6c] sm:$0xf]  ;;  %v3621_v58 = vor.u32 %v3620_v33, %v7695_v60  ;;  %v1417_v44 = vrot.slane %v1415_v49, 4 }
  0xe1   : > { %6054 = vmatprep.subr.bf16.mxu1 %v6710_v7  ;;  %v5159_v54 = vrot.slane %v6446_v11, 9  ;;  %v1418_v18 = vrot.slane %v6447_v29, 5  ;;  %v3635_v63 = vor.u32 %v3634_v6, %v3631_v32  ;;  %v3648_v15 = vshll.u32 %v7721_v43, 16 }
  0xe2   : > { %v3626_v7 = vrot.slane %v3624_v41, 5  ;;  %v3645_v16 = vor.u32 %v3644_v31, %v7709_v26  ;;  %v1422_v38 = vrot.slane %v7057_v12, 5  ;;  %v3612_v46 = vrot.slane %v3611_v4, 4 }
  0xe3   : > { %v8844_v8 = vshrl.u32 %v7377_v17, 16  ;;  %v3658_v33 = vrot.slane %v8845_v48, 5  ;;  %v1429_v20 = vrot.slane %v7082_v21, 5  ;;  %v8846_v32 = vcombine.low %v7589_v9, %v7593_v3  ;;  %v7758_v48 = vld [vmem:[%s7340_s27 + $0x20] sm:$0x1] }
  0xe4   : > { %v8847_v6 = vcombine.low %v7554_v40, %v7563_v62  ;;  %v7755_v17 = vsel %vm7022_vm8, %v5159_v54, %v1415_v49  ;;  %v7760_v21 = vrot.slane %v3662_v51, 5  ;;  %v8848_v3 = vshrl.u32 %v7380_v34, 16  ;;  %v6448_v51 = vld [vmem:[%s6729_s25 + $0x78] sm:$0xf] }
  0xe5   : > { %v3655_v11 = vrot.slane %v8844_v8, 4  ;;  %v8849_v41 = vcombine.low %v7609_v50, %v7618_v10  ;;  %v8850_v31 = vcombine.low %v7581_v55, %v7596_v52  ;;  %v3622_v29 = vrot.slane %v3621_v58, 4 }
  0xe6   : > { %5975 = vmatmul.mubr.msk.bf16.gmra.mrb[20].mxu0 %vm822_vm4, %v8847_v6  ;;  %v3668_v9 = vrot.slane %v8848_v3, 4  ;;  %v7774_v49 = vsel %vm7022_vm8, %v1417_v44, %v1418_v18  ;;  %v3636_v54 = vrot.slane %v3635_v63, 4  ;;  %v5160_v4 = vrot.slane %v6448_v51, 9  ;;  %v6449_v6 = vld [vmem:[%s6729_s25 + $0x80] sm:$0x1] }
  0xe7   : > { %5823 = vmatmul.mubr.msk.bf16.gmra.mrb[4].mxu1 %vm822_vm4, %v8846_v32  ;;  %5978 = vmatprep.mubr.msk.bf16.mxu0 %vm822_vm4, %v8850_v31  ;;  %v3646_v34 = vrot.slane %v3645_v16, 4  ;;  %v3650_v8 = vrot.slane %v3648_v15, 5  ;;  %v1424_v32 = vrot.slane %v1422_v38, 4  ;;  %v1425_v50 = vrot.slane %v6449_v6, 5 }
  0xe8   : > { %5826 = vmatprep.mubr.msk.bf16.mxu1 %vm822_vm4, %v8849_v41  ;;  %v3659_v10 = vor.u32 %v3658_v33, %v3655_v11  ;;  %v3672_v3 = vshll.u32 %v7758_v48, 16  ;;  %v5161_v41 = vrot.slane %v7079_v59, 9  ;;  %v1431_v12 = vrot.slane %v1429_v20, 4 }
  0xe9   : > { %v3669_v58 = vor.u32 %v3668_v9, %v7760_v21  ;;  %v1432_v44 = vrot.slane %v7092_v36, 5  ;;  %v8851_v18 = vshrl.u32 %v7394_v28, 16  ;;  %v8852_v16 = vshll.u32 %v7394_v28, 16 }
  0xea   : > { %v3617_v11 = vsel %vm6763_vm5, %v3612_v46, %v7695_v60  ;;  %v3627_v33 = vsel %vm6763_vm5, %v3622_v29, %v3626_v7  ;;  %v5176_v59 = vcombine.low %v7755_v17, %v7774_v49  ;;  %v3686_v9 = vshll.u32 %v7397_v13, 16  ;;  %v8879_v49 = vld [vmem:[#allocation15_spill] sm:$0xff] }
  0xeb   : > { %v3679_v63 = vrot.slane %v8851_v18, 4  ;;  %v3682_v15 = vrot.slane %v8852_v16, 5  ;;  %v3641_v36 = vsel %vm6763_vm5, %v3636_v54, %v7709_v26  ;;  %v7799_v28 = vsel %vm7022_vm8, %v5160_v4, %v1422_v38  ;;  %v7813_v26 = vld [vmem:[%s7340_s27 + $0x2c] sm:$0x1] }
  0xec   : > { %v7803_v31 = vsel %vm7022_vm8, %v1424_v32, %v1425_v50  ;;  %v3710_v60 = vshll.u32 %v7404_v19, 16  ;;  %v3651_v7 = vsel %vm6763_vm5, %v3646_v34, %v3650_v8  ;;  %v3660_v46 = vrot.slane %v3659_v10, 4 }
  0xed   : > { %v3674_v29 = vrot.slane %v3672_v3, 5  ;;  %v7810_v51 = vsel %vm7022_vm8, %v5161_v41, %v1429_v20  ;;  %v8853_v38 = vcombine.low %v7642_v42, %v7646_v24  ;;  %v8854_v54 = vcombine.low %v7599_v23, %v7614_v53 }
  0xee   : > { %v3670_v4 = vrot.slane %v3669_v58, 4  ;;  %v7825_v34 = vsel %vm7022_vm8, %v1431_v12, %v1432_v44  ;;  %v3683_v20 = vor.u32 %v3682_v15, %v3679_v63  ;;  %v8855_v8 = vshrl.u32 %v7397_v13, 16 }
  0xef   : > { %5827 = vmatmul.mubr.msk.bf16.gmra.mrb[8].mxu1 %vm822_vm4, %v8853_v38  ;;  %5979 = vmatmul.mubr.msk.bf16.gmra.mrb[24].mxu0 %vm822_vm4, %v8854_v54  ;;  %v8856_v42 = vcombine.low %v7651_v1, %v7655_v22  ;;  %v8857_v24 = vcombine.low %v7628_v47, %v7631_v25  ;;  %v7837_v6 = vrot.slane %v3686_v9, 5  ;;  %v1436_v12 = vrot.slane %v7112_v5, 5 }
  0xf0   : > { %v3692_v32 = vrot.slane %v8855_v8, 4  ;;  %v8858_v50 = vshrl.u32 %v7401_v14, 16  ;;  %v8859_v13 = vshll.u32 %v7401_v14, 16  ;;  %v5348_v41 = vcombine.low %v3617_v11, %v3627_v33  ;;  %v7857_v14 = vld [vmem:[%s7340_s27 + $0x38] sm:$0x1] }
  0xf1   : > { %5830 = vmatprep.mubr.msk.bf16.mxu1 %vm822_vm4, %v8856_v42  ;;  %5982 = vmatprep.mubr.msk.bf16.mxu0 %vm822_vm4, %v8857_v24  ;;  %v3696_v1 = vshll.u32 %v7813_v26, 16  ;;  %v7845_v22 = vrot.slane %v3710_v60, 5  ;;  %v8860_v58 = vshrl.u32 %v7404_v19, 16  ;;  %v7849_v18 = vcombine.low %v3641_v36, %v3651_v7  ;;  %v6450_v33 = vld [vmem:[%s6729_s25 + $0x90] sm:$0xf] }
  0xf2   : > { %v3703_v10 = vrot.slane %v8858_v50, 4  ;;  %v3706_v3 = vrot.slane %v8859_v13, 5  ;;  %v5177_v5 = vcombine.low %v7799_v28, %v7803_v31  ;;  %v3665_v63 = vsel %vm6763_vm5, %v3660_v46, %v7760_v21  ;;  %v6451_v7 = vld [vmem:[%s6729_s25 + $0x98] sm:$0x1] }
  0xf3   : > { %v3716_v44 = vrot.slane %v8860_v58, 4  ;;  %v3734_v16 = vshll.u32 %v7429_v35, 16  ;;  %v3675_v15 = vsel %vm6763_vm5, %v3670_v4, %v3674_v29  ;;  %v5178_v19 = vcombine.low %v7810_v51, %v7825_v34  ;;  %v8861_v4 = vld [vmem:[#allocation12_spill] sm:$0xff] }
  0xf4   : > { %v7864_v11 = vrot.slane %v3683_v20, 4  ;;  %v5162_v9 = vrot.slane %v6450_v33, 9  ;;  %v3693_v36 = vor.u32 %v3692_v32, %v7837_v6  ;;  %v1438_v60 = vrot.slane %v1436_v12, 4 }
  0xf5   : > { %v1439_v21 = vrot.slane %v6451_v7, 5  ;;  %v3707_v46 = vor.u32 %v3706_v3, %v3703_v10  ;;  %v3698_v38 = vrot.slane %v3696_v1, 5  ;;  %v3717_v54 = vor.u32 %v3716_v44, %v7845_v22  ;;  %v7897_v44 = vld [vmem:[%s7340_s27 + $0x44] sm:$0x1] }
  0xf6   : > { %v3720_v8 = vshll.u32 %v7857_v14, 16  ;;  %v1443_v29 = vrot.slane %v7136_v56, 5  ;;  %v8862_v42 = vshrl.u32 %v8861_v4, 16  ;;  %v8863_v24 = vshll.u32 %v8861_v4, 16  ;;  %v8869_v4 = vld [vmem:[#allocation6_spill] sm:$0xff] }
  0xf7   : > { %v7876_v32 = vrot.slane %v3734_v16, 5  ;;  %v8864_v13 = vshrl.u32 %v7429_v35, 16  ;;  %v8865_v10 = vcombine.low %v7665_v45, %v7685_v30  ;;  %v8866_v56 = vcombine.low %v7660_v0, %v7688_v57  ;;  %v8867_v45 = vld [vmem:[#allocation14_spill] sm:$0xff] }
  0xf8   : > { %v3727_v20 = vrot.slane %v8862_v42, 4  ;;  %v3730_v50 = vrot.slane %v8863_v24, 5  ;;  %v5350_v3 = vcombine.low %v3665_v63, %v3675_v15  ;;  %v3689_v1 = vsel %vm6763_vm5, %v7864_v11, %v7837_v6  ;;  %v6452_v11 = vld [vmem:[%s6729_s25 + $0x9c] sm:$0xf] }
  0xf9   : > { %v3740_v58 = vrot.slane %v8864_v13, 4  ;;  %5831 = vmatmul.mubr.msk.bf16.gmra.mrb[12].mxu1 %vm822_vm4, %v8865_v10  ;;  %5983 = vmatmul.mubr.msk.bf16.gmra.mrb[28].mxu0 %vm822_vm4, %v8866_v56  ;;  %v7894_v35 = vsel %vm7022_vm8, %v5162_v9, %v1436_v12  ;;  %v3758_v30 = vshll.u32 %v8867_v45, 16  ;;  %v8868_v16 = vcombine.low %v7725_v27, %v7729_v2  ;;  %v8871_v13 = vld [vmem:[#allocation13_spill] sm:$0xff] }
  0xfa   : > { %5988 = vmatprep.mubr.msk.bf16.mxu0 %vm822_vm4, %v5348_v41  ;;  %v3694_v63 = vrot.slane %v3693_v36, 4  ;;  %v7907_v15 = vsel %vm7022_vm8, %v1438_v60, %v1439_v21  ;;  %v3708_v6 = vrot.slane %v3707_v46, 4  ;;  %v5163_v12 = vrot.slane %v6452_v11, 9  ;;  %v8870_v41 = vld [vmem:[#allocation8_spill] sm:$0xff]  ;;  %v7934_v11 = vld [vmem:[%s7340_s27 + $0x50] sm:$0x1] }
  0xfb   : > { %5834 = vmatprep.mubr.msk.bf16.mxu1 %vm822_vm4, %v8868_v16  ;;  %v3718_v33 = vrot.slane %v3717_v54, 4  ;;  %v3722_v9 = vrot.slane %v3720_v8, 5  ;;  %v1445_v7 = vrot.slane %v1443_v29, 4  ;;  %v1446_v42 = vrot.slane %v8869_v4, 5 }
  0xfc   : > { %v3731_v24 = vor.u32 %v3730_v50, %v3727_v20  ;;  %v3741_v27 = vor.u32 %v3740_v58, %v7876_v32  ;;  %v3744_v2 = vshll.u32 %v7897_v44, 16  ;;  %v1450_v36 = vrot.slane %v8870_v41, 5 }
  0xfd   : > { %v8872_v10 = vshrl.u32 %v8871_v13, 16  ;;  %v8873_v21 = vshll.u32 %v8871_v13, 16  ;;  %v7918_v56 = vrot.slane %v3758_v30, 5  ;;  %v8874_v54 = vshrl.u32 %v8867_v45, 16 }
  0xfe   : > { %v3699_v20 = vsel %vm6763_vm5, %v3694_v63, %v3698_v38  ;;  %v5179_v50 = vcombine.low %v7894_v35, %v7907_v15  ;;  %v3713_v58 = vsel %vm6763_vm5, %v3708_v6, %v7845_v22  ;;  %v7931_v16 = vsel %vm7022_vm8, %v5163_v12, %v1443_v29  ;;  %v8875_v38 = vld [vmem:[#allocation7_spill] sm:$0xff]  ;;  %v8876_v35 = vld [vmem:[#allocation17_spill] sm:$0xff] }
  0xff   : > { %v3751_v60 = vrot.slane %v8872_v10, 4  ;;  %v3754_v46 = vrot.slane %v8873_v21, 5  ;;  %v3764_v8 = vrot.slane %v8874_v54, 4  ;;  %v3723_v45 = vsel %vm6763_vm5, %v3718_v33, %v3722_v9  ;;  %v8877_v6 = vld [vmem:[#allocation9_spill] sm:$0xff]  ;;  %v7966_v10 = vld [vmem:[%s7340_s27 + $0x5c] sm:$0x1] }
 0x100   : > { %v7940_v30 = vsel %vm7022_vm8, %v1445_v7, %v1446_v42  ;;  %v5164_v63 = vrot.slane %v8875_v38, 9  ;;  %v3782_v15 = vshll.u32 %v8876_v35, 16  ;;  %v3732_v4 = vrot.slane %v3731_v24, 4  ;;  %v8878_v42 = vld [vmem:[#allocation16_spill] sm:$0xff]  ;;  %v8884_v54 = vld [vmem:[#allocation10_spill] sm:$0xff] }
 0x101   : > { %v3746_v41 = vrot.slane %v3744_v2, 5  ;;  %v1452_v22 = vrot.slane %v1450_v36, 4  ;;  %v1453_v29 = vrot.slane %v8877_v6, 5  ;;  %5835 = vmatmul.mubr.msk.bf16.gmra.mrb[16].mxu1 %vm822_vm4, %v5176_v59  ;;  %5989 = vmatmul.mubr.msk.bf16.vlgmr.msra.gmra.mrb[0].mxu0 %vm822_vm4, %v7849_v18  ;;  %v3742_v12 = vrot.slane %v3741_v27, 4 }
 0x102   : > { %v3755_v33 = vor.u32 %v3754_v46, %v3751_v60  ;;  %v3765_v9 = vor.u32 %v3764_v8, %v7918_v56  ;;  %v3768_v7 = vshll.u32 %v7934_v11, 16  ;;  %6021 = vmatpush3.bf16.msra.mxu0 %v8878_v42  ;;  %5838 = vmatprep.mubr.msk.bf16.mxu1 %vm822_vm4, %v5177_v5  ;;  %v5351_v24 = vcombine.low %v3689_v1, %v3699_v20  ;;  %v8883_v5 = vld [vmem:[#allocation19_spill] sm:$0xff] }
 0x103   : > { %v5180_v17 = vcombine.low %v7931_v16, %v7940_v30  ;;  %v8880_v59 = vshrl.u32 %v8879_v49, 16  ;;  %v8881_v27 = vshll.u32 %v8879_v49, 16  ;;  %5992 = vmatprep.mubr.msk.bf16.mxu0 %vm822_vm4, %v5350_v3  ;;  %v5352_v13 = vcombine.low %v3713_v58, %v3723_v45  ;;  %v6453_v42 = vld [vmem:[%s6729_s25 + $0xb4] sm:$0xf]  ;;  %v7995_v49 = vld [vmem:[%s7340_s27 + $0x68] sm:$0x1] }
 0x104   : > { %v7968_v60 = vrot.slane %v3782_v15, 5  ;;  %v8882_v28 = vshrl.u32 %v8876_v35, 16  ;;  %v3806_v1 = vshll.u32 %v8883_v5, 16  ;;  %v3737_v21 = vsel %vm6763_vm5, %v3732_v4, %v7876_v32  ;;  %v8885_v32 = vld [vmem:[#allocation18_spill] sm:$0xff] }
 0x105   : > { %v3775_v18 = vrot.slane %v8880_v59, 4  ;;  %v3778_v2 = vrot.slane %v8881_v27, 5  ;;  %v7978_v46 = vsel %vm7022_vm8, %v5164_v63, %v1450_v36  ;;  %v7982_v3 = vsel %vm7022_vm8, %v1452_v22, %v1453_v29 }
 0x106   : > { %v3788_v31 = vrot.slane %v8882_v28, 4  ;;  %v1457_v8 = vrot.slane %v8884_v54, 5  ;;  %v3747_v20 = vsel %vm6763_vm5, %v3742_v12, %v3746_v41  ;;  %v3756_v58 = vrot.slane %v3755_v33, 4 }
 0x107   : > { %v3766_v45 = vrot.slane %v3765_v9, 4  ;;  %v3770_v38 = vrot.slane %v3768_v7, 5  ;;  %v3779_v35 = vor.u32 %v3778_v2, %v3775_v18  ;;  %v3792_v15 = vshll.u32 %v7966_v10, 16  ;;  %v8889_v7 = vld [vmem:[#allocation11_spill] sm:$0xff] }
 0x108   : > { %v8886_v4 = vshrl.u32 %v8885_v32, 16  ;;  %v8887_v36 = vshll.u32 %v8885_v32, 16  ;;  %v5165_v22 = vrot.slane %v6453_v42, 9  ;;  %v3789_v29 = vor.u32 %v3788_v31, %v7968_v60  ;;  %v8038_v32 = vld [vmem:[%s7340_s27 + $0x80] sm:$0x1] }
 0x109   : > { %v7997_v59 = vrot.slane %v3806_v1, 5  ;;  %v8888_v41 = vshrl.u32 %v8883_v5, 16  ;;  %v5181_v33 = vcombine.low %v7978_v46, %v7982_v3  ;;  %v1459_v9 = vrot.slane %v1457_v8, 4  ;;  %5839 = vmatmul.mubr.msk.bf16.gmra.mrb[20].mxu1 %vm822_vm4, %v5178_v19  ;;  %5993 = vmatmul.mubr.msk.bf16.gmra.mrb[4].mxu0 %vm822_vm4, %v5351_v24  ;;  %v8890_v5 = vld [vmem:[#allocation22_spill] sm:$0xff]  ;;  %v8891_v3 = vld [vmem:[#allocation20_spill] sm:$0xff] }
 0x10a   : > { %v3799_v6 = vrot.slane %v8886_v4, 4  ;;  %v3802_v63 = vrot.slane %v8887_v36, 5  ;;  %v1460_v18 = vrot.slane %v8889_v7, 5  ;;  %v3830_v27 = vshll.u32 %v7506_v61, 16  ;;  %5842 = vmatprep.mubr.msk.bf16.mxu1 %vm822_vm4, %v5179_v50  ;;  %5996 = vmatprep.mubr.msk.bf16.mxu0 %vm822_vm4, %v5352_v13  ;;  %v8031_v13 = vld [vmem:[%s7340_s27 + $0x74] sm:$0x1] }
 0x10b   : > { %v3812_v12 = vrot.slane %v8888_v41, 4  ;;  %v5353_v2 = vcombine.low %v3737_v21, %v3747_v20  ;;  %v3761_v28 = vsel %vm6763_vm5, %v3756_v58, %v7918_v56  ;;  %v3771_v31 = vsel %vm6763_vm5, %v3766_v45, %v3770_v38  ;;  %v8895_v4 = vld [vmem:[#allocation21_spill] sm:$0xff] }
 0x10c   : > { %v3854_v1 = vshll.u32 %v8890_v5, 16  ;;  %v3780_v51 = vrot.slane %v3779_v35, 4  ;;  %v3794_v34 = vrot.slane %v3792_v15, 5  ;;  %v3803_v19 = vor.u32 %v3802_v63, %v3799_v6 }
 0x10d   : > { %v3816_v24 = vshll.u32 %v7995_v49, 16  ;;  %v3790_v21 = vrot.slane %v3789_v29, 4  ;;  %v3813_v46 = vor.u32 %v3812_v12, %v7997_v59  ;;  %v8892_v56 = vshrl.u32 %v8891_v3, 16 }
 0x10e   : > { %v8893_v20 = vshll.u32 %v8891_v3, 16  ;;  %v8026_v45 = vsel %vm7022_vm8, %v5165_v22, %v1457_v8  ;;  %v1461_v50 = vsel %vm7022_vm8, %v1459_v9, %v1460_v18  ;;  %v8033_v38 = vrot.slane %v3830_v27, 5 }
 0x10f   : > { %v3823_v54 = vrot.slane %v8892_v56, 4  ;;  %v8894_v35 = vshrl.u32 %v7506_v61, 16  ;;  %v8896_v6 = vshrl.u32 %v8895_v4, 16  ;;  %v8897_v63 = vshll.u32 %v8895_v4, 16  ;;  %v8081_v4 = vld [vmem:[%s7340_s27 + $0x8c] sm:$0x1] }
 0x110   : > { %v3826_v58 = vrot.slane %v8893_v20, 5  ;;  %v8044_v8 = vrot.slane %v3854_v1, 5  ;;  %v8898_v22 = vshrl.u32 %v8890_v5, 16  ;;  %v5354_v41 = vcombine.low %v3761_v28, %v3771_v31 }
 0x111   : > { %v3836_v15 = vrot.slane %v8894_v35, 4  ;;  %v3847_v36 = vrot.slane %v8896_v6, 4  ;;  %v3850_v42 = vrot.slane %v8897_v63, 5  ;;  %v3785_v12 = vsel %vm6763_vm5, %v3780_v51, %v7968_v60  ;;  %5843 = vmatmul.mubr.msk.bf16.gmra.mrb[24].mxu1 %vm822_vm4, %v5180_v17  ;;  %5997 = vmatmul.mubr.msk.bf16.gmra.mrb[8].mxu0 %vm822_vm4, %v5353_v2  ;;  %v6454_v63 = vld [vmem:[%s6735_s7] sm:$0xf] }
 0x112   : > { %v3860_v29 = vrot.slane %v8898_v22, 4  ;;  %v3804_v61 = vrot.slane %v3803_v19, 4  ;;  %v3818_v9 = vrot.slane %v3816_v24, 5  ;;  %v3795_v7 = vsel %vm6763_vm5, %v3790_v21, %v3794_v34  ;;  %5846 = vmatprep.mubr.msk.bf16.mxu1 %vm822_vm4, %v5181_v33  ;;  %6000 = vmatprep.mubr.msk.bf16.mxu0 %vm822_vm4, %v5354_v41 }
 0x113   : > { %v3814_v18 = vrot.slane %v3813_v46, 4  ;;  %v3827_v27 = vor.u32 %v3826_v58, %v3823_v54  ;;  %v3840_v3 = vshll.u32 %v8031_v13, 16  ;;  %v3896_v1 = vshll.u32 %v7581_v55, 16 }
 0x114   : > { %v3906_v56 = vshrl.u32 %v7596_v52, 16  ;;  %v3837_v5 = vor.u32 %v3836_v15, %v8033_v38  ;;  %v3864_v28 = vshll.u32 %v8038_v32, 16  ;;  %v3917_v31 = vshrl.u32 %v7599_v23, 16 }
 0x115   : > { %v3851_v60 = vor.u32 %v3850_v42, %v3847_v36  ;;  %v3861_v51 = vor.u32 %v3860_v29, %v8044_v8  ;;  %v3878_v34 = vshll.u32 %v7563_v62, 16  ;;  %v3920_v19 = vshll.u32 %v7599_v23, 16  ;;  %v6455_v42 = vld [vmem:[%s6735_s7 + $0x4] sm:$0xf]  ;;  %v8090_v29 = vld [vmem:[%s7340_s27 + $0x98] sm:$0x1] }
 0x116   : > { %v5182_v24 = vcombine.low %v8026_v45, %v1461_v50  ;;  %v5355_v16 = vcombine.low %v3785_v12, %v3795_v7  ;;  %v3809_v30 = vsel %vm6763_vm5, %v3804_v61, %v7997_v59  ;;  %v3819_v17 = vsel %vm6763_vm5, %v3814_v18, %v3818_v9 }
 0x117   : > { %v3828_v2 = vrot.slane %v3827_v27, 4  ;;  %v3842_v21 = vrot.slane %v3840_v3, 5  ;;  %v3902_v46 = vshll.u32 %v7596_v52, 16  ;;  %v3838_v33 = vrot.slane %v3837_v5, 4 }
 0x118   : > { %v3866_v54 = vrot.slane %v3864_v28, 5  ;;  %v8899_v20 = vshrl.u32 %v7554_v40, 16  ;;  %v8900_v45 = vshll.u32 %v7554_v40, 16  ;;  %v3852_v35 = vrot.slane %v3851_v60, 4 }
 0x119   : > { %v3862_v15 = vrot.slane %v3861_v51, 4  ;;  %v8083_v59 = vrot.slane %v3878_v34, 5  ;;  %v8901_v6 = vshrl.u32 %v7563_v62, 16  ;;  %v5200_v52 = vcombine.low %v6454_v63, %v6455_v42  ;;  %5847 = vmatmul.mubr.msk.bf16.gmra.mrb[28].mxu1 %vm822_vm4, %v5182_v24  ;;  %6001 = vmatmul.mubr.msk.bf16.gmra.mrb[12].mxu0 %vm822_vm4, %v5355_v16  ;;  %v6456_v24 = vld [vmem:[%s6735_s7 + $0xc] sm:$0xf] }
 0x11a   : > { %v3871_v58 = vrot.slane %v8899_v20, 4  ;;  %v3874_v50 = vrot.slane %v8900_v45, 5  ;;  %v5356_v22 = vcombine.low %v3809_v30, %v3819_v17  ;;  %v8902_v41 = vshrl.u32 %v7581_v55, 16  ;;  %v6458_v30 = vld [vmem:[%s6735_s7 + $0x18] sm:$0xf] }
 0x11b   : > { %v3884_v36 = vrot.slane %v8901_v6, 4  ;;  %v3898_v40 = vrot.slane %v3896_v1, 5  ;;  %v3930_v61 = vshrl.u32 %v7614_v53, 16  ;;  %v3941_v9 = vshrl.u32 %v7628_v47, 16  ;;  %5852 = vmatprep.mubr.msk.bf16.mxu1 %vm822_vm4, %v5200_v52  ;;  %v6459_v17 = vld [vmem:[%s6735_s7 + $0x1c] sm:$0xf] }
 0x11c   : > { %v3895_v12 = vrot.slane %v8902_v41, 4  ;;  %v8096_v7 = vrot.slane %v3902_v46, 5  ;;  %v3908_v18 = vrot.slane %v3906_v56, 4  ;;  %v3833_v62 = vsel %vm6763_vm5, %v3828_v2, %v8033_v38  ;;  %6004 = vmatprep.mubr.msk.bf16.mxu0 %vm822_vm4, %v5356_v22  ;;  %v8129_v42 = vld [vmem:[%s7340_s27 + $0xa4] sm:$0x1] }
 0x11d   : > { %v3843_v27 = vsel %vm6763_vm5, %v3838_v33, %v3842_v21  ;;  %v3875_v3 = vor.u32 %v3874_v50, %v3871_v58  ;;  %v3888_v55 = vshll.u32 %v8081_v4, 16  ;;  %v3857_v1 = vsel %vm6763_vm5, %v3852_v35, %v8044_v8  ;;  %v6457_v8 = vld [vmem:[%s6735_s7 + $0x10] sm:$0xf] }
 0x11e   : > { %v3867_v38 = vsel %vm6763_vm5, %v3862_v15, %v3866_v54  ;;  %v3885_v56 = vor.u32 %v3884_v36, %v8083_v59  ;;  %v3912_v5 = vshll.u32 %v8090_v29, 16  ;;  %v3944_v28 = vshll.u32 %v7628_v47, 16 }
 0x11f   : > { %v3954_v60 = vshrl.u32 %v7631_v25, 16  ;;  %v3899_v51 = vor.u32 %v3898_v40, %v3895_v12  ;;  %v3926_v34 = vshll.u32 %v7614_v53, 16  ;;  %v5201_v16 = vcombine.low %v6456_v24, %v6457_v8  ;;  %v8136_v40 = vld [vmem:[%s7340_s27 + $0xb0] sm:$0x1] }
 0x120   : > { %v5202_v2 = vcombine.low %v6458_v30, %v6459_v17  ;;  %v3909_v21 = vor.u32 %v3908_v18, %v8096_v7  ;;  %v3950_v47 = vshll.u32 %v7631_v25, 16  ;;  %v5357_v46 = vcombine.low %v3833_v62, %v3843_v27 }
 0x121   : > { %v5358_v33 = vcombine.low %v3857_v1, %v3867_v38  ;;  %v3876_v54 = vrot.slane %v3875_v3, 4  ;;  %v3890_v20 = vrot.slane %v3888_v55, 5  ;;  %v3886_v58 = vrot.slane %v3885_v56, 4  ;;  %5853 = vmatmul.mubr.msk.bf16.vlgmr.msra.gmra.mrb[0].mxu1 %vm822_vm4, %v5201_v16  ;;  %v6460_v1 = vld [vmem:[%s6735_s7 + $0x24] sm:$0xf] }
 0x122   : > { %v3914_v45 = vrot.slane %v3912_v5, 5  ;;  %v3919_v53 = vrot.slane %v3917_v31, 4  ;;  %v3922_v50 = vrot.slane %v3920_v19, 5  ;;  %v3900_v35 = vrot.slane %v3899_v51, 4  ;;  %6005 = vmatmul.mubr.msk.bf16.gmra.mrb[16].mxu0 %vm822_vm4, %v5357_v46  ;;  %5856 = vmatprep.mubr.msk.bf16.mxu1 %vm822_vm4, %v5202_v2  ;;  %v6461_v38 = vld [vmem:[%s6735_s7 + $0x28] sm:$0xf] }
 0x123   : > { %v8126_v15 = vrot.slane %v3926_v34, 5  ;;  %v3932_v6 = vrot.slane %v3930_v61, 4  ;;  %v3943_v36 = vrot.slane %v3941_v9, 4  ;;  %v3910_v63 = vrot.slane %v3909_v21, 4  ;;  %6008 = vmatprep.mubr.msk.bf16.mxu0 %vm822_vm4, %v5358_v33  ;;  %v6463_v51 = vld [vmem:[%s6735_s7 + $0x34] sm:$0xf] }
 0x124   : > { %v3946_v25 = vrot.slane %v3944_v28, 5  ;;  %v8131_v52 = vrot.slane %v3950_v47, 5  ;;  %v3956_v22 = vrot.slane %v3954_v60, 4  ;;  %v3965_v41 = vshrl.u32 %v7660_v0, 16  ;;  %v6462_v60 = vld [vmem:[%s6735_s7 + $0x30] sm:$0xf] }
 0x125   : > { %v3968_v12 = vshll.u32 %v7660_v0, 16  ;;  %v3978_v23 = vshrl.u32 %v7688_v57, 16  ;;  %v3881_v31 = vsel %vm6763_vm5, %v3876_v54, %v8083_v59  ;;  %v3891_v19 = vsel %vm6763_vm5, %v3886_v58, %v3890_v20  ;;  %v8903_v0 = vld [vmem:[#allocation5_spill] sm:$0xff]  ;;  %v8166_v21 = vld [vmem:[%s7340_s27 + $0xbc] sm:$0x1] }
 0x126   : > { %v3974_v61 = vshll.u32 %v7688_v57, 16  ;;  %6055 = vmatpush3.bf16.msra.mxu1 %v8903_v0  ;;  %v3905_v9 = vsel %vm6763_vm5, %v3900_v35, %v8096_v7  ;;  %v3923_v18 = vor.u32 %v3922_v50, %v3919_v53  ;;  %v3933_v62 = vor.u32 %v3932_v6, %v8126_v15 }
 0x127   : > { %v3936_v59 = vshll.u32 %v8129_v42, 16  ;;  %v3915_v57 = vsel %vm6763_vm5, %v3910_v63, %v3914_v45  ;;  %v3947_v27 = vor.u32 %v3946_v25, %v3943_v36  ;;  %v3957_v3 = vor.u32 %v3956_v22, %v8131_v52  ;;  %v8173_v45 = vld [vmem:[%s6735_s7 + $0x6c] sm:$0xf]  ;;  %v6465_v25 = vld [vmem:[%s7340_s27 + $0x4] sm:$0xf] }
 0x128   : > { %v3960_v55 = vshll.u32 %v8136_v40, 16  ;;  %v5203_v7 = vcombine.low %v6460_v1, %v6461_v38  ;;  %v3967_v56 = vrot.slane %v3965_v41, 4  ;;  %v3970_v5 = vrot.slane %v3968_v12, 5  ;;  %v6466_v41 = vld [vmem:[%s7340_s27 + $0x10] sm:$0xf] }
 0x129   : > { %v5359_v28 = vcombine.low %v3881_v31, %v3891_v19  ;;  %v5204_v34 = vcombine.low %v6462_v60, %v6463_v51  ;;  %v8163_v24 = vrot.slane %v3974_v61, 5  ;;  %v3980_v8 = vrot.slane %v3978_v23, 4  ;;  %v8192_v23 = vld [vmem:[%s6735_s7 + $0x70] sm:$0xf]  ;;  %v6468_v19 = vld [vmem:[%s6735_s7 + $0x3c] sm:$0xf] }
 0x12a   : > { %v5360_v16 = vcombine.low %v3905_v9, %v3915_v57  ;;  %v3924_v30 = vrot.slane %v3923_v18, 4  ;;  %v3934_v17 = vrot.slane %v3933_v62, 4  ;;  %v3938_v2 = vrot.slane %v3936_v59, 5  ;;  %5857 = vmatmul.mubr.msk.bf16.gmra.mrb[4].mxu1 %vm822_vm4, %v5203_v7  ;;  %v6469_v61 = vld [vmem:[%s6735_s7 + $0x40] sm:$0xf] }
 0x12b   : > { %v3948_v47 = vrot.slane %v3947_v27, 4  ;;  %v3958_v46 = vrot.slane %v3957_v3, 4  ;;  %v3962_v33 = vrot.slane %v3960_v55, 5  ;;  %v3971_v54 = vor.u32 %v3970_v5, %v3967_v56  ;;  %6009 = vmatmul.mubr.msk.bf16.gmra.mrb[20].mxu0 %vm822_vm4, %v5359_v28  ;;  %5860 = vmatprep.mubr.msk.bf16.mxu1 %vm822_vm4, %v5204_v34  ;;  %v6470_v59 = vld [vmem:[%s7340_s27 + $0x1c] sm:$0xf]  ;;  %v8904_v56 = vld [vmem:[#allocation23_spill] sm:$0xff] }
 0x12c   : > { %v3981_v20 = vor.u32 %v3980_v8, %v8163_v24  ;;  %v3984_v58 = vshll.u32 %v8166_v21, 16  ;;  %v2347_v53 = vshrl.u32 %v8173_v45, 16  ;;  %v2350_v50 = vshll.u32 %v8173_v45, 16  ;;  %6012 = vmatprep.mubr.msk.bf16.mxu0 %vm822_vm4, %v5360_v16  ;;  %v6471_v27 = vld [vmem:[%s6735_s7 + $0x48] sm:$0xf] }
 0x12d   : > { %v3929_v35 = vsel %vm6763_vm5, %v3924_v30, %v8126_v15  ;;  %v3939_v6 = vsel %vm6763_vm5, %v3934_v17, %v3938_v2  ;;  %v3953_v36 = vsel %vm6763_vm5, %v3948_v47, %v8131_v52  ;;  %v3963_v63 = vsel %vm6763_vm5, %v3958_v46, %v3962_v33  ;;  %v6472_v3 = vld [vmem:[%s6735_s7 + $0x4c] sm:$0xf]  ;;  %v6473_v38 = vld [vmem:[%s7340_s27] sm:$0xf]  ;;  %v6475_v47 = vld [vmem:[%s7340_s27 + $0x18] sm:$0xf] }
 0x12e   : > { %v4300_v22 = vrot.slane %v6465_v25, 5  ;;  %v4307_v12 = vrot.slane %v6466_v41, 5  ;;  %v2356_v15 = vshll.u32 %v8192_v23, 16  ;;  %v2360_v31 = vshrl.u32 %v8192_v23, 16  ;;  %v6474_v60 = vld [vmem:[%s7340_s27 + $0xc] sm:$0xf] }
 0x12f   : > { %v5205_v52 = vcombine.low %v6468_v19, %v6469_v61  ;;  %v3972_v0 = vrot.slane %v3971_v54, 4  ;;  %v5361_v9 = vcombine.low %v3929_v35, %v3939_v6  ;;  %v3982_v18 = vrot.slane %v3981_v20, 4  ;;  %v6477_v6 = vld [vmem:[%s7340_s27 + $0x28] sm:$0xf]  ;;  %v6479_v25 = vld [vmem:[%s6735_s7 + $0x58] sm:$0xf] }
 0x130   : > { %v3986_v62 = vrot.slane %v3984_v58, 5  ;;  %v4314_v57 = vrot.slane %v6470_v59, 5  ;;  %v5206_v55 = vcombine.low %v6471_v27, %v6472_v3  ;;  %v5362_v1 = vcombine.low %v3953_v36, %v3963_v63  ;;  %v6478_v63 = vld [vmem:[%s6735_s7 + $0x54] sm:$0xf]  ;;  %v6482_v19 = vld [vmem:[%s7340_s27 + $0x24] sm:$0xf] }
 0x131   : > { %v5380_v7 = vrot.slane %v6473_v38, 9  ;;  %v4303_v5 = vrot.slane %v8904_v56, 5  ;;  %v4302_v28 = vrot.slane %v4300_v22, 4  ;;  %v5381_v51 = vrot.slane %v6474_v60, 9  ;;  %v8278_v56 = vld [vmem:[%s6735_s7 + $0x88] sm:$0xf] }
 0x132   : > { %v4309_v34 = vrot.slane %v4307_v12, 4  ;;  %v4310_v8 = vrot.slane %v7721_v43, 5  ;;  %v8205_v16 = vrot.slane %v2347_v53, 4  ;;  %v8207_v30 = vrot.slane %v2350_v50, 5  ;;  %5861 = vmatmul.mubr.msk.bf16.gmra.mrb[8].mxu1 %vm822_vm4, %v5205_v52 }
 0x133   : > { %v3977_v17 = vsel %vm6763_vm5, %v3972_v0, %v8163_v24  ;;  %6013 = vmatmul.mubr.msk.bf16.gmra.mrb[24].mxu0 %vm822_vm4, %v5361_v9  ;;  %v3987_v2 = vsel %vm6763_vm5, %v3982_v18, %v3986_v62  ;;  %v5382_v46 = vrot.slane %v6475_v47, 9  ;;  %v4316_v43 = vrot.slane %v4314_v57, 4  ;;  %v8223_v24 = vld [vmem:[%s6735_s7 + $0x74] sm:$0x1]  ;;  %5864 = vmatprep.mubr.msk.bf16.mxu1 %vm822_vm4, %v5206_v55  ;;  %v6483_v9 = vld [vmem:[%s7340_s27 + $0x30] sm:$0xf] }
 0x134   : > { %v4317_v33 = vrot.slane %v7758_v48, 5  ;;  %v8218_v54 = vrot.slane %v2356_v15, 5  ;;  %v8220_v20 = vrot.slane %v2360_v31, 4  ;;  %v2366_v58 = vshll.u32 %v8223_v24, 16  ;;  %6016 = vmatprep.mubr.msk.bf16.mxu0 %vm822_vm4, %v5362_v1  ;;  %v8244_v15 = vld [vmem:[%s6735_s7 + $0x60] sm:$0xf] }
 0x135   : > { %v4301_v53 = vsel %vm7022_vm8, %v5380_v7, %v4300_v22  ;;  %v4304_v48 = vsel %vm7022_vm8, %v4302_v28, %v4303_v5  ;;  %v8234_v50 = vsel %vm7022_vm8, %v5381_v51, %v4307_v12  ;;  %v8238_v35 = vsel %vm7022_vm8, %v4309_v34, %v4310_v8  ;;  %v8247_v31 = vld [vmem:[%s6735_s7 + $0x64] sm:$0xf]  ;;  %v6484_v62 = vld [vmem:[%s7340_s27 + $0x34] sm:$0xf]  ;;  %v8270_v1 = vld [vmem:[%s6735_s7 + $0x7c] sm:$0xf] }
 0x136   : > { %v4321_v36 = vrot.slane %v6477_v6, 5  ;;  %v5207_v41 = vcombine.low %v6478_v63, %v6479_v25  ;;  %v5363_v22 = vcombine.low %v3977_v17, %v3987_v2  ;;  %v5208_v12 = vcombine.low %v8244_v15, %v8247_v31  ;;  %v8275_v7 = vld [vmem:[%s6735_s7 + $0x84] sm:$0xf]  ;;  %v6489_v51 = vld [vmem:[%s7340_s27 + $0x40] sm:$0xf] }
 0x137   : > { %v5383_v61 = vrot.slane %v6482_v19, 9  ;;  %v8254_v52 = vsel %vm7022_vm8, %v5382_v46, %v4314_v57  ;;  %v8258_v0 = vsel %vm7022_vm8, %v4316_v43, %v4317_v33  ;;  %v5384_v18 = vrot.slane %v6483_v9, 9  ;;  %v8267_v57 = vld [vmem:[%s6735_s7 + $0x78] sm:$0xf]  ;;  %v8291_v2 = vld [vmem:[%s6735_s7 + $0x94] sm:$0xf] }
 0x138   : > { %v4328_v59 = vrot.slane %v6484_v62, 5  ;;  %v5397_v27 = vcombine.low %v4301_v53, %v4304_v48  ;;  %v5209_v3 = vcombine.low %v8173_v45, %v8192_v23  ;;  %v5398_v55 = vcombine.low %v8234_v50, %v8238_v35  ;;  %v8294_v47 = vld [vmem:[%s6735_s7 + $0x90] sm:$0xf]  ;;  %v6493_v6 = vld [vmem:[%s7340_s27 + $0x58] sm:$0xf] }
 0x139   : > { %v5210_v38 = vcombine.low %v8267_v57, %v8270_v1  ;;  %v5211_v5 = vcombine.low %v8275_v7, %v8278_v56  ;;  %v4323_v28 = vrot.slane %v4321_v36, 4  ;;  %v4324_v60 = vrot.slane %v7813_v26, 5  ;;  %v6492_v26 = vld [vmem:[%s7340_s27 + $0x4c] sm:$0xf]  ;;  %v8310_v63 = vld [vmem:[%s6735_s7 + $0xa0] sm:$0xf] }
 0x13a   : > { %v4335_v34 = vrot.slane %v6489_v51, 5  ;;  %v5399_v8 = vcombine.low %v8254_v52, %v8258_v0  ;;  %v8288_v17 = vsel %vm7022_vm8, %v5383_v61, %v4321_v36  ;;  %v4342_v43 = vrot.slane %v6492_v26, 5  ;;  %5865 = vmatmul.mubr.msk.bf16.gmra.mrb[12].mxu1 %vm822_vm4, %v5207_v41  ;;  %v8313_v25 = vld [vmem:[%s6735_s7 + $0x9c] sm:$0xf]  ;;  %v6497_v9 = vld [vmem:[%s7340_s27 + $0x48] sm:$0xf] }
 0x13b   : > { %6017 = vmatmul.mubr.msk.bf16.gmra.mrb[28].mxu0 %vm822_vm4, %v5363_v22  ;;  %v8303_v33 = vsel %vm7022_vm8, %v5384_v18, %v4328_v59  ;;  %v4330_v53 = vrot.slane %v4328_v59, 4  ;;  %v4331_v48 = vrot.slane %v7857_v14, 5  ;;  %v4349_v36 = vrot.slane %v6493_v6, 5  ;;  %5868 = vmatprep.mubr.msk.bf16.mxu1 %vm822_vm4, %v5208_v12  ;;  %v6496_v22 = vld [vmem:[%s7340_s27 + $0x3c] sm:$0xf] }
 0x13c   : > { %6022 = vmatprep.mubr.msk.bf16.mxu0 %vm822_vm4, %v5397_v27  ;;  %v5385_v19 = vrot.slane %v6496_v22, 9  ;;  %v2323_v14 = vshrl.u32 %v8244_v15, 16  ;;  %v2326_v61 = vshll.u32 %v8244_v15, 16  ;;  %v8322_v12 = vsel %vm7022_vm8, %v4323_v28, %v4324_v60  ;;  %v8330_v26 = vld [vmem:[%s6735_s7 + $0xac] sm:$0xf] }
 0x13d   : > { %v4337_v52 = vrot.slane %v4335_v34, 4  ;;  %v4338_v0 = vrot.slane %v7897_v44, 5  ;;  %v5386_v18 = vrot.slane %v6497_v9, 9  ;;  %v4344_v62 = vrot.slane %v4342_v43, 4  ;;  %v8333_v15 = vld [vmem:[%s6735_s7 + $0xa8] sm:$0xf] }
 0x13e   : > { %v4345_v59 = vrot.slane %v7934_v11, 5  ;;  %v2332_v27 = vshll.u32 %v8247_v31, 16  ;;  %v2336_v51 = vshrl.u32 %v8247_v31, 16  ;;  %v6500_v60 = vld [vmem:[%s7340_s27 + $0x54] sm:$0xf]  ;;  %v4351_v6 = vrot.slane %v4349_v36, 4 }
 0x13f   : > { %v5387_v44 = vrot.slane %v6500_v60, 9  ;;  %v4352_v22 = vrot.slane %v7966_v10, 5  ;;  %v5400_v11 = vcombine.low %v8288_v17, %v8322_v12  ;;  %v4332_v9 = vsel %vm7022_vm8, %v4330_v53, %v4331_v48  ;;  %v6501_v10 = vld [vmem:[%s7340_s27 + $0x64] sm:$0xf]  ;;  %v8392_v23 = vld [vmem:[%s6735_s7 + $0xb8] sm:$0xf] }
 0x140   : > { %v2325_v31 = vrot.slane %v2323_v14, 4  ;;  %v2328_v41 = vrot.slane %v2326_v61, 5  ;;  %v8345_v46 = vsel %vm7022_vm8, %v5385_v19, %v4335_v34  ;;  %v8349_v28 = vsel %vm7022_vm8, %v4337_v52, %v4338_v0  ;;  %v6502_v19 = vld [vmem:[%s6735_s7 + $0x68] sm:$0x1] }
 0x141   : > { %v8353_v60 = vsel %vm7022_vm8, %v5386_v18, %v4342_v43  ;;  %v4356_v17 = vrot.slane %v6501_v10, 5  ;;  %v8358_v53 = vsel %vm7022_vm8, %v4344_v62, %v4345_v59  ;;  %v8360_v48 = vrot.slane %v2332_v27, 5 }
 0x142   : > { %v2338_v34 = vrot.slane %v2336_v51, 4  ;;  %v2342_v14 = vshll.u32 %v6502_v19, 16  ;;  %v8365_v61 = vrot.slane %v2366_v58, 5  ;;  %5869 = vmatmul.mubr.msk.bf16.gmra.mrb[16].mxu1 %vm822_vm4, %v5209_v3  ;;  %v5401_v43 = vcombine.low %v8303_v33, %v4332_v9  ;;  %v8395_v58 = vld [vmem:[%s6735_s7 + $0xb4] sm:$0xf] }
 0x143   : > { %6023 = vmatmul.mubr.msk.bf16.vlgmr.msra.gmra.mrb[0].mxu0 %vm822_vm4, %v5398_v55  ;;  %v8378_v12 = vsel %vm7022_vm8, %v5387_v44, %v4349_v36  ;;  %v8382_v24 = vsel %vm7022_vm8, %v4351_v6, %v4352_v22  ;;  %5872 = vmatprep.mubr.msk.bf16.mxu1 %vm822_vm4, %v5210_v38  ;;  %v5402_v45 = vcombine.low %v8345_v46, %v8349_v28  ;;  %v6505_v3 = vld [vmem:[%s7340_s27 + $0x60] sm:$0xf]  ;;  %v4358_v38 = vrot.slane %v4356_v17, 4  ;;  %v6507_v6 = vld [vmem:[%s7340_s27 + $0x70] sm:$0xf] }
 0x144   : > { %6026 = vmatprep.mubr.msk.bf16.mxu0 %vm822_vm4, %v5399_v8  ;;  %v5215_v50 = vcombine.low %v8395_v58, %v8392_v23  ;;  %v2329_v35 = vor.u32 %v2328_v41, %v2325_v31  ;;  %v5388_v55 = vrot.slane %v6505_v3, 9  ;;  %v5403_v33 = vcombine.low %v8353_v60, %v8358_v53 }
 0x145   : > { %v4359_v8 = vrot.slane %v7995_v49, 5  ;;  %v2353_v36 = vor.u32 %v8207_v30, %v8205_v16  ;;  %v5404_v52 = vcombine.low %v8378_v12, %v8382_v24  ;;  %v2339_v0 = vor.u32 %v2338_v34, %v8360_v48  ;;  %v6506_v30 = vld [vmem:[%s7340_s27 + $0x6c] sm:$0xf]  ;;  %v6516_v24 = vld [vmem:[%s7340_s27 + $0x90] sm:$0xf] }
 0x146   : > { %v8408_v18 = vrot.slane %v2342_v14, 5  ;;  %v2363_v41 = vor.u32 %v8220_v20, %v8218_v54  ;;  %v2371_v62 = vshrl.u32 %v8267_v57, 16  ;;  %v2374_v59 = vshll.u32 %v8267_v57, 16 }
 0x147   : > { %v2380_v27 = vshll.u32 %v8270_v1, 16  ;;  %v2384_v49 = vshrl.u32 %v8270_v1, 16  ;;  %v8416_v51 = vrot.slane %v2329_v35, 4  ;;  %v8420_v16 = vsel %vm7022_vm8, %v5388_v55, %v4356_v17 }
 0x148   : > { %v5389_v44 = vrot.slane %v6506_v30, 9  ;;  %v4363_v22 = vrot.slane %v6507_v6, 5  ;;  %v8426_v20 = vsel %vm7022_vm8, %v4358_v38, %v4359_v8  ;;  %v8428_v9 = vrot.slane %v2353_v36, 4 }
 0x149   : > { %v2395_v57 = vshrl.u32 %v8275_v7, 16  ;;  %v2398_v1 = vshll.u32 %v8275_v7, 16  ;;  %v2340_v31 = vrot.slane %v2339_v0, 4  ;;  %v2364_v10 = vrot.slane %v2363_v41, 4  ;;  %v6508_v0 = vld [vmem:[%s6735_s7 + $0x80] sm:$0x1] }
 0x14a   : > { %v2404_v34 = vshll.u32 %v8278_v56, 16  ;;  %v2408_v17 = vshrl.u32 %v8278_v56, 16  ;;  %5873 = vmatmul.mubr.msk.bf16.gmra.mrb[20].mxu1 %vm822_vm4, %v5211_v5  ;;  %v2373_v19 = vrot.slane %v2371_v62, 4  ;;  %v2376_v14 = vrot.slane %v2374_v59, 5 }
 0x14b   : > { %6027 = vmatmul.mubr.msk.bf16.gmra.mrb[4].mxu0 %vm822_vm4, %v5400_v11  ;;  %v8439_v35 = vrot.slane %v2380_v27, 5  ;;  %v2386_v3 = vrot.slane %v2384_v49, 4  ;;  %v8905_v55 = vcombine.low %v8294_v47, %v8291_v2  ;;  %v2335_v7 = vsel %vm6763_vm5, %v8416_v51, %v8360_v48  ;;  %v6509_v49 = vld [vmem:[%s7340_s27 + $0x7c] sm:$0xf] }
 0x14c   : > { %6030 = vmatprep.mubr.msk.bf16.mxu0 %vm822_vm4, %v5401_v43  ;;  %v5405_v56 = vcombine.low %v8420_v16, %v8426_v20  ;;  %v8454_v5 = vsel %vm7022_vm8, %v5389_v44, %v4363_v22  ;;  %v4366_v11 = vrot.slane %v8031_v13, 5  ;;  %v2359_v43 = vsel %vm6763_vm5, %v8428_v9, %v8218_v54 }
 0x14d   : > { %5876 = vmatprep.mubr.msk.bf16.mxu1 %vm822_vm4, %v8905_v55  ;;  %v4365_v38 = vrot.slane %v4363_v22, 4  ;;  %v2397_v8 = vrot.slane %v2395_v57, 4  ;;  %v2400_v36 = vrot.slane %v2398_v1, 5  ;;  %v2369_v48 = vsel %vm6763_vm5, %v2364_v10, %v8365_v61  ;;  %v6513_v55 = vld [vmem:[%s7340_s27 + $0x84] sm:$0xf] }
 0x14e   : > { %v2390_v41 = vshll.u32 %v6508_v0, 16  ;;  %v8465_v62 = vrot.slane %v2404_v34, 5  ;;  %v2410_v59 = vrot.slane %v2408_v17, 4  ;;  %v2345_v13 = vsel %vm6763_vm5, %v2340_v31, %v8408_v18  ;;  %v6510_v18 = vld [vmem:[%s7340_s27 + $0x78] sm:$0xf] }
 0x14f   : > { %v2377_v27 = vor.u32 %v2376_v14, %v2373_v19  ;;  %v2387_v54 = vor.u32 %v2386_v3, %v8439_v35  ;;  %v4370_v51 = vrot.slane %v6509_v49, 5  ;;  %v2419_v30 = vshrl.u32 %v8294_v47, 16  ;;  %v6511_v34 = vld [vmem:[%s6735_s7 + $0x8c] sm:$0x1]  ;;  %v6512_v17 = vld [vmem:[%s7340_s27 + $0x88] sm:$0xf] }
 0x150   : > { %v2422_v61 = vshll.u32 %v8294_v47, 16  ;;  %v2428_v44 = vshll.u32 %v8291_v2, 16  ;;  %v2432_v6 = vshrl.u32 %v8291_v2, 16  ;;  %v8478_v22 = vsel %vm7022_vm8, %v4365_v38, %v4366_v11 }
 0x151   : > { %v5390_v9 = vrot.slane %v6510_v18, 9  ;;  %v4373_v57 = vrot.slane %v8038_v32, 5  ;;  %v2401_v1 = vor.u32 %v2400_v36, %v2397_v8  ;;  %v8482_v31 = vrot.slane %v2390_v41, 5 }
 0x152   : > { %v2411_v10 = vor.u32 %v2410_v59, %v8465_v62  ;;  %v2414_v47 = vshll.u32 %v6511_v34, 16  ;;  %v4377_v19 = vrot.slane %v6512_v17, 5  ;;  %v8906_v2 = vcombine.low %v8313_v25, %v8310_v63 }
 0x153   : > { %6031 = vmatmul.mubr.msk.bf16.gmra.mrb[8].mxu0 %vm822_vm4, %v5402_v45  ;;  %v2378_v32 = vrot.slane %v2377_v27, 4  ;;  %v2388_v14 = vrot.slane %v2387_v54, 4  ;;  %v4372_v3 = vrot.slane %v4370_v51, 4  ;;  %v5391_v11 = vrot.slane %v6513_v55, 9 }
 0x154   : > { %5877 = vmatmul.mubr.msk.bf16.gmra.mrb[24].mxu1 %vm822_vm4, %v8906_v2  ;;  %v8907_v38 = vcombine.low %v8333_v15, %v8330_v26  ;;  %6034 = vmatprep.mubr.msk.bf16.mxu0 %vm822_vm4, %v5403_v33  ;;  %v2421_v8 = vrot.slane %v2419_v30, 4  ;;  %v2424_v36 = vrot.slane %v2422_v61, 5  ;;  %v8504_v46 = vrot.slane %v2428_v44, 5  ;;  %v6515_v44 = vld [vmem:[%s7340_s27 + $0x94] sm:$0xf] }
 0x155   : > { %v2434_v28 = vrot.slane %v2432_v6, 4  ;;  %v5241_v45 = vcombine.low %v2335_v7, %v2345_v13  ;;  %v8506_v0 = vcombine.low %v2359_v43, %v2369_v48  ;;  %v5406_v41 = vcombine.low %v8454_v5, %v8478_v22 }
 0x156   : > { %5880 = vmatprep.mubr.msk.bf16.mxu1 %vm822_vm4, %v8907_v38  ;;  %v2402_v59 = vrot.slane %v2401_v1, 4  ;;  %v2412_v27 = vrot.slane %v2411_v10, 4  ;;  %v2416_v54 = vrot.slane %v2414_v47, 5  ;;  %v4379_v49 = vrot.slane %v4377_v19, 4 }
 0x157   : > { %v4380_v60 = vrot.slane %v8081_v4, 5  ;;  %v2383_v53 = vsel %vm6763_vm5, %v2378_v32, %v8439_v35  ;;  %v2393_v33 = vsel %vm6763_vm5, %v2388_v14, %v8482_v31  ;;  %v8519_v7 = vsel %vm7022_vm8, %v5390_v9, %v4370_v51  ;;  %v6514_v35 = vld [vmem:[%s6735_s7 + $0x98] sm:$0x1] }
 0x158   : > { %v8523_v43 = vsel %vm7022_vm8, %v4372_v3, %v4373_v57  ;;  %v8527_v48 = vsel %vm7022_vm8, %v5391_v11, %v4377_v19  ;;  %v2425_v4 = vor.u32 %v2424_v36, %v2421_v8  ;;  %v2435_v13 = vor.u32 %v2434_v28, %v8504_v46 }
 0x159   : > { %v2438_v30 = vshll.u32 %v6514_v35, 16  ;;  %v2407_v61 = vsel %vm6763_vm5, %v2402_v59, %v8465_v62  ;;  %v4384_v51 = vrot.slane %v6515_v44, 5  ;;  %v2443_v6 = vshrl.u32 %v8313_v25, 16 }
 0x15a   : > { %v2446_v18 = vshll.u32 %v8313_v25, 16  ;;  %v2417_v9 = vsel %vm6763_vm5, %v2412_v27, %v2416_v54  ;;  %v8541_v57 = vsel %vm7022_vm8, %v4379_v49, %v4380_v60  ;;  %v2452_v1 = vshll.u32 %v8310_v63, 16  ;;  %v6518_v54 = vld [vmem:[%s7340_s27 + $0x9c] sm:$0xf]  ;;  %v6519_v60 = vld [vmem:[%s7340_s27 + $0xa0] sm:$0xf] }
 0x15b   : > { %v2456_v31 = vshrl.u32 %v8310_v63, 16  ;;  %6035 = vmatmul.mubr.msk.bf16.gmra.mrb[12].mxu0 %vm822_vm4, %v5404_v52  ;;  %v2467_v25 = vshrl.u32 %v8333_v15, 16  ;;  %v2470_v62 = vshll.u32 %v8333_v15, 16  ;;  %v2476_v10 = vshll.u32 %v8330_v26, 16 }
 0x15c   : > { %5881 = vmatmul.mubr.msk.bf16.gmra.mrb[28].mxu1 %vm822_vm4, %v5215_v50  ;;  %v2480_v34 = vshrl.u32 %v8330_v26, 16  ;;  %6038 = vmatprep.mubr.msk.bf16.mxu0 %vm822_vm4, %v5405_v56  ;;  %v2426_v63 = vrot.slane %v2425_v4, 4  ;;  %v2436_v50 = vrot.slane %v2435_v13, 4  ;;  %v2440_v12 = vrot.slane %v2438_v30, 5  ;;  %v6521_v4 = vld [vmem:[%s7340_s27 + $0xac] sm:$0xf] }
 0x15d   : > { %5902 = vmatprep.mubr.msk.bf16.mxu1 %vm822_vm4, %v5241_v45  ;;  %v5392_v52 = vrot.slane %v6516_v24, 9  ;;  %v4386_v47 = vrot.slane %v4384_v51, 4  ;;  %v4387_v17 = vrot.slane %v8090_v29, 5  ;;  %v2445_v15 = vrot.slane %v2443_v6, 4  ;;  %v6517_v45 = vld [vmem:[%s6735_s7 + $0xa4] sm:$0x1] }
 0x15e   : > { %v2448_v19 = vrot.slane %v2446_v18, 5  ;;  %v5243_v2 = vcombine.low %v2383_v53, %v2393_v33  ;;  %v5407_v26 = vcombine.low %v8519_v7, %v8523_v43  ;;  %v8566_v32 = vrot.slane %v2452_v1, 5 }
 0x15f   : > { %v2458_v16 = vrot.slane %v2456_v31, 4  ;;  %v2469_v20 = vrot.slane %v2467_v25, 4  ;;  %v2472_v56 = vrot.slane %v2470_v62, 5  ;;  %v8568_v14 = vrot.slane %v2476_v10, 5 }
 0x160   : > { %v2482_v3 = vrot.slane %v2480_v34, 4  ;;  %v5244_v55 = vcombine.low %v2407_v61, %v2417_v9  ;;  %v5408_v29 = vcombine.low %v8527_v48, %v8541_v57  ;;  %v2431_v11 = vsel %vm6763_vm5, %v2426_v63, %v8504_v46  ;;  %v6520_v46 = vld [vmem:[%s6735_s7 + $0xb0] sm:$0x1]  ;;  %v6522_v9 = vld [vmem:[%s7340_s27 + $0xa8] sm:$0xf] }
 0x161   : > { %v2441_v38 = vsel %vm6763_vm5, %v2436_v50, %v2440_v12  ;;  %v4385_v8 = vsel %vm7022_vm8, %v5392_v52, %v4384_v51  ;;  %v4388_v36 = vsel %vm7022_vm8, %v4386_v47, %v4387_v17  ;;  %v2449_v28 = vor.u32 %v2448_v19, %v2445_v15  ;;  %v6523_v47 = vld [vmem:[%s6735_s7 + $0xbc] sm:$0x1] }
 0x162   : > { %v2462_v59 = vshll.u32 %v6517_v45, 16  ;;  %v2459_v27 = vor.u32 %v2458_v16, %v8566_v32  ;;  %v5393_v49 = vrot.slane %v6518_v54, 9  ;;  %v4391_v53 = vrot.slane %v6519_v60, 5 }
 0x163   : > { %v2486_v33 = vshll.u32 %v6520_v46, 16  ;;  %6039 = vmatmul.mubr.msk.bf16.gmra.mrb[16].mxu0 %vm822_vm4, %v5406_v41  ;;  %v5245_v7 = vcombine.low %v2431_v11, %v2441_v38  ;;  %v2473_v43 = vor.u32 %v2472_v56, %v2469_v20  ;;  %v2483_v48 = vor.u32 %v2482_v3, %v8568_v14 }
 0x164   : > { %5903 = vmatmul.mubr.msk.bf16.vlgmr.msra.gmra.mrb[16].mxu1 %vm822_vm4, %v8506_v0  ;;  %v4398_v13 = vrot.slane %v6521_v4, 5  ;;  %6042 = vmatprep.mubr.msk.bf16.mxu0 %vm822_vm4, %v5407_v26  ;;  %v2491_v35 = vshrl.u32 %v8395_v58, 16  ;;  %v2494_v0 = vshll.u32 %v8395_v58, 16  ;;  %v2500_v30 = vshll.u32 %v8392_v23, 16  ;;  %v6524_v26 = vld [vmem:[%s7340_s27 + $0xb8] sm:$0xf] }
 0x165   : > { %5906 = vmatprep.mubr.msk.bf16.mxu1 %vm822_vm4, %v5243_v2  ;;  %v2504_v5 = vshrl.u32 %v8392_v23, 16  ;;  %v5409_v22 = vcombine.low %v4385_v8, %v4388_v36  ;;  %v2450_v41 = vrot.slane %v2449_v28, 4  ;;  %v2464_v61 = vrot.slane %v2462_v59, 5 }
 0x166   : > { %v4394_v44 = vrot.slane %v8129_v42, 5  ;;  %v2460_v51 = vrot.slane %v2459_v27, 4  ;;  %v4393_v6 = vrot.slane %v4391_v53, 4  ;;  %v2488_v18 = vrot.slane %v2486_v33, 5 }
 0x167   : > { %v5394_v57 = vrot.slane %v6522_v9, 9  ;;  %v2474_v1 = vrot.slane %v2473_v43, 4  ;;  %v2484_v31 = vrot.slane %v2483_v48, 4  ;;  %v4400_v25 = vrot.slane %v4398_v13, 4 }
 0x168   : > { %v4401_v58 = vrot.slane %v8136_v40, 5  ;;  %v2493_v62 = vrot.slane %v2491_v35, 4  ;;  %v2496_v10 = vrot.slane %v2494_v0, 5  ;;  %v2502_v34 = vrot.slane %v2500_v30, 5 }
 0x169   : > { %v2506_v23 = vrot.slane %v2504_v5, 4  ;;  %v2455_v63 = vsel %vm6763_vm5, %v2450_v41, %v8566_v32  ;;  %v2465_v42 = vsel %vm6763_vm5, %v2460_v51, %v2464_v61  ;;  %v4392_v50 = vsel %vm7022_vm8, %v5393_v49, %v4391_v53  ;;  %v8654_v41 = vld [vmem:[%s8774_s4] ss:$0 sm:$0xff] }
 0x16a   : > { %v4395_v12 = vsel %vm7022_vm8, %v4393_v6, %v4394_v44  ;;  %v2479_v40 = vsel %vm6763_vm5, %v2474_v1, %v8568_v14  ;;  %v4399_v24 = vsel %vm7022_vm8, %v5394_v57, %v4398_v13  ;;  %v4402_v52 = vsel %vm7022_vm8, %v4400_v25, %v4401_v58 }
 0x16b   : > { %6043 = vmatmul.mubr.msk.bf16.gmra.mrb[20].mxu0 %vm822_vm4, %v5408_v29  ;;  %v2510_v17 = vshll.u32 %v6523_v47, 16  ;;  %v2489_v15 = vsel %vm6763_vm5, %v2484_v31, %v2488_v18  ;;  %v2497_v19 = vor.u32 %v2496_v10, %v2493_v62  ;;  %v2507_v2 = vor.u32 %v2506_v23, %v2502_v34 }
 0x16c   : > { %5907 = vmatmul.mubr.msk.bf16.gmra.mrb[20].mxu1 %vm822_vm4, %v5244_v55  ;;  %6046 = vmatprep.mubr.msk.bf16.mxu0 %vm822_vm4, %v5409_v22  ;;  %v4405_v32 = vrot.slane %v6524_v26, 5  ;;  %v5246_v16 = vcombine.low %v2455_v63, %v2465_v42  ;;  %v5410_v20 = vcombine.low %v4392_v50, %v4395_v12  ;;  %v5247_v56 = vcombine.low %v2479_v40, %v2489_v15  ;;  %v6525_v55 = vld [vmem:[%s7340_s27 + $0xb4] sm:$0xf]  ;;  %s6530_s27 = sshll.u32 %s6607_s24, 4  ;;  %s6531_s27 = int_to_ptr.vmem [resolvable:$false] %s6530_s27 }
 0x16d   : > { %5910 = vmatprep.mubr.msk.bf16.mxu1 %vm822_vm4, %v5245_v7  ;;  %v5411_v14 = vcombine.low %v4399_v24, %v4402_v52  ;;  %v2512_v3 = vrot.slane %v2510_v17, 5  ;;  %v5395_v29 = vrot.slane %v6525_v55, 9  ;;  %v2498_v11 = vrot.slane %v2497_v19, 4  ;;  %s6532_s16 = scalar_lea.vmem %s6531_s27, 4096  ;;  %p6533_p1 = scmp.lt.s32.totalorder %s8718_s12, %s6531_s27 }
 0x16e   : > { %v2508_v38 = vrot.slane %v2507_v2, 4  ;;  %v4407_v8 = vrot.slane %v4405_v32, 4  ;;  %v4408_v36 = vrot.slane %v8166_v21, 5  ;;  %p6534_p2 = scmp.lt.s32.totalorder %s6532_s16, %s6526_s17 }
 0x16f   : > { %v4406_v28 = vsel %vm7022_vm8, %v5395_v29, %v4405_v32  ;;  %v2503_v45 = vsel %vm6763_vm5, %v2498_v11, %v2502_v34 }
 0x170   : > { %v2513_v59 = vsel %vm6763_vm5, %v2508_v38, %v2512_v3  ;;  %v4409_v21 = vsel %vm7022_vm8, %v4407_v8, %v4408_v36  ;;  %p6535_p3 = por %p6534_p2, %p6533_p1 }
 0x171   : > { %v5248_v27 = vcombine.low %v2503_v45, %v2513_v59  ;;  %v5412_v54 = vcombine.low %v4406_v28, %v4409_v21 }
 0x172   : > { %p6536_p5 = pnand %p6535_p3, %p6529_p0 }
 0x173   : > { %6047 = vmatmul.mubr.msk.bf16.gmra.mrb[24].mxu0 %vm822_vm4, %v5410_v20 }
 0x174   : > { %5911 = vmatmul.mubr.msk.bf16.gmra.mrb[24].mxu1 %vm822_vm4, %v5246_v16  ;;  %6050 = vmatprep.mubr.msk.bf16.mxu0 %vm822_vm4, %v5411_v14 }
 0x175   : > { %5914 = vmatprep.mubr.msk.bf16.mxu1 %vm822_vm4, %v5247_v56 }
 0x17b   : > { %6051 = vmatmul.mubr.msk.bf16.gmra.mrb[28].mxu0 %vm822_vm4, %v5412_v54 }
 0x17c   : > { %5915 = vmatmul.mubr.msk.bf16.gmra.mrb[28].mxu1 %vm822_vm4, %v5248_v27 }
 0x1f4   : > { %v5854_v49 = vpop.f32.mrb[0].mxu1 }
 0x1f5   : > { %v1971_v60 = vpop.f32.mrb[1].mxu1 }
 0x1f6   : > { %v5855_v53 = vpop.f32.mrb[2].mxu1 }
 0x1f7   : > { %v1974_v46 = vpop.f32.mrb[3].mxu1 }
 0x1fd   : > { %v5858_v33 = vpop.f32.mrb[4].mxu1 }
 0x1fe   : > { %v1987_v7 = vpop.f32.mrb[5].mxu1 }
 0x1ff   : > { %v5859_v43 = vpop.f32.mrb[6].mxu1 }
 0x200   : > { %v1990_v48 = vpop.f32.mrb[7].mxu1 }
 0x205   : > { %v5862_v37 = vpop.f32.mrb[8].mxu1 }
 0x206   : > { %v2003_v4 = vpop.f32.mrb[9].mxu1 }
 0x207   : > { %v5863_v13 = vpop.f32.mrb[10].mxu1 }
 0x208   : > { %v2006_v39 = vpop.f32.mrb[11].mxu1 }
 0x20d   : > { %v8643_v35 = vpop.f32.mrb[12].mxu1 }
 0x20e   : > { %v8645_v0 = vpop.f32.mrb[13].mxu1 }
 0x20f   : > { %v8647_v30 = vpop.f32.mrb[14].mxu1 }
 0x210   : > { %v8649_v5 = vpop.f32.mrb[15].mxu1 }
 0x216   : > { %v6024_v22 = vpop.f32.mrb[0].mxu0 }
 0x217   : > { %v6056_v61 = vadd.f32 %v6024_v22, %v5854_v49  ;;  %v4545_v44 = vpop.f32.mrb[1].mxu0 }
 0x218   : > { %v6057_v51 = vadd.f32 %v4545_v44, %v1971_v60  ;;  %v6025_v6 = vpop.f32.mrb[2].mxu0 }
 0x219   : > { %v4713_v18 = vadd.f32 %v6056_v61, %v8654_v41  ;;  %v6058_v9 = vadd.f32 %v6025_v6, %v5855_v53  ;;  %v4548_v57 = vpop.f32.mrb[3].mxu0 }
 0x21a   : > { %v4711_v1 = vadd.f32 %v6057_v51, %v8654_v41  ;;  %v6059_v31 = vadd.f32 %v4548_v57, %v1974_v46 }
 0x21b   : > { %v4714_v25 = vadd.f32 %v6058_v9, %v8654_v41  ;;  %v4745_v62 = vmax.f32 %v4713_v18, 0.0 }
 0x21c   : > { %v4712_v58 = vadd.f32 %v6059_v31, %v8654_v41  ;;  %v4743_v34 = vmax.f32 %v4711_v1, 0.0 }
 0x21d   : > { %v4746_v10 = vmax.f32 %v4714_v25, 0.0 }
 0x21e   : > { %v4744_v23 = vmax.f32 %v4712_v58, 0.0  ;;  %v6028_v63 = vpop.f32.mrb[4].mxu0 }
 0x21f   : > { %v5508_v42 = vpack.c.bf16 %v4746_v10, %v4745_v62  ;;  %v6060_v50 = vadd.f32 %v6028_v63, %v5858_v33  ;;  %v4561_v12 = vpop.f32.mrb[5].mxu0 }
 0x220   : > { %v5503_v40 = vpack.c.bf16 %v4744_v23, %v4743_v34  ;;  %v6061_v24 = vadd.f32 %v4561_v12, %v1987_v7  ;;  %v6029_v52 = vpop.f32.mrb[6].mxu0 }
 0x221   : > { %5580 = vst [vmem:[%s8663_s10 + $0x8] sm:$0xff] %v5508_v42   ;;  %v4717_v47 = vadd.f32 %v6060_v50, %v8654_v41  ;;  %v6062_v17 = vadd.f32 %v6029_v52, %v5859_v43  ;;  %v4564_v15 = vpop.f32.mrb[7].mxu0 }
 0x222   : > { %5504 = vst [vmem:[%s8663_s10] sm:$0xff] %v5503_v40   ;;  %v4715_v19 = vadd.f32 %v6061_v24, %v8654_v41  ;;  %v6063_v2 = vadd.f32 %v4564_v15, %v1990_v48 }
 0x223   : > { %v4718_v26 = vadd.f32 %v6062_v17, %v8654_v41  ;;  %v4749_v16 = vmax.f32 %v4717_v47, 0.0 }
 0x224   : > { %v4716_v32 = vadd.f32 %v6063_v2, %v8654_v41  ;;  %v4747_v56 = vmax.f32 %v4715_v19, 0.0 }
 0x225   : > { %v4750_v20 = vmax.f32 %v4718_v26, 0.0 }
 0x226   : > { %v4748_v14 = vmax.f32 %v4716_v32, 0.0  ;;  %v6032_v3 = vpop.f32.mrb[8].mxu0 }
 0x227   : > { %v5518_v55 = vpack.c.bf16 %v4750_v20, %v4749_v16  ;;  %v6064_v29 = vadd.f32 %v6032_v3, %v5862_v37  ;;  %v4577_v11 = vpop.f32.mrb[9].mxu0 }
 0x228   : > { %v5513_v38 = vpack.c.bf16 %v4748_v14, %v4747_v56  ;;  %v6065_v8 = vadd.f32 %v4577_v11, %v2003_v4  ;;  %v6033_v36 = vpop.f32.mrb[10].mxu0 }
 0x229   : > { %5582 = vst [vmem:[%s8663_s10 + $0x18] sm:$0xff] %v5518_v55   ;;  %v4721_v28 = vadd.f32 %v6064_v29, %v8654_v41  ;;  %v6066_v45 = vadd.f32 %v6033_v36, %v5863_v13  ;;  %v4580_v59 = vpop.f32.mrb[11].mxu0 }
 0x22a   : > { %5581 = vst [vmem:[%s8663_s10 + $0x10] sm:$0xff] %v5513_v38   ;;  %v4719_v21 = vadd.f32 %v6065_v8, %v8654_v41  ;;  %v6067_v27 = vadd.f32 %v4580_v59, %v2006_v39 }
 0x22b   : > { %v4722_v54 = vadd.f32 %v6066_v45, %v8654_v41  ;;  %v4753_v60 = vmax.f32 %v4721_v28, 0.0 }
 0x22c   : > { %v4720_v49 = vadd.f32 %v6067_v27, %v8654_v41  ;;  %v4751_v46 = vmax.f32 %v4719_v21, 0.0 }
 0x22d   : > { %v4754_v53 = vmax.f32 %v4722_v54, 0.0 }
 0x22e   : > { %v4752_v33 = vmax.f32 %v4720_v49, 0.0  ;;  %v6036_v7 = vpop.f32.mrb[12].mxu0 }
 0x22f   : > { %v5528_v43 = vpack.c.bf16 %v4754_v53, %v4753_v60  ;;  %v6068_v48 = vadd.f32 %v6036_v7, %v8643_v35  ;;  %v4593_v37 = vpop.f32.mrb[13].mxu0 }
 0x230   : > { %v5523_v4 = vpack.c.bf16 %v4752_v33, %v4751_v46  ;;  %v6069_v13 = vadd.f32 %v4593_v37, %v8645_v0  ;;  %v6037_v22 = vpop.f32.mrb[14].mxu0 }
 0x231   : > { %5584 = vst [vmem:[%s8663_s10 + $0x28] sm:$0xff] %v5528_v43   ;;  %v4725_v39 = vadd.f32 %v6068_v48, %v8654_v41  ;;  %v6070_v61 = vadd.f32 %v6037_v22, %v8647_v30  ;;  %v4596_v44 = vpop.f32.mrb[15].mxu0 }
 0x232   : > { %5583 = vst [vmem:[%s8663_s10 + $0x20] sm:$0xff] %v5523_v4   ;;  %v4723_v51 = vadd.f32 %v6069_v13, %v8654_v41  ;;  %v6071_v6 = vadd.f32 %v4596_v44, %v8649_v5 }
 0x233   : > { %v4726_v18 = vadd.f32 %v6070_v61, %v8654_v41  ;;  %v4757_v9 = vmax.f32 %v4725_v39, 0.0 }
 0x234   : > { %v4724_v35 = vadd.f32 %v6071_v6, %v8654_v41  ;;  %v4755_v0 = vmax.f32 %v4723_v51, 0.0 }
 0x235   : > { %v4758_v57 = vmax.f32 %v4726_v18, 0.0 }
 0x236   : > { %v4756_v1 = vmax.f32 %v4724_v35, 0.0  ;;  %v6040_v25 = vpop.f32.mrb[16].mxu0 }
 0x237   : > { %v5904_v31 = vpop.f32.mrb[16].mxu1  ;;  %v5538_v58 = vpack.c.bf16 %v4758_v57, %v4757_v9  ;;  %v4609_v10 = vpop.f32.mrb[17].mxu0 }
 0x238   : > { %v6072_v30 = vadd.f32 %v6040_v25, %v5904_v31  ;;  %v2713_v62 = vpop.f32.mrb[17].mxu1  ;;  %v5533_v34 = vpack.c.bf16 %v4756_v1, %v4755_v0  ;;  %v6041_v5 = vpop.f32.mrb[18].mxu0 }
 0x239   : > { %v6073_v23 = vadd.f32 %v4609_v10, %v2713_v62  ;;  %v5905_v63 = vpop.f32.mrb[18].mxu1  ;;  %5586 = vst [vmem:[%s8663_s10 + $0x38] sm:$0xff] %v5538_v58   ;;  %v4612_v40 = vpop.f32.mrb[19].mxu0 }
 0x23a   : > { %v4729_v42 = vadd.f32 %v6072_v30, %v8654_v41  ;;  %v6074_v50 = vadd.f32 %v6041_v5, %v5905_v63  ;;  %v2716_v12 = vpop.f32.mrb[19].mxu1  ;;  %5585 = vst [vmem:[%s8663_s10 + $0x30] sm:$0xff] %v5533_v34  }
 0x23b   : > { %v4727_v24 = vadd.f32 %v6073_v23, %v8654_v41  ;;  %v6075_v52 = vadd.f32 %v4612_v40, %v2716_v12 }
 0x23c   : > { %v4730_v47 = vadd.f32 %v6074_v50, %v8654_v41  ;;  %v4761_v15 = vmax.f32 %v4729_v42, 0.0 }
 0x23d   : > { %v4728_v17 = vadd.f32 %v6075_v52, %v8654_v41  ;;  %v4759_v2 = vmax.f32 %v4727_v24, 0.0 }
 0x23e   : > { %v4762_v19 = vmax.f32 %v4730_v47, 0.0  ;;  %v6044_v16 = vpop.f32.mrb[20].mxu0 }
 0x23f   : > { %v4760_v26 = vmax.f32 %v4728_v17, 0.0  ;;  %v5908_v32 = vpop.f32.mrb[20].mxu1  ;;  %v4625_v3 = vpop.f32.mrb[21].mxu0 }
 0x240   : > { %v5548_v20 = vpack.c.bf16 %v4762_v19, %v4761_v15  ;;  %v6076_v56 = vadd.f32 %v6044_v16, %v5908_v32  ;;  %v2729_v14 = vpop.f32.mrb[21].mxu1  ;;  %v6045_v38 = vpop.f32.mrb[22].mxu0 }
 0x241   : > { %v5543_v55 = vpack.c.bf16 %v4760_v26, %v4759_v2  ;;  %v6077_v29 = vadd.f32 %v4625_v3, %v2729_v14  ;;  %v5909_v11 = vpop.f32.mrb[22].mxu1  ;;  %v4628_v45 = vpop.f32.mrb[23].mxu0 }
 0x242   : > { %5588 = vst [vmem:[%s8663_s10 + $0x48] sm:$0xff] %v5548_v20   ;;  %v4733_v8 = vadd.f32 %v6076_v56, %v8654_v41  ;;  %v6078_v36 = vadd.f32 %v6045_v38, %v5909_v11  ;;  %v2732_v28 = vpop.f32.mrb[23].mxu1 }
 0x243   : > { %5587 = vst [vmem:[%s8663_s10 + $0x40] sm:$0xff] %v5543_v55   ;;  %v4731_v59 = vadd.f32 %v6077_v29, %v8654_v41  ;;  %v6079_v21 = vadd.f32 %v4628_v45, %v2732_v28 }
 0x244   : > { %v4734_v27 = vadd.f32 %v6078_v36, %v8654_v41  ;;  %v4765_v49 = vmax.f32 %v4733_v8, 0.0 }
 0x245   : > { %v4732_v54 = vadd.f32 %v6079_v21, %v8654_v41  ;;  %v4763_v53 = vmax.f32 %v4731_v59, 0.0 }
 0x246   : > { %v4766_v60 = vmax.f32 %v4734_v27, 0.0  ;;  %v6048_v7 = vpop.f32.mrb[24].mxu0 }
 0x247   : > { %v4764_v46 = vmax.f32 %v4732_v54, 0.0  ;;  %v5912_v33 = vpop.f32.mrb[24].mxu1  ;;  %v4641_v4 = vpop.f32.mrb[25].mxu0 }
 0x248   : > { %v5558_v43 = vpack.c.bf16 %v4766_v60, %v4765_v49  ;;  %v6080_v48 = vadd.f32 %v6048_v7, %v5912_v33  ;;  %v2745_v37 = vpop.f32.mrb[25].mxu1  ;;  %v6049_v61 = vpop.f32.mrb[26].mxu0 }
 0x249   : > { %v5553_v13 = vpack.c.bf16 %v4764_v46, %v4763_v53  ;;  %v6081_v22 = vadd.f32 %v4641_v4, %v2745_v37  ;;  %v5913_v39 = vpop.f32.mrb[26].mxu1  ;;  %v4644_v18 = vpop.f32.mrb[27].mxu0 }
 0x24a   : > { %5590 = vst [vmem:[%s8663_s10 + $0x58] sm:$0xff] %v5558_v43   ;;  %v4737_v44 = vadd.f32 %v6080_v48, %v8654_v41  ;;  %v6082_v51 = vadd.f32 %v6049_v61, %v5913_v39  ;;  %v2748_v6 = vpop.f32.mrb[27].mxu1 }
 0x24b   : > { %5589 = vst [vmem:[%s8663_s10 + $0x50] sm:$0xff] %v5553_v13   ;;  %v4735_v35 = vadd.f32 %v6081_v22, %v8654_v41  ;;  %v6083_v9 = vadd.f32 %v4644_v18, %v2748_v6 }
 0x24c   : > { %v4738_v57 = vadd.f32 %v6082_v51, %v8654_v41  ;;  %v4769_v1 = vmax.f32 %v4737_v44, 0.0 }
 0x24d   : > { %v4736_v0 = vadd.f32 %v6083_v9, %v8654_v41  ;;  %v4767_v25 = vmax.f32 %v4735_v35, 0.0 }
 0x24e   : > { %v4770_v31 = vmax.f32 %v4738_v57, 0.0  ;;  %v6052_v62 = vpop.f32.mrb[28].mxu0 }
 0x24f   : > { %v4768_v58 = vmax.f32 %v4736_v0, 0.0  ;;  %v5916_v30 = vpop.f32.mrb[28].mxu1  ;;  %v4657_v63 = vpop.f32.mrb[29].mxu0 }
 0x250   : > { %v5568_v10 = vpack.c.bf16 %v4770_v31, %v4769_v1  ;;  %v6084_v34 = vadd.f32 %v6052_v62, %v5916_v30  ;;  %v2761_v23 = vpop.f32.mrb[29].mxu1  ;;  %v6053_v12 = vpop.f32.mrb[30].mxu0 }
 0x251   : > { %v5563_v5 = vpack.c.bf16 %v4768_v58, %v4767_v25  ;;  %v6085_v42 = vadd.f32 %v4657_v63, %v2761_v23  ;;  %v5917_v50 = vpop.f32.mrb[30].mxu1  ;;  %v4660_v47 = vpop.f32.mrb[31].mxu0 }
 0x252   : > { %5592 = vst [vmem:[%s8663_s10 + $0x68] sm:$0xff] %v5568_v10   ;;  %v4741_v40 = vadd.f32 %v6084_v34, %v8654_v41  ;;  %v6086_v24 = vadd.f32 %v6053_v12, %v5917_v50  ;;  %v2764_v52 = vpop.f32.mrb[31].mxu1 }
 0x253   : > { %5591 = vst [vmem:[%s8663_s10 + $0x60] sm:$0xff] %v5563_v5   ;;  %v4739_v17 = vadd.f32 %v6085_v42, %v8654_v41  ;;  %v6087_v15 = vadd.f32 %v4660_v47, %v2764_v52 }
 0x254   : > { %v4742_v19 = vadd.f32 %v6086_v24, %v8654_v41  ;;  %v4773_v26 = vmax.f32 %v4741_v40, 0.0 }
 0x255   : > { %v4740_v2 = vadd.f32 %v6087_v15, %v8654_v41  ;;  %v4771_v16 = vmax.f32 %v4739_v17, 0.0 }
 0x256   : > { %v4774_v32 = vmax.f32 %v4742_v19, 0.0 }
 0x257   : > { %v4772_v20 = vmax.f32 %v4740_v2, 0.0 }
 0x258   : > { %v5578_v56 = vpack.c.bf16 %v4774_v32, %v4773_v26 }
 0x259   : > { %v5573_v14 = vpack.c.bf16 %v4772_v20, %v4771_v16 }
 0x25a   : > { %5594 = vst [vmem:[%s8663_s10 + $0x78] sm:$0xff] %v5578_v56  }
 0x25b   : > { %5593 = vst [vmem:[%s8663_s10 + $0x70] sm:$0xff] %v5573_v14  }
 0x25c   : > { %6539 = shalt.err (!%p6536_p5)
}
 0x25d   : > { %s6540_s29 = scalar_lea.hbm %s8716_s15, 2048  ;;  %s6544_s8 = scalar_lea.hbm %s8775_s5, 4096 }
 0x25e   : > { %p6541_p6 = scmp.ne.s32.totalorder %s8716_s15, %s6540_s29  ;;  %p6545_p10 = scmp.lt.u32.totalorder %s8716_s15, %s8775_s5 }
 0x25f   : > { %p6546_p11 = scmp.lt.u32.totalorder %s6544_s8, %s6540_s29  ;;  %p6548_p13 = scmp.lt.u32.totalorder %s6540_s29, %s8716_s15 }
 0x260   : > { %p6542_p7 = pnand %p6541_p6, %p6680_p4 }
 0x261   : > { %p6547_p12 = por %p6546_p11, %p6545_p10 }
 0x262   : > { %p6543_p9 = pneg %p6542_p7 }
 0x263   : > { %p6549_p0 = por %p6548_p13, %p6547_p12 }
 0x265   : > { %p6550_p1 = pnand %p6549_p0, %p6543_p9 }
 0x267   : > { %6553 = shalt.err (!%p6550_p1)
}
 0x268   : > { %s6608_s11 = smov 64   ;;  %s6609_s13 = smov 4  }
 0x269   : > { %6313 = dma.vmem_to_hbm [thread:$0]  (%p6680_p4), %s8718_s12, 2048, %s8716_s15, %s8724_s21, %s6608_s11, %s6608_s11, %s6609_s13  }
 0x26a PF: > { %p6319_p2 = scmp.ge.s32.totalorder %s6604_s23, 2  ;;  %s4967_s14 = sand.u32 1, %s6584_s18  }
 0x26b   : > { %s4968_s17 = scalar_lea.sflag [#allocation3], %s4967_s14 }
 0x26c   : > { %p6316_p3 = pnand %p6319_p2, %p6687_p8 }
 0x26e   : > { %6579 = dma.done.wait (!%p6316_p3), %s4968_s17, 2048  }
 0x26f   : > { %6581 = vsyncadd (!%p6316_p3), %s4968_s17, 4294965248  ;;  %s18_s23 = sadd.s32 1, %s6604_s23   ;;  %s8908_s18 = smov %s6588_s19 }
 0x270   : > { %p15_p5 = scmp.ge.s32.totalorder %s18_s23, 4   ;;  %s8909_s19 = smov %s6592_s20 }
 0x271   : > { %s8910_s20 = smov %s6693_s6  ;;  %s8911_s21 = smov %s6600_s22 }
 0x272   : > { %s8912_s22 = smov %s8914_s26  ;;  %17 = sbr.rel (!%p15_p5) target bundleno = 4 (0x4), region = 89 }
 0x279   :  { %4973 = vsyncpa [#allocation3], 1 }
 0x27a   :  { %4975 = vsyncpa [#allocation3 + $0x1], 1 }

</bundles_post_ra>
